<compile_context>
chip_gen: v6e
topology: v6e:2x2x1
jax: 0.10.0
libtpu: 0.0.40
codegen_flags: <defaults>
</compile_context>

<pallas_src>
import numpy as np
import jax
import jax.numpy as jnp
from jax.experimental import pallas as pl
from jax.experimental.pallas import tpu as pltpu


# Padded (lane-aligned) widths.
_C1P = 128   # conv1 out channels: 50  -> 128
_C2P = 256   # conv2 out channels: 200 -> 256
_F1P = 256   # fc1 width:          200 -> 256
_F2P = 256   # fc2 width:          200 -> 256


def _round_up(v, m):
    return (v + m - 1) // m * m


# --------------------------------------------------------------------------
# Host-side constant builder: 0/1 selection matrices for stride-2 3x3 im2col.
# G[t, o, p] = 1 iff flattened input pixel p is tap t of flattened output o.
# --------------------------------------------------------------------------
def _make_selection(h, w, kh, kw, stride):
    oh = (h - kh) // stride + 1
    ow = (w - kw) // stride + 1
    g = np.zeros((kh * kw, oh * ow, h * w), np.float32)
    for ky in range(kh):
        for kx in range(kw):
            t = ky * kw + kx
            for oy in range(oh):
                for ox in range(ow):
                    g[t, oy * ow + ox,
                      (stride * oy + ky) * w + (stride * ox + kx)] = 1.0
    return g, oh, ow


# --------------------------------------------------------------------------
# Parameters (PyTorch layouts) and one-time preparation (fold / pad / cast).
# --------------------------------------------------------------------------
def init_params(key, input_shapes, num_classes):
    C_in, H, W = input_shapes
    oh1 = (H - 3) // 2 + 1
    ow1 = (W - 3) // 2 + 1
    oh2 = (oh1 - 3) // 2 + 1
    ow2 = (ow1 - 3) // 2 + 1
    num_elem = 200 * oh2 * ow2

    ks = jax.random.split(key, 8)
    f32 = jnp.float32
    return {
        "conv1_w": 0.1 * jax.random.normal(ks[0], (50, C_in, 3, 3), f32),
        "conv1_b": 0.01 * jax.random.normal(ks[1], (50,), f32),
        "bn_gamma": jnp.ones((50,), f32),
        "bn_beta": jnp.zeros((50,), f32),
        "bn_mean": jnp.zeros((50,), f32),
        "bn_var": jnp.ones((50,), f32),
        "conv2_w": 0.05 * jax.random.normal(ks[2], (200, 50, 3, 3), f32),
        "conv2_b": 0.01 * jax.random.normal(ks[3], (200,), f32),
        "fc1_w": 0.02 * jax.random.normal(ks[4], (200, num_elem), f32),
        "fc1_b": jnp.zeros((200,), f32),
        "fc2_w": 0.05 * jax.random.normal(ks[5], (200, 200), f32),
        "fc2_b": jnp.zeros((200,), f32),
        "fc3_w": 0.05 * jax.random.normal(ks[6], (num_classes, 200), f32),
        "fc3_b": jnp.zeros((num_classes,), f32),
    }


def prepare_params(params, input_shapes, num_classes):
    """Fold BN/bias, permute fc1 to channels-last order, pad to lane multiples,
    cast to bf16. Done once, outside the per-call path."""
    C_in, H, W = input_shapes
    assert C_in == 1, "model spec is Conv2d(1, 50, 3, 2)"
    eps = 1e-5
    f32, bf16 = jnp.float32, jnp.bfloat16

    g1_np, oh1, ow1 = _make_selection(H, W, 3, 3, 2)
    g2_np, oh2, ow2 = _make_selection(oh1, ow1, 3, 3, 2)
    s2n = oh2 * ow2
    ncp = _round_up(max(num_classes, 128), 128)

    # conv1 (+ folded BatchNorm, eval mode)
    bn_scale = params["bn_gamma"] / jnp.sqrt(params["bn_var"] + eps)        # (50,)
    w1 = params["conv1_w"][:, 0, :, :] * bn_scale[:, None, None]            # (50,3,3)
    w1 = jnp.transpose(w1, (1, 2, 0)).reshape(9, 1, 50)                     # (tap,1,50)
    w1 = jnp.pad(w1, ((0, 0), (0, 7), (0, _C1P - 50)))                      # (9,8,C1P)
    s1 = (params["conv1_b"] * bn_scale + params["bn_beta"]
          - params["bn_mean"] * bn_scale)
    s1 = jnp.pad(s1, (0, _C1P - 50)).reshape(1, _C1P)

    # conv2
    w2 = jnp.transpose(params["conv2_w"], (2, 3, 1, 0)).reshape(9, 50, 200)  # (tap,ci,co)
    w2 = jnp.pad(w2, ((0, 0), (0, _C1P - 50), (0, _C2P - 200)))
    s2 = jnp.pad(params["conv2_b"], (0, _C2P - 200)).reshape(1, _C2P)

    # fc1: PyTorch flatten order is (c, oy, ox) -> reorder columns to (s, c)
    fw = params["fc1_w"].reshape(200, 200, s2n)        # (j, c, s)
    fw = jnp.transpose(fw, (2, 1, 0))                  # (s, c, j)
    fw = jnp.pad(fw, ((0, 0), (0, _C2P - 200), (0, _F1P - 200)))
    sf1 = jnp.pad(params["fc1_b"], (0, _F1P - 200)).reshape(1, _F1P)

    # fc2 / fc3
    fc2 = jnp.pad(params["fc2_w"].T, ((0, _F1P - 200), (0, _F2P - 200)))
    sf2 = jnp.pad(params["fc2_b"], (0, _F2P - 200)).reshape(1, _F2P)
    fc3 = jnp.pad(params["fc3_w"].T, ((0, _F2P - 200), (0, ncp - num_classes)))
    sf3 = jnp.pad(params["fc3_b"], (0, ncp - num_classes)).reshape(1, ncp)

    return {
        "g1": jnp.asarray(g1_np, bf16), "g2": jnp.asarray(g2_np, bf16),
        "w1": w1.astype(bf16), "s1": s1.astype(f32),
        "w2": w2.astype(bf16), "s2": s2.astype(f32),
        "fc1": fw.astype(bf16), "sf1": sf1.astype(f32),
        "fc2": fc2.astype(bf16), "sf2": sf2.astype(f32),
        "fc3": fc3.astype(bf16), "sf3": sf3.astype(f32),
        "dims": (H, W, oh1, ow1, oh2, ow2, num_classes, ncp),
    }


# --------------------------------------------------------------------------
# Single fused Pallas kernel: one image per grid step, everything in VMEM.
# --------------------------------------------------------------------------
def _fused_forward_kernel(x_ref, g1_ref, g2_ref, w1_ref, s1_ref, w2_ref, s2_ref,
                          fc1_ref, sf1_ref, fc2_ref, sf2_ref, fc3_ref, sf3_ref,
                          o_ref):
    f32, bf16 = jnp.float32, jnp.bfloat16
    n_tap = g1_ref.shape[0]          # 9
    ohw1 = g1_ref.shape[1]           # conv1 spatial (49)
    ohw2 = g2_ref.shape[1]           # conv2 spatial (9)
    c1p = w1_ref.shape[2]            # 128
    c2p = w2_ref.shape[2]            # 256
    f1p = fc1_ref.shape[2]           # 256

    x_in = x_ref[0]                  # (H*W, 8) bf16, channel 0 = image

    # ---- Conv2d(1, 50, 3, 2) + BN + ReLU (scale folded into weights) ----
    acc1 = jnp.zeros((ohw1, c1p), f32)
    for t in range(n_tap):
        patch = jnp.dot(g1_ref[t], x_in, preferred_element_type=f32)   # (ohw1, 8)
        acc1 = acc1 + jnp.dot(patch.astype(bf16), w1_ref[t],
                              preferred_element_type=f32)              # (ohw1, c1p)
    y1 = jnp.maximum(acc1 + s1_ref[...], 0.0).astype(bf16)             # (ohw1, c1p)

    # ---- Conv2d(50, 200, 3, 2) + bias + ReLU ----
    acc2 = jnp.zeros((ohw2, c2p), f32)
    for t in range(n_tap):
        p2 = jnp.dot(g2_ref[t], y1, preferred_element_type=f32).astype(bf16)  # (ohw2,c1p)
        acc2 = acc2 + jnp.dot(p2, w2_ref[t], preferred_element_type=f32)      # (ohw2,c2p)
    y2 = jnp.maximum(acc2 + s2_ref[...], 0.0).astype(bf16)             # (ohw2, c2p)

    # ---- Flatten + Linear(num_elem, 200) + ReLU ----
    # (NCHW flatten order is folded into fc1's (spatial, channel, out) layout)
    h = jnp.zeros((1, f1p), f32)
    for s in range(ohw2):
        h = h + jnp.dot(y2[s:s + 1, :], fc1_ref[s], preferred_element_type=f32)
    h1 = jnp.maximum(h + sf1_ref[...], 0.0).astype(bf16)               # (1, f1p)

    # ---- Linear(200, 200) + ReLU ----
    h2 = jnp.maximum(jnp.dot(h1, fc2_ref[...], preferred_element_type=f32)
                     + sf2_ref[...], 0.0).astype(bf16)                 # (1, f2p)

    # ---- Linear(200, num_classes) ----
    logits = jnp.dot(h2, fc3_ref[...], preferred_element_type=f32) + sf3_ref[...]
    o_ref[0] = logits.astype(o_ref.dtype)                              # (1, ncp)


def speech_command_classifier_forward(x, prep):
    """x: (B, 1, H, W) float32 NCHW. Eval-mode forward (Dropout = identity)."""
    H, W, oh1, ow1, oh2, ow2, num_classes, ncp = prep["dims"]
    B = x.shape[0]
    HW = H * W

    # Channels-last per-image column of pixels, zero-padded to 8 lanes.
    x_in = jnp.pad(x.reshape(B, HW, 1).astype(jnp.bfloat16),
                   ((0, 0), (0, 0), (0, 7)))

    def _full(a):
        nd = a.ndim
        return pl.BlockSpec(a.shape, lambda b, _n=nd: (0,) * _n)

    operands = (x_in, prep["g1"], prep["g2"], prep["w1"], prep["s1"],
                prep["w2"], prep["s2"], prep["fc1"], prep["sf1"],
                prep["fc2"], prep["sf2"], prep["fc3"], prep["sf3"])

    out = pl.pallas_call(
        _fused_forward_kernel,
        out_shape=jax.ShapeDtypeStruct((B, 1, ncp), jnp.float32),
        grid=(B,),
        in_specs=[pl.BlockSpec((1, HW, 8), lambda b: (b, 0, 0))]
                 + [_full(a) for a in operands[1:]],
        out_specs=pl.BlockSpec((1, 1, ncp), lambda b: (b, 0, 0)),
        compiler_params=pltpu.CompilerParams(
            dimension_semantics=("parallel",)),
    )(*operands)

    return out.reshape(B, ncp)[:, :num_classes]


# --------------------------------------------------------------------------
# Pure-JAX f32 reference (faithful to the PyTorch module, eval mode).
# --------------------------------------------------------------------------
def reference_forward(x, params):
    eps = 1e-5
    y = jax.lax.conv_general_dilated(
        x, params["conv1_w"], window_strides=(2, 2), padding="VALID",
        dimension_numbers=("NCHW", "OIHW", "NCHW"))
    y = y + params["conv1_b"][None, :, None, None]
    y = ((y - params["bn_mean"][None, :, None, None])
         / jnp.sqrt(params["bn_var"] + eps)[None, :, None, None]
         * params["bn_gamma"][None, :, None, None]
         + params["bn_beta"][None, :, None, None])
    y = jnp.maximum(y, 0.0)
    y = jax.lax.conv_general_dilated(
        y, params["conv2_w"], window_strides=(2, 2), padding="VALID",
        dimension_numbers=("NCHW", "OIHW", "NCHW"))
    y = y + params["conv2_b"][None, :, None, None]
    y = jnp.maximum(y, 0.0)
    feat = y.reshape(y.shape[0], -1)
    h = jnp.maximum(feat @ params["fc1_w"].T + params["fc1_b"], 0.0)
    h = jnp.maximum(h @ params["fc2_w"].T + params["fc2_b"], 0.0)
    return h @ params["fc3_w"].T + params["fc3_b"]


if __name__ == "__main__":
    # TODO(synk): Dropout layers are identity (eval mode); training-mode
    # stochastic dropout is not reproduced.
    key = jax.random.PRNGKey(0)
    k_param, k_x = jax.random.split(key)

    input_shapes = (1, 16, 16)   # (C_in, H, W) -> 7x7 -> 3x3, num_elem = 1800
    num_classes = 10
    batch = 2

    params = init_params(k_param, input_shapes, num_classes)
    prep = prepare_params(params, input_shapes, num_classes)
    x = jax.random.uniform(k_x, (batch,) + input_shapes, jnp.float32)

    logits = speech_command_classifier_forward(x, prep)
    jax.block_until_ready(logits)
    assert logits.shape == (batch, num_classes), logits.shape

    ref = reference_forward(x, params)
    err = float(jnp.max(jnp.abs(logits - ref)))
    assert err < 5e-2, f"mismatch vs f32 reference: max abs err = {err}"

    print("KERNEL_OK")
</pallas_src>

<mosaic_0001>
module attributes {stable_mosaic.version = 11 : i64} {
  func.func @_fused_forward_kernel(%arg0: i32, %arg1: memref<1x256x8xbf16, #tpu.memory_space<vmem>>, %arg2: memref<9x49x256xbf16, #tpu.memory_space<vmem>>, %arg3: memref<9x9x49xbf16, #tpu.memory_space<vmem>>, %arg4: memref<9x8x128xbf16, #tpu.memory_space<vmem>>, %arg5: memref<1x128xf32, #tpu.memory_space<vmem>>, %arg6: memref<9x128x256xbf16, #tpu.memory_space<vmem>>, %arg7: memref<1x256xf32, #tpu.memory_space<vmem>>, %arg8: memref<9x256x256xbf16, #tpu.memory_space<vmem>>, %arg9: memref<1x256xf32, #tpu.memory_space<vmem>>, %arg10: memref<256x256xbf16, #tpu.memory_space<vmem>>, %arg11: memref<1x256xf32, #tpu.memory_space<vmem>>, %arg12: memref<256x128xbf16, #tpu.memory_space<vmem>>, %arg13: memref<1x128xf32, #tpu.memory_space<vmem>>, %arg14: memref<1x1x128xf32, #tpu.memory_space<vmem>>) attributes {dimension_semantics = [#tpu.dimension_semantics<parallel>], iteration_bounds = array<i64: 2>, scalar_prefetch = 0 : i64, scratch_operands = 0 : i64, tpu.core_type = #tpu.core_type<tc>, window_params = [{transform_indices = @transform_0, window_bounds = array<i64: 1, 256, 8>}, {pipeline_mode = #tpu.pipeline_mode<synchronous>, transform_indices = @transform_1, window_bounds = array<i64: 9, 49, 256>}, {pipeline_mode = #tpu.pipeline_mode<synchronous>, transform_indices = @transform_2, window_bounds = array<i64: 9, 9, 49>}, {pipeline_mode = #tpu.pipeline_mode<synchronous>, transform_indices = @transform_3, window_bounds = array<i64: 9, 8, 128>}, {pipeline_mode = #tpu.pipeline_mode<synchronous>, transform_indices = @transform_4, window_bounds = array<i64: 1, 128>}, {pipeline_mode = #tpu.pipeline_mode<synchronous>, transform_indices = @transform_5, window_bounds = array<i64: 9, 128, 256>}, {pipeline_mode = #tpu.pipeline_mode<synchronous>, transform_indices = @transform_6, window_bounds = array<i64: 1, 256>}, {pipeline_mode = #tpu.pipeline_mode<synchronous>, transform_indices = @transform_7, window_bounds = array<i64: 9, 256, 256>}, {pipeline_mode = #tpu.pipeline_mode<synchronous>, transform_indices = @transform_8, window_bounds = array<i64: 1, 256>}, {pipeline_mode = #tpu.pipeline_mode<synchronous>, transform_indices = @transform_9, window_bounds = array<i64: 256, 256>}, {pipeline_mode = #tpu.pipeline_mode<synchronous>, transform_indices = @transform_10, window_bounds = array<i64: 1, 256>}, {pipeline_mode = #tpu.pipeline_mode<synchronous>, transform_indices = @transform_11, window_bounds = array<i64: 256, 128>}, {pipeline_mode = #tpu.pipeline_mode<synchronous>, transform_indices = @transform_12, window_bounds = array<i64: 1, 128>}, {transform_indices = @transform_13, window_bounds = array<i64: 1, 1, 128>}]} {
    %c0 = arith.constant 0 : index
    %c0_0 = arith.constant 0 : index
    %c0_1 = arith.constant 0 : index
    %0 = vector.load %arg1[%c0, %c0_0, %c0_1] : memref<1x256x8xbf16, #tpu.memory_space<vmem>>, vector<1x256x8xbf16>
    %1 = vector.shape_cast %0 : vector<1x256x8xbf16> to vector<256x8xbf16>
    %cst = arith.constant 0.000000e+00 : f32
    %2 = vector.broadcast %cst : f32 to vector<49x128xf32>
    %c0_2 = arith.constant 0 : index
    %c0_3 = arith.constant 0 : index
    %c0_4 = arith.constant 0 : index
    %3 = vector.load %arg2[%c0_2, %c0_3, %c0_4] : memref<9x49x256xbf16, #tpu.memory_space<vmem>>, vector<1x49x256xbf16>
    %4 = vector.shape_cast %3 : vector<1x49x256xbf16> to vector<49x256xbf16>
    %cst_5 = arith.constant dense<0.000000e+00> : vector<49x8xf32>
    %5 = tpu.matmul %4, %1, %cst_5 {dimension_numbers = #tpu.dot_dimension_numbers<[1], [0], [0], [1], [0, 0, 1, 1], [], []>} : vector<49x256xbf16>, vector<256x8xbf16>, vector<49x8xf32> -> vector<49x8xf32>
    %6 = arith.truncf %5 : vector<49x8xf32> to vector<49x8xbf16>
    %c0_6 = arith.constant 0 : index
    %c0_7 = arith.constant 0 : index
    %c0_8 = arith.constant 0 : index
    %7 = vector.load %arg4[%c0_6, %c0_7, %c0_8] : memref<9x8x128xbf16, #tpu.memory_space<vmem>>, vector<1x8x128xbf16>
    %8 = vector.shape_cast %7 : vector<1x8x128xbf16> to vector<8x128xbf16>
    %cst_9 = arith.constant dense<0.000000e+00> : vector<49x128xf32>
    %9 = tpu.matmul %6, %8, %cst_9 {dimension_numbers = #tpu.dot_dimension_numbers<[1], [0], [0], [1], [0, 0, 1, 1], [], []>} : vector<49x8xbf16>, vector<8x128xbf16>, vector<49x128xf32> -> vector<49x128xf32>
    %10 = arith.addf %2, %9 : vector<49x128xf32>
    %c1 = arith.constant 1 : index
    %c0_10 = arith.constant 0 : index
    %c0_11 = arith.constant 0 : index
    %11 = vector.load %arg2[%c1, %c0_10, %c0_11] : memref<9x49x256xbf16, #tpu.memory_space<vmem>>, vector<1x49x256xbf16>
    %12 = vector.shape_cast %11 : vector<1x49x256xbf16> to vector<49x256xbf16>
    %cst_12 = arith.constant dense<0.000000e+00> : vector<49x8xf32>
    %13 = tpu.matmul %12, %1, %cst_12 {dimension_numbers = #tpu.dot_dimension_numbers<[1], [0], [0], [1], [0, 0, 1, 1], [], []>} : vector<49x256xbf16>, vector<256x8xbf16>, vector<49x8xf32> -> vector<49x8xf32>
    %14 = arith.truncf %13 : vector<49x8xf32> to vector<49x8xbf16>
    %c1_13 = arith.constant 1 : index
    %c0_14 = arith.constant 0 : index
    %c0_15 = arith.constant 0 : index
    %15 = vector.load %arg4[%c1_13, %c0_14, %c0_15] : memref<9x8x128xbf16, #tpu.memory_space<vmem>>, vector<1x8x128xbf16>
    %16 = vector.shape_cast %15 : vector<1x8x128xbf16> to vector<8x128xbf16>
    %cst_16 = arith.constant dense<0.000000e+00> : vector<49x128xf32>
    %17 = tpu.matmul %14, %16, %cst_16 {dimension_numbers = #tpu.dot_dimension_numbers<[1], [0], [0], [1], [0, 0, 1, 1], [], []>} : vector<49x8xbf16>, vector<8x128xbf16>, vector<49x128xf32> -> vector<49x128xf32>
    %18 = arith.addf %10, %17 : vector<49x128xf32>
    %c2 = arith.constant 2 : index
    %c0_17 = arith.constant 0 : index
    %c0_18 = arith.constant 0 : index
    %19 = vector.load %arg2[%c2, %c0_17, %c0_18] : memref<9x49x256xbf16, #tpu.memory_space<vmem>>, vector<1x49x256xbf16>
    %20 = vector.shape_cast %19 : vector<1x49x256xbf16> to vector<49x256xbf16>
    %cst_19 = arith.constant dense<0.000000e+00> : vector<49x8xf32>
    %21 = tpu.matmul %20, %1, %cst_19 {dimension_numbers = #tpu.dot_dimension_numbers<[1], [0], [0], [1], [0, 0, 1, 1], [], []>} : vector<49x256xbf16>, vector<256x8xbf16>, vector<49x8xf32> -> vector<49x8xf32>
    %22 = arith.truncf %21 : vector<49x8xf32> to vector<49x8xbf16>
    %c2_20 = arith.constant 2 : index
    %c0_21 = arith.constant 0 : index
    %c0_22 = arith.constant 0 : index
    %23 = vector.load %arg4[%c2_20, %c0_21, %c0_22] : memref<9x8x128xbf16, #tpu.memory_space<vmem>>, vector<1x8x128xbf16>
    %24 = vector.shape_cast %23 : vector<1x8x128xbf16> to vector<8x128xbf16>
    %cst_23 = arith.constant dense<0.000000e+00> : vector<49x128xf32>
    %25 = tpu.matmul %22, %24, %cst_23 {dimension_numbers = #tpu.dot_dimension_numbers<[1], [0], [0], [1], [0, 0, 1, 1], [], []>} : vector<49x8xbf16>, vector<8x128xbf16>, vector<49x128xf32> -> vector<49x128xf32>
    %26 = arith.addf %18, %25 : vector<49x128xf32>
    %c3 = arith.constant 3 : index
    %c0_24 = arith.constant 0 : index
    %c0_25 = arith.constant 0 : index
    %27 = vector.load %arg2[%c3, %c0_24, %c0_25] : memref<9x49x256xbf16, #tpu.memory_space<vmem>>, vector<1x49x256xbf16>
    %28 = vector.shape_cast %27 : vector<1x49x256xbf16> to vector<49x256xbf16>
    %cst_26 = arith.constant dense<0.000000e+00> : vector<49x8xf32>
    %29 = tpu.matmul %28, %1, %cst_26 {dimension_numbers = #tpu.dot_dimension_numbers<[1], [0], [0], [1], [0, 0, 1, 1], [], []>} : vector<49x256xbf16>, vector<256x8xbf16>, vector<49x8xf32> -> vector<49x8xf32>
    %30 = arith.truncf %29 : vector<49x8xf32> to vector<49x8xbf16>
    %c3_27 = arith.constant 3 : index
    %c0_28 = arith.constant 0 : index
    %c0_29 = arith.constant 0 : index
    %31 = vector.load %arg4[%c3_27, %c0_28, %c0_29] : memref<9x8x128xbf16, #tpu.memory_space<vmem>>, vector<1x8x128xbf16>
    %32 = vector.shape_cast %31 : vector<1x8x128xbf16> to vector<8x128xbf16>
    %cst_30 = arith.constant dense<0.000000e+00> : vector<49x128xf32>
    %33 = tpu.matmul %30, %32, %cst_30 {dimension_numbers = #tpu.dot_dimension_numbers<[1], [0], [0], [1], [0, 0, 1, 1], [], []>} : vector<49x8xbf16>, vector<8x128xbf16>, vector<49x128xf32> -> vector<49x128xf32>
    %34 = arith.addf %26, %33 : vector<49x128xf32>
    %c4 = arith.constant 4 : index
    %c0_31 = arith.constant 0 : index
    %c0_32 = arith.constant 0 : index
    %35 = vector.load %arg2[%c4, %c0_31, %c0_32] : memref<9x49x256xbf16, #tpu.memory_space<vmem>>, vector<1x49x256xbf16>
    %36 = vector.shape_cast %35 : vector<1x49x256xbf16> to vector<49x256xbf16>
    %cst_33 = arith.constant dense<0.000000e+00> : vector<49x8xf32>
    %37 = tpu.matmul %36, %1, %cst_33 {dimension_numbers = #tpu.dot_dimension_numbers<[1], [0], [0], [1], [0, 0, 1, 1], [], []>} : vector<49x256xbf16>, vector<256x8xbf16>, vector<49x8xf32> -> vector<49x8xf32>
    %38 = arith.truncf %37 : vector<49x8xf32> to vector<49x8xbf16>
    %c4_34 = arith.constant 4 : index
    %c0_35 = arith.constant 0 : index
    %c0_36 = arith.constant 0 : index
    %39 = vector.load %arg4[%c4_34, %c0_35, %c0_36] : memref<9x8x128xbf16, #tpu.memory_space<vmem>>, vector<1x8x128xbf16>
    %40 = vector.shape_cast %39 : vector<1x8x128xbf16> to vector<8x128xbf16>
    %cst_37 = arith.constant dense<0.000000e+00> : vector<49x128xf32>
    %41 = tpu.matmul %38, %40, %cst_37 {dimension_numbers = #tpu.dot_dimension_numbers<[1], [0], [0], [1], [0, 0, 1, 1], [], []>} : vector<49x8xbf16>, vector<8x128xbf16>, vector<49x128xf32> -> vector<49x128xf32>
    %42 = arith.addf %34, %41 : vector<49x128xf32>
    %c5 = arith.constant 5 : index
    %c0_38 = arith.constant 0 : index
    %c0_39 = arith.constant 0 : index
    %43 = vector.load %arg2[%c5, %c0_38, %c0_39] : memref<9x49x256xbf16, #tpu.memory_space<vmem>>, vector<1x49x256xbf16>
    %44 = vector.shape_cast %43 : vector<1x49x256xbf16> to vector<49x256xbf16>
    %cst_40 = arith.constant dense<0.000000e+00> : vector<49x8xf32>
    %45 = tpu.matmul %44, %1, %cst_40 {dimension_numbers = #tpu.dot_dimension_numbers<[1], [0], [0], [1], [0, 0, 1, 1], [], []>} : vector<49x256xbf16>, vector<256x8xbf16>, vector<49x8xf32> -> vector<49x8xf32>
    %46 = arith.truncf %45 : vector<49x8xf32> to vector<49x8xbf16>
    %c5_41 = arith.constant 5 : index
    %c0_42 = arith.constant 0 : index
    %c0_43 = arith.constant 0 : index
    %47 = vector.load %arg4[%c5_41, %c0_42, %c0_43] : memref<9x8x128xbf16, #tpu.memory_space<vmem>>, vector<1x8x128xbf16>
    %48 = vector.shape_cast %47 : vector<1x8x128xbf16> to vector<8x128xbf16>
    %cst_44 = arith.constant dense<0.000000e+00> : vector<49x128xf32>
    %49 = tpu.matmul %46, %48, %cst_44 {dimension_numbers = #tpu.dot_dimension_numbers<[1], [0], [0], [1], [0, 0, 1, 1], [], []>} : vector<49x8xbf16>, vector<8x128xbf16>, vector<49x128xf32> -> vector<49x128xf32>
    %50 = arith.addf %42, %49 : vector<49x128xf32>
    %c6 = arith.constant 6 : index
    %c0_45 = arith.constant 0 : index
    %c0_46 = arith.constant 0 : index
    %51 = vector.load %arg2[%c6, %c0_45, %c0_46] : memref<9x49x256xbf16, #tpu.memory_space<vmem>>, vector<1x49x256xbf16>
    %52 = vector.shape_cast %51 : vector<1x49x256xbf16> to vector<49x256xbf16>
    %cst_47 = arith.constant dense<0.000000e+00> : vector<49x8xf32>
    %53 = tpu.matmul %52, %1, %cst_47 {dimension_numbers = #tpu.dot_dimension_numbers<[1], [0], [0], [1], [0, 0, 1, 1], [], []>} : vector<49x256xbf16>, vector<256x8xbf16>, vector<49x8xf32> -> vector<49x8xf32>
    %54 = arith.truncf %53 : vector<49x8xf32> to vector<49x8xbf16>
    %c6_48 = arith.constant 6 : index
    %c0_49 = arith.constant 0 : index
    %c0_50 = arith.constant 0 : index
    %55 = vector.load %arg4[%c6_48, %c0_49, %c0_50] : memref<9x8x128xbf16, #tpu.memory_space<vmem>>, vector<1x8x128xbf16>
    %56 = vector.shape_cast %55 : vector<1x8x128xbf16> to vector<8x128xbf16>
    %cst_51 = arith.constant dense<0.000000e+00> : vector<49x128xf32>
    %57 = tpu.matmul %54, %56, %cst_51 {dimension_numbers = #tpu.dot_dimension_numbers<[1], [0], [0], [1], [0, 0, 1, 1], [], []>} : vector<49x8xbf16>, vector<8x128xbf16>, vector<49x128xf32> -> vector<49x128xf32>
    %58 = arith.addf %50, %57 : vector<49x128xf32>
    %c7 = arith.constant 7 : index
    %c0_52 = arith.constant 0 : index
    %c0_53 = arith.constant 0 : index
    %59 = vector.load %arg2[%c7, %c0_52, %c0_53] : memref<9x49x256xbf16, #tpu.memory_space<vmem>>, vector<1x49x256xbf16>
    %60 = vector.shape_cast %59 : vector<1x49x256xbf16> to vector<49x256xbf16>
    %cst_54 = arith.constant dense<0.000000e+00> : vector<49x8xf32>
    %61 = tpu.matmul %60, %1, %cst_54 {dimension_numbers = #tpu.dot_dimension_numbers<[1], [0], [0], [1], [0, 0, 1, 1], [], []>} : vector<49x256xbf16>, vector<256x8xbf16>, vector<49x8xf32> -> vector<49x8xf32>
    %62 = arith.truncf %61 : vector<49x8xf32> to vector<49x8xbf16>
    %c7_55 = arith.constant 7 : index
    %c0_56 = arith.constant 0 : index
    %c0_57 = arith.constant 0 : index
    %63 = vector.load %arg4[%c7_55, %c0_56, %c0_57] : memref<9x8x128xbf16, #tpu.memory_space<vmem>>, vector<1x8x128xbf16>
    %64 = vector.shape_cast %63 : vector<1x8x128xbf16> to vector<8x128xbf16>
    %cst_58 = arith.constant dense<0.000000e+00> : vector<49x128xf32>
    %65 = tpu.matmul %62, %64, %cst_58 {dimension_numbers = #tpu.dot_dimension_numbers<[1], [0], [0], [1], [0, 0, 1, 1], [], []>} : vector<49x8xbf16>, vector<8x128xbf16>, vector<49x128xf32> -> vector<49x128xf32>
    %66 = arith.addf %58, %65 : vector<49x128xf32>
    %c8 = arith.constant 8 : index
    %c0_59 = arith.constant 0 : index
    %c0_60 = arith.constant 0 : index
    %67 = vector.load %arg2[%c8, %c0_59, %c0_60] : memref<9x49x256xbf16, #tpu.memory_space<vmem>>, vector<1x49x256xbf16>
    %68 = vector.shape_cast %67 : vector<1x49x256xbf16> to vector<49x256xbf16>
    %cst_61 = arith.constant dense<0.000000e+00> : vector<49x8xf32>
    %69 = tpu.matmul %68, %1, %cst_61 {dimension_numbers = #tpu.dot_dimension_numbers<[1], [0], [0], [1], [0, 0, 1, 1], [], []>} : vector<49x256xbf16>, vector<256x8xbf16>, vector<49x8xf32> -> vector<49x8xf32>
    %70 = arith.truncf %69 : vector<49x8xf32> to vector<49x8xbf16>
    %c8_62 = arith.constant 8 : index
    %c0_63 = arith.constant 0 : index
    %c0_64 = arith.constant 0 : index
    %71 = vector.load %arg4[%c8_62, %c0_63, %c0_64] : memref<9x8x128xbf16, #tpu.memory_space<vmem>>, vector<1x8x128xbf16>
    %72 = vector.shape_cast %71 : vector<1x8x128xbf16> to vector<8x128xbf16>
    %cst_65 = arith.constant dense<0.000000e+00> : vector<49x128xf32>
    %73 = tpu.matmul %70, %72, %cst_65 {dimension_numbers = #tpu.dot_dimension_numbers<[1], [0], [0], [1], [0, 0, 1, 1], [], []>} : vector<49x8xbf16>, vector<8x128xbf16>, vector<49x128xf32> -> vector<49x128xf32>
    %74 = arith.addf %66, %73 : vector<49x128xf32>
    %c0_66 = arith.constant 0 : index
    %c0_67 = arith.constant 0 : index
    %75 = vector.load %arg5[%c0_66, %c0_67] : memref<1x128xf32, #tpu.memory_space<vmem>>, vector<1x128xf32>
    %76 = vector.broadcast %75 : vector<1x128xf32> to vector<49x128xf32>
    %77 = arith.addf %74, %76 : vector<49x128xf32>
    %cst_68 = arith.constant 0.000000e+00 : f32
    %78 = vector.broadcast %cst_68 : f32 to vector<49x128xf32>
    %79 = arith.maximumf %77, %78 : vector<49x128xf32>
    %80 = arith.truncf %79 : vector<49x128xf32> to vector<49x128xbf16>
    %cst_69 = arith.constant 0.000000e+00 : f32
    %81 = vector.broadcast %cst_69 : f32 to vector<9x256xf32>
    %c0_70 = arith.constant 0 : index
    %c0_71 = arith.constant 0 : index
    %c0_72 = arith.constant 0 : index
    %82 = vector.load %arg3[%c0_70, %c0_71, %c0_72] : memref<9x9x49xbf16, #tpu.memory_space<vmem>>, vector<1x9x49xbf16>
    %83 = vector.shape_cast %82 : vector<1x9x49xbf16> to vector<9x49xbf16>
    %cst_73 = arith.constant dense<0.000000e+00> : vector<9x128xf32>
    %84 = tpu.matmul %83, %80, %cst_73 {dimension_numbers = #tpu.dot_dimension_numbers<[1], [0], [0], [1], [0, 0, 1, 1], [], []>} : vector<9x49xbf16>, vector<49x128xbf16>, vector<9x128xf32> -> vector<9x128xf32>
    %85 = arith.truncf %84 : vector<9x128xf32> to vector<9x128xbf16>
    %c0_74 = arith.constant 0 : index
    %c0_75 = arith.constant 0 : index
    %c0_76 = arith.constant 0 : index
    %86 = vector.load %arg6[%c0_74, %c0_75, %c0_76] : memref<9x128x256xbf16, #tpu.memory_space<vmem>>, vector<1x128x256xbf16>
    %87 = vector.shape_cast %86 : vector<1x128x256xbf16> to vector<128x256xbf16>
    %cst_77 = arith.constant dense<0.000000e+00> : vector<9x256xf32>
    %88 = tpu.matmul %85, %87, %cst_77 {dimension_numbers = #tpu.dot_dimension_numbers<[1], [0], [0], [1], [0, 0, 1, 1], [], []>} : vector<9x128xbf16>, vector<128x256xbf16>, vector<9x256xf32> -> vector<9x256xf32>
    %89 = arith.addf %81, %88 : vector<9x256xf32>
    %c1_78 = arith.constant 1 : index
    %c0_79 = arith.constant 0 : index
    %c0_80 = arith.constant 0 : index
    %90 = vector.load %arg3[%c1_78, %c0_79, %c0_80] : memref<9x9x49xbf16, #tpu.memory_space<vmem>>, vector<1x9x49xbf16>
    %91 = vector.shape_cast %90 : vector<1x9x49xbf16> to vector<9x49xbf16>
    %cst_81 = arith.constant dense<0.000000e+00> : vector<9x128xf32>
    %92 = tpu.matmul %91, %80, %cst_81 {dimension_numbers = #tpu.dot_dimension_numbers<[1], [0], [0], [1], [0, 0, 1, 1], [], []>} : vector<9x49xbf16>, vector<49x128xbf16>, vector<9x128xf32> -> vector<9x128xf32>
    %93 = arith.truncf %92 : vector<9x128xf32> to vector<9x128xbf16>
    %c1_82 = arith.constant 1 : index
    %c0_83 = arith.constant 0 : index
    %c0_84 = arith.constant 0 : index
    %94 = vector.load %arg6[%c1_82, %c0_83, %c0_84] : memref<9x128x256xbf16, #tpu.memory_space<vmem>>, vector<1x128x256xbf16>
    %95 = vector.shape_cast %94 : vector<1x128x256xbf16> to vector<128x256xbf16>
    %cst_85 = arith.constant dense<0.000000e+00> : vector<9x256xf32>
    %96 = tpu.matmul %93, %95, %cst_85 {dimension_numbers = #tpu.dot_dimension_numbers<[1], [0], [0], [1], [0, 0, 1, 1], [], []>} : vector<9x128xbf16>, vector<128x256xbf16>, vector<9x256xf32> -> vector<9x256xf32>
    %97 = arith.addf %89, %96 : vector<9x256xf32>
    %c2_86 = arith.constant 2 : index
    %c0_87 = arith.constant 0 : index
    %c0_88 = arith.constant 0 : index
    %98 = vector.load %arg3[%c2_86, %c0_87, %c0_88] : memref<9x9x49xbf16, #tpu.memory_space<vmem>>, vector<1x9x49xbf16>
    %99 = vector.shape_cast %98 : vector<1x9x49xbf16> to vector<9x49xbf16>
    %cst_89 = arith.constant dense<0.000000e+00> : vector<9x128xf32>
    %100 = tpu.matmul %99, %80, %cst_89 {dimension_numbers = #tpu.dot_dimension_numbers<[1], [0], [0], [1], [0, 0, 1, 1], [], []>} : vector<9x49xbf16>, vector<49x128xbf16>, vector<9x128xf32> -> vector<9x128xf32>
    %101 = arith.truncf %100 : vector<9x128xf32> to vector<9x128xbf16>
    %c2_90 = arith.constant 2 : index
    %c0_91 = arith.constant 0 : index
    %c0_92 = arith.constant 0 : index
    %102 = vector.load %arg6[%c2_90, %c0_91, %c0_92] : memref<9x128x256xbf16, #tpu.memory_space<vmem>>, vector<1x128x256xbf16>
    %103 = vector.shape_cast %102 : vector<1x128x256xbf16> to vector<128x256xbf16>
    %cst_93 = arith.constant dense<0.000000e+00> : vector<9x256xf32>
    %104 = tpu.matmul %101, %103, %cst_93 {dimension_numbers = #tpu.dot_dimension_numbers<[1], [0], [0], [1], [0, 0, 1, 1], [], []>} : vector<9x128xbf16>, vector<128x256xbf16>, vector<9x256xf32> -> vector<9x256xf32>
    %105 = arith.addf %97, %104 : vector<9x256xf32>
    %c3_94 = arith.constant 3 : index
    %c0_95 = arith.constant 0 : index
    %c0_96 = arith.constant 0 : index
    %106 = vector.load %arg3[%c3_94, %c0_95, %c0_96] : memref<9x9x49xbf16, #tpu.memory_space<vmem>>, vector<1x9x49xbf16>
    %107 = vector.shape_cast %106 : vector<1x9x49xbf16> to vector<9x49xbf16>
    %cst_97 = arith.constant dense<0.000000e+00> : vector<9x128xf32>
    %108 = tpu.matmul %107, %80, %cst_97 {dimension_numbers = #tpu.dot_dimension_numbers<[1], [0], [0], [1], [0, 0, 1, 1], [], []>} : vector<9x49xbf16>, vector<49x128xbf16>, vector<9x128xf32> -> vector<9x128xf32>
    %109 = arith.truncf %108 : vector<9x128xf32> to vector<9x128xbf16>
    %c3_98 = arith.constant 3 : index
    %c0_99 = arith.constant 0 : index
    %c0_100 = arith.constant 0 : index
    %110 = vector.load %arg6[%c3_98, %c0_99, %c0_100] : memref<9x128x256xbf16, #tpu.memory_space<vmem>>, vector<1x128x256xbf16>
    %111 = vector.shape_cast %110 : vector<1x128x256xbf16> to vector<128x256xbf16>
    %cst_101 = arith.constant dense<0.000000e+00> : vector<9x256xf32>
    %112 = tpu.matmul %109, %111, %cst_101 {dimension_numbers = #tpu.dot_dimension_numbers<[1], [0], [0], [1], [0, 0, 1, 1], [], []>} : vector<9x128xbf16>, vector<128x256xbf16>, vector<9x256xf32> -> vector<9x256xf32>
    %113 = arith.addf %105, %112 : vector<9x256xf32>
    %c4_102 = arith.constant 4 : index
    %c0_103 = arith.constant 0 : index
    %c0_104 = arith.constant 0 : index
    %114 = vector.load %arg3[%c4_102, %c0_103, %c0_104] : memref<9x9x49xbf16, #tpu.memory_space<vmem>>, vector<1x9x49xbf16>
    %115 = vector.shape_cast %114 : vector<1x9x49xbf16> to vector<9x49xbf16>
    %cst_105 = arith.constant dense<0.000000e+00> : vector<9x128xf32>
    %116 = tpu.matmul %115, %80, %cst_105 {dimension_numbers = #tpu.dot_dimension_numbers<[1], [0], [0], [1], [0, 0, 1, 1], [], []>} : vector<9x49xbf16>, vector<49x128xbf16>, vector<9x128xf32> -> vector<9x128xf32>
    %117 = arith.truncf %116 : vector<9x128xf32> to vector<9x128xbf16>
    %c4_106 = arith.constant 4 : index
    %c0_107 = arith.constant 0 : index
    %c0_108 = arith.constant 0 : index
    %118 = vector.load %arg6[%c4_106, %c0_107, %c0_108] : memref<9x128x256xbf16, #tpu.memory_space<vmem>>, vector<1x128x256xbf16>
    %119 = vector.shape_cast %118 : vector<1x128x256xbf16> to vector<128x256xbf16>
    %cst_109 = arith.constant dense<0.000000e+00> : vector<9x256xf32>
    %120 = tpu.matmul %117, %119, %cst_109 {dimension_numbers = #tpu.dot_dimension_numbers<[1], [0], [0], [1], [0, 0, 1, 1], [], []>} : vector<9x128xbf16>, vector<128x256xbf16>, vector<9x256xf32> -> vector<9x256xf32>
    %121 = arith.addf %113, %120 : vector<9x256xf32>
    %c5_110 = arith.constant 5 : index
    %c0_111 = arith.constant 0 : index
    %c0_112 = arith.constant 0 : index
    %122 = vector.load %arg3[%c5_110, %c0_111, %c0_112] : memref<9x9x49xbf16, #tpu.memory_space<vmem>>, vector<1x9x49xbf16>
    %123 = vector.shape_cast %122 : vector<1x9x49xbf16> to vector<9x49xbf16>
    %cst_113 = arith.constant dense<0.000000e+00> : vector<9x128xf32>
    %124 = tpu.matmul %123, %80, %cst_113 {dimension_numbers = #tpu.dot_dimension_numbers<[1], [0], [0], [1], [0, 0, 1, 1], [], []>} : vector<9x49xbf16>, vector<49x128xbf16>, vector<9x128xf32> -> vector<9x128xf32>
    %125 = arith.truncf %124 : vector<9x128xf32> to vector<9x128xbf16>
    %c5_114 = arith.constant 5 : index
    %c0_115 = arith.constant 0 : index
    %c0_116 = arith.constant 0 : index
    %126 = vector.load %arg6[%c5_114, %c0_115, %c0_116] : memref<9x128x256xbf16, #tpu.memory_space<vmem>>, vector<1x128x256xbf16>
    %127 = vector.shape_cast %126 : vector<1x128x256xbf16> to vector<128x256xbf16>
    %cst_117 = arith.constant dense<0.000000e+00> : vector<9x256xf32>
    %128 = tpu.matmul %125, %127, %cst_117 {dimension_numbers = #tpu.dot_dimension_numbers<[1], [0], [0], [1], [0, 0, 1, 1], [], []>} : vector<9x128xbf16>, vector<128x256xbf16>, vector<9x256xf32> -> vector<9x256xf32>
    %129 = arith.addf %121, %128 : vector<9x256xf32>
    %c6_118 = arith.constant 6 : index
    %c0_119 = arith.constant 0 : index
    %c0_120 = arith.constant 0 : index
    %130 = vector.load %arg3[%c6_118, %c0_119, %c0_120] : memref<9x9x49xbf16, #tpu.memory_space<vmem>>, vector<1x9x49xbf16>
    %131 = vector.shape_cast %130 : vector<1x9x49xbf16> to vector<9x49xbf16>
    %cst_121 = arith.constant dense<0.000000e+00> : vector<9x128xf32>
    %132 = tpu.matmul %131, %80, %cst_121 {dimension_numbers = #tpu.dot_dimension_numbers<[1], [0], [0], [1], [0, 0, 1, 1], [], []>} : vector<9x49xbf16>, vector<49x128xbf16>, vector<9x128xf32> -> vector<9x128xf32>
    %133 = arith.truncf %132 : vector<9x128xf32> to vector<9x128xbf16>
    %c6_122 = arith.constant 6 : index
    %c0_123 = arith.constant 0 : index
    %c0_124 = arith.constant 0 : index
    %134 = vector.load %arg6[%c6_122, %c0_123, %c0_124] : memref<9x128x256xbf16, #tpu.memory_space<vmem>>, vector<1x128x256xbf16>
    %135 = vector.shape_cast %134 : vector<1x128x256xbf16> to vector<128x256xbf16>
    %cst_125 = arith.constant dense<0.000000e+00> : vector<9x256xf32>
    %136 = tpu.matmul %133, %135, %cst_125 {dimension_numbers = #tpu.dot_dimension_numbers<[1], [0], [0], [1], [0, 0, 1, 1], [], []>} : vector<9x128xbf16>, vector<128x256xbf16>, vector<9x256xf32> -> vector<9x256xf32>
    %137 = arith.addf %129, %136 : vector<9x256xf32>
    %c7_126 = arith.constant 7 : index
    %c0_127 = arith.constant 0 : index
    %c0_128 = arith.constant 0 : index
    %138 = vector.load %arg3[%c7_126, %c0_127, %c0_128] : memref<9x9x49xbf16, #tpu.memory_space<vmem>>, vector<1x9x49xbf16>
    %139 = vector.shape_cast %138 : vector<1x9x49xbf16> to vector<9x49xbf16>
    %cst_129 = arith.constant dense<0.000000e+00> : vector<9x128xf32>
    %140 = tpu.matmul %139, %80, %cst_129 {dimension_numbers = #tpu.dot_dimension_numbers<[1], [0], [0], [1], [0, 0, 1, 1], [], []>} : vector<9x49xbf16>, vector<49x128xbf16>, vector<9x128xf32> -> vector<9x128xf32>
    %141 = arith.truncf %140 : vector<9x128xf32> to vector<9x128xbf16>
    %c7_130 = arith.constant 7 : index
    %c0_131 = arith.constant 0 : index
    %c0_132 = arith.constant 0 : index
    %142 = vector.load %arg6[%c7_130, %c0_131, %c0_132] : memref<9x128x256xbf16, #tpu.memory_space<vmem>>, vector<1x128x256xbf16>
    %143 = vector.shape_cast %142 : vector<1x128x256xbf16> to vector<128x256xbf16>
    %cst_133 = arith.constant dense<0.000000e+00> : vector<9x256xf32>
    %144 = tpu.matmul %141, %143, %cst_133 {dimension_numbers = #tpu.dot_dimension_numbers<[1], [0], [0], [1], [0, 0, 1, 1], [], []>} : vector<9x128xbf16>, vector<128x256xbf16>, vector<9x256xf32> -> vector<9x256xf32>
    %145 = arith.addf %137, %144 : vector<9x256xf32>
    %c8_134 = arith.constant 8 : index
    %c0_135 = arith.constant 0 : index
    %c0_136 = arith.constant 0 : index
    %146 = vector.load %arg3[%c8_134, %c0_135, %c0_136] : memref<9x9x49xbf16, #tpu.memory_space<vmem>>, vector<1x9x49xbf16>
    %147 = vector.shape_cast %146 : vector<1x9x49xbf16> to vector<9x49xbf16>
    %cst_137 = arith.constant dense<0.000000e+00> : vector<9x128xf32>
    %148 = tpu.matmul %147, %80, %cst_137 {dimension_numbers = #tpu.dot_dimension_numbers<[1], [0], [0], [1], [0, 0, 1, 1], [], []>} : vector<9x49xbf16>, vector<49x128xbf16>, vector<9x128xf32> -> vector<9x128xf32>
    %149 = arith.truncf %148 : vector<9x128xf32> to vector<9x128xbf16>
    %c8_138 = arith.constant 8 : index
    %c0_139 = arith.constant 0 : index
    %c0_140 = arith.constant 0 : index
    %150 = vector.load %arg6[%c8_138, %c0_139, %c0_140] : memref<9x128x256xbf16, #tpu.memory_space<vmem>>, vector<1x128x256xbf16>
    %151 = vector.shape_cast %150 : vector<1x128x256xbf16> to vector<128x256xbf16>
    %cst_141 = arith.constant dense<0.000000e+00> : vector<9x256xf32>
    %152 = tpu.matmul %149, %151, %cst_141 {dimension_numbers = #tpu.dot_dimension_numbers<[1], [0], [0], [1], [0, 0, 1, 1], [], []>} : vector<9x128xbf16>, vector<128x256xbf16>, vector<9x256xf32> -> vector<9x256xf32>
    %153 = arith.addf %145, %152 : vector<9x256xf32>
    %c0_142 = arith.constant 0 : index
    %c0_143 = arith.constant 0 : index
    %154 = vector.load %arg7[%c0_142, %c0_143] : memref<1x256xf32, #tpu.memory_space<vmem>>, vector<1x256xf32>
    %155 = vector.broadcast %154 : vector<1x256xf32> to vector<9x256xf32>
    %156 = arith.addf %153, %155 : vector<9x256xf32>
    %cst_144 = arith.constant 0.000000e+00 : f32
    %157 = vector.broadcast %cst_144 : f32 to vector<9x256xf32>
    %158 = arith.maximumf %156, %157 : vector<9x256xf32>
    %159 = arith.truncf %158 : vector<9x256xf32> to vector<9x256xbf16>
    %cst_145 = arith.constant 0.000000e+00 : f32
    %160 = vector.broadcast %cst_145 : f32 to vector<1x256xf32>
    %161 = vector.extract_strided_slice %159 {offsets = [0, 0], sizes = [1, 256], strides = [1, 1]} : vector<9x256xbf16> to vector<1x256xbf16>
    %c0_146 = arith.constant 0 : index
    %c0_147 = arith.constant 0 : index
    %c0_148 = arith.constant 0 : index
    %162 = vector.load %arg8[%c0_146, %c0_147, %c0_148] : memref<9x256x256xbf16, #tpu.memory_space<vmem>>, vector<1x256x256xbf16>
    %163 = vector.shape_cast %162 : vector<1x256x256xbf16> to vector<256x256xbf16>
    %cst_149 = arith.constant dense<0.000000e+00> : vector<1x256xf32>
    %164 = tpu.matmul %161, %163, %cst_149 {dimension_numbers = #tpu.dot_dimension_numbers<[1], [0], [0], [1], [0, 0, 1, 1], [], []>} : vector<1x256xbf16>, vector<256x256xbf16>, vector<1x256xf32> -> vector<1x256xf32>
    %165 = arith.addf %160, %164 : vector<1x256xf32>
    %166 = vector.extract_strided_slice %159 {offsets = [1, 0], sizes = [1, 256], strides = [1, 1]} : vector<9x256xbf16> to vector<1x256xbf16>
    %c1_150 = arith.constant 1 : index
    %c0_151 = arith.constant 0 : index
    %c0_152 = arith.constant 0 : index
    %167 = vector.load %arg8[%c1_150, %c0_151, %c0_152] : memref<9x256x256xbf16, #tpu.memory_space<vmem>>, vector<1x256x256xbf16>
    %168 = vector.shape_cast %167 : vector<1x256x256xbf16> to vector<256x256xbf16>
    %cst_153 = arith.constant dense<0.000000e+00> : vector<1x256xf32>
    %169 = tpu.matmul %166, %168, %cst_153 {dimension_numbers = #tpu.dot_dimension_numbers<[1], [0], [0], [1], [0, 0, 1, 1], [], []>} : vector<1x256xbf16>, vector<256x256xbf16>, vector<1x256xf32> -> vector<1x256xf32>
    %170 = arith.addf %165, %169 : vector<1x256xf32>
    %171 = vector.extract_strided_slice %159 {offsets = [2, 0], sizes = [1, 256], strides = [1, 1]} : vector<9x256xbf16> to vector<1x256xbf16>
    %c2_154 = arith.constant 2 : index
    %c0_155 = arith.constant 0 : index
    %c0_156 = arith.constant 0 : index
    %172 = vector.load %arg8[%c2_154, %c0_155, %c0_156] : memref<9x256x256xbf16, #tpu.memory_space<vmem>>, vector<1x256x256xbf16>
    %173 = vector.shape_cast %172 : vector<1x256x256xbf16> to vector<256x256xbf16>
    %cst_157 = arith.constant dense<0.000000e+00> : vector<1x256xf32>
    %174 = tpu.matmul %171, %173, %cst_157 {dimension_numbers = #tpu.dot_dimension_numbers<[1], [0], [0], [1], [0, 0, 1, 1], [], []>} : vector<1x256xbf16>, vector<256x256xbf16>, vector<1x256xf32> -> vector<1x256xf32>
    %175 = arith.addf %170, %174 : vector<1x256xf32>
    %176 = vector.extract_strided_slice %159 {offsets = [3, 0], sizes = [1, 256], strides = [1, 1]} : vector<9x256xbf16> to vector<1x256xbf16>
    %c3_158 = arith.constant 3 : index
    %c0_159 = arith.constant 0 : index
    %c0_160 = arith.constant 0 : index
    %177 = vector.load %arg8[%c3_158, %c0_159, %c0_160] : memref<9x256x256xbf16, #tpu.memory_space<vmem>>, vector<1x256x256xbf16>
    %178 = vector.shape_cast %177 : vector<1x256x256xbf16> to vector<256x256xbf16>
    %cst_161 = arith.constant dense<0.000000e+00> : vector<1x256xf32>
    %179 = tpu.matmul %176, %178, %cst_161 {dimension_numbers = #tpu.dot_dimension_numbers<[1], [0], [0], [1], [0, 0, 1, 1], [], []>} : vector<1x256xbf16>, vector<256x256xbf16>, vector<1x256xf32> -> vector<1x256xf32>
    %180 = arith.addf %175, %179 : vector<1x256xf32>
    %181 = vector.extract_strided_slice %159 {offsets = [4, 0], sizes = [1, 256], strides = [1, 1]} : vector<9x256xbf16> to vector<1x256xbf16>
    %c4_162 = arith.constant 4 : index
    %c0_163 = arith.constant 0 : index
    %c0_164 = arith.constant 0 : index
    %182 = vector.load %arg8[%c4_162, %c0_163, %c0_164] : memref<9x256x256xbf16, #tpu.memory_space<vmem>>, vector<1x256x256xbf16>
    %183 = vector.shape_cast %182 : vector<1x256x256xbf16> to vector<256x256xbf16>
    %cst_165 = arith.constant dense<0.000000e+00> : vector<1x256xf32>
    %184 = tpu.matmul %181, %183, %cst_165 {dimension_numbers = #tpu.dot_dimension_numbers<[1], [0], [0], [1], [0, 0, 1, 1], [], []>} : vector<1x256xbf16>, vector<256x256xbf16>, vector<1x256xf32> -> vector<1x256xf32>
    %185 = arith.addf %180, %184 : vector<1x256xf32>
    %186 = vector.extract_strided_slice %159 {offsets = [5, 0], sizes = [1, 256], strides = [1, 1]} : vector<9x256xbf16> to vector<1x256xbf16>
    %c5_166 = arith.constant 5 : index
    %c0_167 = arith.constant 0 : index
    %c0_168 = arith.constant 0 : index
    %187 = vector.load %arg8[%c5_166, %c0_167, %c0_168] : memref<9x256x256xbf16, #tpu.memory_space<vmem>>, vector<1x256x256xbf16>
    %188 = vector.shape_cast %187 : vector<1x256x256xbf16> to vector<256x256xbf16>
    %cst_169 = arith.constant dense<0.000000e+00> : vector<1x256xf32>
    %189 = tpu.matmul %186, %188, %cst_169 {dimension_numbers = #tpu.dot_dimension_numbers<[1], [0], [0], [1], [0, 0, 1, 1], [], []>} : vector<1x256xbf16>, vector<256x256xbf16>, vector<1x256xf32> -> vector<1x256xf32>
    %190 = arith.addf %185, %189 : vector<1x256xf32>
    %191 = vector.extract_strided_slice %159 {offsets = [6, 0], sizes = [1, 256], strides = [1, 1]} : vector<9x256xbf16> to vector<1x256xbf16>
    %c6_170 = arith.constant 6 : index
    %c0_171 = arith.constant 0 : index
    %c0_172 = arith.constant 0 : index
    %192 = vector.load %arg8[%c6_170, %c0_171, %c0_172] : memref<9x256x256xbf16, #tpu.memory_space<vmem>>, vector<1x256x256xbf16>
    %193 = vector.shape_cast %192 : vector<1x256x256xbf16> to vector<256x256xbf16>
    %cst_173 = arith.constant dense<0.000000e+00> : vector<1x256xf32>
    %194 = tpu.matmul %191, %193, %cst_173 {dimension_numbers = #tpu.dot_dimension_numbers<[1], [0], [0], [1], [0, 0, 1, 1], [], []>} : vector<1x256xbf16>, vector<256x256xbf16>, vector<1x256xf32> -> vector<1x256xf32>
    %195 = arith.addf %190, %194 : vector<1x256xf32>
    %196 = vector.extract_strided_slice %159 {offsets = [7, 0], sizes = [1, 256], strides = [1, 1]} : vector<9x256xbf16> to vector<1x256xbf16>
    %c7_174 = arith.constant 7 : index
    %c0_175 = arith.constant 0 : index
    %c0_176 = arith.constant 0 : index
    %197 = vector.load %arg8[%c7_174, %c0_175, %c0_176] : memref<9x256x256xbf16, #tpu.memory_space<vmem>>, vector<1x256x256xbf16>
    %198 = vector.shape_cast %197 : vector<1x256x256xbf16> to vector<256x256xbf16>
    %cst_177 = arith.constant dense<0.000000e+00> : vector<1x256xf32>
    %199 = tpu.matmul %196, %198, %cst_177 {dimension_numbers = #tpu.dot_dimension_numbers<[1], [0], [0], [1], [0, 0, 1, 1], [], []>} : vector<1x256xbf16>, vector<256x256xbf16>, vector<1x256xf32> -> vector<1x256xf32>
    %200 = arith.addf %195, %199 : vector<1x256xf32>
    %201 = vector.extract_strided_slice %159 {offsets = [8, 0], sizes = [1, 256], strides = [1, 1]} : vector<9x256xbf16> to vector<1x256xbf16>
    %c8_178 = arith.constant 8 : index
    %c0_179 = arith.constant 0 : index
    %c0_180 = arith.constant 0 : index
    %202 = vector.load %arg8[%c8_178, %c0_179, %c0_180] : memref<9x256x256xbf16, #tpu.memory_space<vmem>>, vector<1x256x256xbf16>
    %203 = vector.shape_cast %202 : vector<1x256x256xbf16> to vector<256x256xbf16>
    %cst_181 = arith.constant dense<0.000000e+00> : vector<1x256xf32>
    %204 = tpu.matmul %201, %203, %cst_181 {dimension_numbers = #tpu.dot_dimension_numbers<[1], [0], [0], [1], [0, 0, 1, 1], [], []>} : vector<1x256xbf16>, vector<256x256xbf16>, vector<1x256xf32> -> vector<1x256xf32>
    %205 = arith.addf %200, %204 : vector<1x256xf32>
    %c0_182 = arith.constant 0 : index
    %c0_183 = arith.constant 0 : index
    %206 = vector.load %arg9[%c0_182, %c0_183] : memref<1x256xf32, #tpu.memory_space<vmem>>, vector<1x256xf32>
    %207 = arith.addf %205, %206 : vector<1x256xf32>
    %cst_184 = arith.constant 0.000000e+00 : f32
    %208 = vector.broadcast %cst_184 : f32 to vector<1x256xf32>
    %209 = arith.maximumf %207, %208 : vector<1x256xf32>
    %210 = arith.truncf %209 : vector<1x256xf32> to vector<1x256xbf16>
    %c0_185 = arith.constant 0 : index
    %c0_186 = arith.constant 0 : index
    %211 = vector.load %arg10[%c0_185, %c0_186] : memref<256x256xbf16, #tpu.memory_space<vmem>>, vector<256x256xbf16>
    %cst_187 = arith.constant dense<0.000000e+00> : vector<1x256xf32>
    %212 = tpu.matmul %210, %211, %cst_187 {dimension_numbers = #tpu.dot_dimension_numbers<[1], [0], [0], [1], [0, 0, 1, 1], [], []>} : vector<1x256xbf16>, vector<256x256xbf16>, vector<1x256xf32> -> vector<1x256xf32>
    %c0_188 = arith.constant 0 : index
    %c0_189 = arith.constant 0 : index
    %213 = vector.load %arg11[%c0_188, %c0_189] : memref<1x256xf32, #tpu.memory_space<vmem>>, vector<1x256xf32>
    %214 = arith.addf %212, %213 : vector<1x256xf32>
    %cst_190 = arith.constant 0.000000e+00 : f32
    %215 = vector.broadcast %cst_190 : f32 to vector<1x256xf32>
    %216 = arith.maximumf %214, %215 : vector<1x256xf32>
    %217 = arith.truncf %216 : vector<1x256xf32> to vector<1x256xbf16>
    %c0_191 = arith.constant 0 : index
    %c0_192 = arith.constant 0 : index
    %218 = vector.load %arg12[%c0_191, %c0_192] : memref<256x128xbf16, #tpu.memory_space<vmem>>, vector<256x128xbf16>
    %cst_193 = arith.constant dense<0.000000e+00> : vector<1x128xf32>
    %219 = tpu.matmul %217, %218, %cst_193 {dimension_numbers = #tpu.dot_dimension_numbers<[1], [0], [0], [1], [0, 0, 1, 1], [], []>} : vector<1x256xbf16>, vector<256x128xbf16>, vector<1x128xf32> -> vector<1x128xf32>
    %c0_194 = arith.constant 0 : index
    %c0_195 = arith.constant 0 : index
    %220 = vector.load %arg13[%c0_194, %c0_195] : memref<1x128xf32, #tpu.memory_space<vmem>>, vector<1x128xf32>
    %221 = arith.addf %219, %220 : vector<1x128xf32>
    %c0_196 = arith.constant 0 : index
    %c0_197 = arith.constant 0 : index
    %c0_198 = arith.constant 0 : index
    %222 = vector.load %arg14[%c0_196, %c0_197, %c0_198] : memref<1x1x128xf32, #tpu.memory_space<vmem>>, vector<1x1x128xf32>
    %223 = vector.shape_cast %222 : vector<1x1x128xf32> to vector<1x128xf32>
    %224 = vector.shape_cast %221 : vector<1x128xf32> to vector<1x1x128xf32>
    tpu.vector_store %arg14[%c0_196, %c0_197, %c0_198], %224 {strides = array<i32>} : memref<1x1x128xf32, #tpu.memory_space<vmem>>, vector<1x1x128xf32>,
    return
  }
  func.func @transform_0(%arg0: i32) -> (i32, i32, i32) {
    %c0_i32 = arith.constant 0 : i32
    %c0_i32_0 = arith.constant 0 : i32
    %c0_i32_1 = arith.constant 0 : i32
    return %arg0, %c0_i32, %c0_i32_0 : i32, i32, i32
  }
  func.func @transform_1(%arg0: i32) -> (i32, i32, i32) {
    %c0_i32 = arith.constant 0 : i32
    %c0_i32_0 = arith.constant 0 : i32
    %c0_i32_1 = arith.constant 0 : i32
    %c0_i32_2 = arith.constant 0 : i32
    return %c0_i32, %c0_i32_0, %c0_i32_1 : i32, i32, i32
  }
  func.func @transform_2(%arg0: i32) -> (i32, i32, i32) {
    %c0_i32 = arith.constant 0 : i32
    %c0_i32_0 = arith.constant 0 : i32
    %c0_i32_1 = arith.constant 0 : i32
    %c0_i32_2 = arith.constant 0 : i32
    return %c0_i32, %c0_i32_0, %c0_i32_1 : i32, i32, i32
  }
  func.func @transform_3(%arg0: i32) -> (i32, i32, i32) {
    %c0_i32 = arith.constant 0 : i32
    %c0_i32_0 = arith.constant 0 : i32
    %c0_i32_1 = arith.constant 0 : i32
    %c0_i32_2 = arith.constant 0 : i32
    return %c0_i32, %c0_i32_0, %c0_i32_1 : i32, i32, i32
  }
  func.func @transform_4(%arg0: i32) -> (i32, i32) {
    %c0_i32 = arith.constant 0 : i32
    %c0_i32_0 = arith.constant 0 : i32
    %c0_i32_1 = arith.constant 0 : i32
    return %c0_i32, %c0_i32_0 : i32, i32
  }
  func.func @transform_5(%arg0: i32) -> (i32, i32, i32) {
    %c0_i32 = arith.constant 0 : i32
    %c0_i32_0 = arith.constant 0 : i32
    %c0_i32_1 = arith.constant 0 : i32
    %c0_i32_2 = arith.constant 0 : i32
    return %c0_i32, %c0_i32_0, %c0_i32_1 : i32, i32, i32
  }
  func.func @transform_6(%arg0: i32) -> (i32, i32) {
    %c0_i32 = arith.constant 0 : i32
    %c0_i32_0 = arith.constant 0 : i32
    %c0_i32_1 = arith.constant 0 : i32
    return %c0_i32, %c0_i32_0 : i32, i32
  }
  func.func @transform_7(%arg0: i32) -> (i32, i32, i32) {
    %c0_i32 = arith.constant 0 : i32
    %c0_i32_0 = arith.constant 0 : i32
    %c0_i32_1 = arith.constant 0 : i32
    %c0_i32_2 = arith.constant 0 : i32
    return %c0_i32, %c0_i32_0, %c0_i32_1 : i32, i32, i32
  }
  func.func @transform_8(%arg0: i32) -> (i32, i32) {
    %c0_i32 = arith.constant 0 : i32
    %c0_i32_0 = arith.constant 0 : i32
    %c0_i32_1 = arith.constant 0 : i32
    return %c0_i32, %c0_i32_0 : i32, i32
  }
  func.func @transform_9(%arg0: i32) -> (i32, i32) {
    %c0_i32 = arith.constant 0 : i32
    %c0_i32_0 = arith.constant 0 : i32
    %c0_i32_1 = arith.constant 0 : i32
    return %c0_i32, %c0_i32_0 : i32, i32
  }
  func.func @transform_10(%arg0: i32) -> (i32, i32) {
    %c0_i32 = arith.constant 0 : i32
    %c0_i32_0 = arith.constant 0 : i32
    %c0_i32_1 = arith.constant 0 : i32
    return %c0_i32, %c0_i32_0 : i32, i32
  }
  func.func @transform_11(%arg0: i32) -> (i32, i32) {
    %c0_i32 = arith.constant 0 : i32
    %c0_i32_0 = arith.constant 0 : i32
    %c0_i32_1 = arith.constant 0 : i32
    return %c0_i32, %c0_i32_0 : i32, i32
  }
  func.func @transform_12(%arg0: i32) -> (i32, i32) {
    %c0_i32 = arith.constant 0 : i32
    %c0_i32_0 = arith.constant 0 : i32
    %c0_i32_1 = arith.constant 0 : i32
    return %c0_i32, %c0_i32_0 : i32, i32
  }
  func.func @transform_13(%arg0: i32) -> (i32, i32, i32) {
    %c0_i32 = arith.constant 0 : i32
    %c0_i32_0 = arith.constant 0 : i32
    %c0_i32_1 = arith.constant 0 : i32
    return %arg0, %c0_i32, %c0_i32_0 : i32, i32, i32
  }
}

</mosaic_0001>

<bundles_post_ra>
// kernel: tpu_custom_call.1
= control target key start
LH: loop header
LB: loop body
LE: loop exit
PB: predicated region body
PF: predicated region fallthrough
CT: control target
= control target key end

     0   :  { %18 = vsyncpa [#allocation3], 0  ;;  %s10764_s0 = inlined_call_operand.vmem [shape: bf16[2,256,8], index: 0, kind: input, shape index: {}]   ;;  %s10765_s1 = inlined_call_operand.hbm [shape: bf16[9,49,256], index: 1, kind: input, shape index: {}]   ;;  %s10766_s2 = inlined_call_operand.hbm [shape: bf16[9,9,49], index: 2, kind: input, shape index: {}]   ;;  %s10767_s3 = inlined_call_operand.hbm [shape: bf16[9,8,128], index: 3, kind: input, shape index: {}]   ;;  %s10768_s4 = inlined_call_operand.hbm [shape: f32[1,128], index: 4, kind: input, shape index: {}]   ;;  %s10769_s5 = inlined_call_operand.hbm [shape: bf16[9,128,256], index: 5, kind: input, shape index: {}]   ;;  %s10770_s6 = inlined_call_operand.hbm [shape: f32[1,256], index: 6, kind: input, shape index: {}]   ;;  %s10771_s7 = inlined_call_operand.hbm [shape: bf16[9,256,256], index: 7, kind: input, shape index: {}]   ;;  %s10772_s8 = inlined_call_operand.hbm [shape: f32[1,256], index: 8, kind: input, shape index: {}]   ;;  %s10773_s9 = inlined_call_operand.hbm [shape: bf16[256,256], index: 9, kind: input, shape index: {}]   ;;  %s10774_s10 = inlined_call_operand.hbm [shape: f32[1,256], index: 10, kind: input, shape index: {}]   ;;  %s10775_s11 = inlined_call_operand.hbm [shape: bf16[256,128], index: 11, kind: input, shape index: {}]   ;;  %s10776_s12 = inlined_call_operand.hbm [shape: f32[1,128], index: 12, kind: input, shape index: {}]   ;;  %s10777_s13 = inlined_call_operand.hbm [shape: f32[2,1,128], index: 13, kind: output, shape index: {}]  }
   0x1   :  { %19 = vsyncpa [#allocation6], 0 }
   0x2   :  { %20 = vsyncpa [#allocation9], 0 }
   0x3   :  { %21 = vsyncpa [#allocation12], 0 }
   0x4   :  { %22 = vsyncpa [#allocation15], 0 }
   0x5   :  { %23 = vsyncpa [#allocation18], 0 }
   0x6   :  { %24 = vsyncpa [#allocation21], 0 }
   0x7   :  { %25 = vsyncpa [#allocation4], 0 }
   0x8   :  { %27 = vsyncpa [#allocation4 + $0x1], 0  ;;  %s9970_s25 = smov 0   ;;  %s9972_s26 = smov 0  }
   0x9   :  { %s9974_s27 = smov 0   ;;  %s9976_s28 = smov 0  }
   0xa LB: > { %10790 = sst [smem:[#allocation31_spill]] %s9866_s25  ;;  %s9991_s29 = sadd.s32 4294967295, %s9878_s28   ;;  %s9878_s28 = sphi %s9976_s28, %s10823_s28   ;;  %s9874_s27 = sphi %s9974_s27, %s10825_s27   ;;  %s9870_s26 = sphi %s9972_s26, %s10827_s26   ;;  %s9866_s25 = sphi %s9970_s25, %s10826_s25  }
   0xb   : > { %10791 = sst [smem:[#allocation32_spill]] %s9874_s27  ;;  %s7123_s30 = sadd.s32 4294967294, %s9878_s28  }
   0xc   : > { %10792 = sst [smem:[#allocation33_spill]] %s9878_s28  ;;  %s9995_s14 = sadd.s32 1, %s9878_s28  }
   0xd   : > { %10793 = sst [smem:[#allocation34_spill]] %s9995_s14  ;;  %s318_s15 = sadd.s32 1, %s9874_s27 }
   0xe   : > { %s315_s16 = ssub.s32 %s9878_s28, %s9995_s14  ;;  %p328_p0 = scmp.ne.s32.totalorder %s9874_s27, %s9870_s26 }
   0xf   : > { %p316_p1 = scmp.eq.s32.totalorder %s315_s16, 0  ;;  %p329_p2 = scmp.eq.s32.totalorder %s9991_s29, 1 }
  0x10   : > { %p334_p3 = scmp.ne.s32.totalorder %s9870_s26, %s9866_s25  ;;  %p335_p4 = scmp.eq.s32.totalorder %s7123_s30, 1 }
  0x11   : > { %s10006_s17 = scalar_select %p316_p1, %s9874_s27, %s318_s15  }
  0x12   : > { %p10008_p5 = por %p329_p2, %p328_p0  ;;  %p10012_p6 = por %p335_p4, %p334_p3 }
  0x13   : > { %10794 = sst [smem:[#allocation35_spill]] %s10006_s17  ;;  %p7124_p7 = scmp.ge.s32.totalorder %s9878_s28, 1 }
  0x14   : > { %s10795_s18 = scalar_select %p10008_p5, 1, 0 }
  0x15   : > { %s10796_s19 = scalar_select %p10012_p6, 1, 0 }
  0x16   : > { %p342_p8 = scmp.lt.s32.totalorder %s9878_s28, 3  ;;  %p10784_p9 = scmp.eq.s32.totalorder %s9991_s29, 0 }
  0x17   : > { %10797 = sst [smem:[#allocation36_spill]] %s10796_s19  ;;  %s9880_s21 = smov [#allocation5]  }
  0x18   : > { %p10019_p10 = pnand %p7124_p7, %p342_p8  ;;  %s367_s22 = sshll.u32 %s9880_s21, 4  ;;  %s368_s22 = int_to_ptr.vmem [resolvable:$true] %s367_s22 }
  0x19   : > { %s9881_s24 = smov [#allocation8]   ;;  %s9882_s15 = smov [#allocation11]  }
  0x1a   : > { %s10798_s20 = scalar_select %p10019_p10, 1, 0 }
  0x1b   : > { %p8509_p11 = pneg %p10019_p10  ;;  %s394_s30 = sshll.u32 %s9881_s24, 4  ;;  %s395_s30 = int_to_ptr.vmem [resolvable:$true] %s394_s30 }
  0x1c   : > { %s418_s16 = sshll.u32 %s9882_s15, 4  ;;  %s9489_s21 = scalar_lea.vmem %s368_s22, 1152  ;;  %s419_s16 = int_to_ptr.vmem [resolvable:$true] %s418_s16 }
  0x1d   : > { %p10027_p12 = pnand %p10784_p9, %p8509_p11  ;;  %p9490_p0 = scmp.ne.s32.totalorder %s368_s22, %s9489_s21 }
  0x1e   : > { %p9497_p3 = scmp.lt.s32.totalorder %s368_s22, %s368_s22  ;;  %p9498_p4 = scmp.lt.s32.totalorder %s9489_s21, %s9489_s21 }
  0x1f   : > { %p10033_p13 = pneg %p10027_p12 }
  0x20   : > { %p9499_p7 = por %p9498_p4, %p9497_p3 }
  0x21   : > { %p9492_p1 = pnand %p9490_p0, %p10033_p13 }
  0x23   : > { %p9493_p2 = pneg %p9492_p1 }
  0x25   : > { %p9500_p8 = pnand %p9499_p7, %p9493_p2 }
  0x27   : > { %9503 = shalt.err (!%p9500_p8)
}
  0x28   : > { %s10787_s24 = smov 64   ;;  %s10789_s15 = smov 4  }
  0x29   : > { %8515 = dma.hbm_to_vmem [thread:$0]  (!%p10027_p12), %s10766_s2, 1152, %s368_s22, [#allocation6], %s10787_s24, %s10787_s24, %s10789_s15  }
  0x2a   : > { %s9515_s19 = scalar_lea.vmem %s395_s30, 16  ;;  %s9522_s21 = scalar_lea.vmem %s395_s30, 32 }
  0x2b   : > { %p9516_p11 = scmp.ne.s32.totalorder %s395_s30, %s9515_s19  ;;  %p9523_p2 = scmp.lt.s32.totalorder %s395_s30, %s395_s30 }
  0x2c   : > { %p9524_p3 = scmp.lt.s32.totalorder %s9522_s21, %s9515_s19 }
  0x2d   : > { %p9518_p0 = pnand %p9516_p11, %p10033_p13 }
  0x2e   : > { %p9525_p4 = por %p9524_p3, %p9523_p2 }
  0x2f   : > { %p9519_p1 = pneg %p9518_p0 }
  0x31   : > { %p9526_p7 = pnand %p9525_p4, %p9519_p1 }
  0x33   : > { %9529 = shalt.err (!%p9526_p7)
}
  0x34   : > { %8521 = dma.hbm_to_vmem [thread:$0]  (!%p10027_p12), %s10768_s4, 16, %s395_s30, [#allocation9]  }
  0x35   : > { %s9541_s27 = scalar_lea.vmem %s419_s16, 32  ;;  %p9549_p0 = scmp.lt.s32.totalorder %s419_s16, %s419_s16 }
  0x36   : > { %p9542_p8 = scmp.ne.s32.totalorder %s419_s16, %s9541_s27  ;;  %p9550_p6 = scmp.lt.s32.totalorder %s9541_s27, %s9541_s27 }
  0x38   : > { %p9544_p9 = pnand %p9542_p8, %p10033_p13  ;;  %p9551_p5 = por %p9550_p6, %p9549_p0 }
  0x3a   : > { %p9545_p11 = pneg %p9544_p9 }
  0x3c   : > { %p9552_p10 = pnand %p9551_p5, %p9545_p11 }
  0x3e   : > { %9555 = shalt.err (!%p9552_p10)
}
  0x3f   : > { %8527 = dma.hbm_to_vmem [thread:$0]  (!%p10027_p12), %s10770_s6, 32, %s419_s16, [#allocation12]  }
  0x40   : > { %s9885_s25 = smov [#allocation14]   ;;  %s9886_s22 = smov [#allocation17]  }
  0x41   : > { %s442_s28 = sshll.u32 %s9885_s25, 4  ;;  %s466_s30 = sshll.u32 %s9886_s22, 4  ;;  %s443_s28 = int_to_ptr.vmem [resolvable:$true] %s442_s28  ;;  %s467_s30 = int_to_ptr.vmem [resolvable:$true] %s466_s30 }
  0x42   : > { %s9567_s21 = scalar_lea.vmem %s443_s28, 32  ;;  %p9575_p6 = scmp.lt.s32.totalorder %s443_s28, %s443_s28 }
  0x43   : > { %p9568_p1 = scmp.ne.s32.totalorder %s443_s28, %s9567_s21  ;;  %p9576_p5 = scmp.lt.s32.totalorder %s9567_s21, %s9567_s21 }
  0x45   : > { %p9570_p9 = pnand %p9568_p1, %p10033_p13  ;;  %p9577_p10 = por %p9576_p5, %p9575_p6 }
  0x47   : > { %p9571_p2 = pneg %p9570_p9 }
  0x49   : > { %p9578_p3 = pnand %p9577_p10, %p9571_p2 }
  0x4b   : > { %9581 = shalt.err (!%p9578_p3)
}
  0x4c   : > { %8533 = dma.hbm_to_vmem [thread:$0]  (!%p10027_p12), %s10772_s8, 32, %s443_s28, [#allocation15]  }
  0x4d   : > { %s9593_s16 = scalar_lea.vmem %s467_s30, 32  ;;  %p9601_p11 = scmp.lt.s32.totalorder %s467_s30, %s467_s30 }
  0x4e   : > { %p9594_p4 = scmp.ne.s32.totalorder %s467_s30, %s9593_s16  ;;  %p9602_p0 = scmp.lt.s32.totalorder %s9593_s16, %s9593_s16 }
  0x50   : > { %p9596_p7 = pnand %p9594_p4, %p10033_p13  ;;  %p9603_p1 = por %p9602_p0, %p9601_p11 }
  0x52   : > { %p9597_p8 = pneg %p9596_p7 }
  0x54   : > { %p9604_p9 = pnand %p9603_p1, %p9597_p8 }
  0x56   : > { %9607 = shalt.err (!%p9604_p9)
}
  0x57   : > { %8539 = dma.hbm_to_vmem [thread:$0]  (!%p10027_p12), %s10774_s10, 32, %s467_s30, [#allocation18]  }
  0x58   : > { %s9887_s22 = smov [#allocation2]  }
  0x59   : > { %s354_s28 = sshll.u32 %s9887_s22, 4  ;;  %s355_s28 = int_to_ptr.vmem [resolvable:$true] %s354_s28 }
  0x5a   : > { %s9619_s21 = scalar_lea.vmem %s355_s28, 8064  ;;  %p9627_p10 = scmp.lt.s32.totalorder %s355_s28, %s355_s28 }
  0x5b   : > { %p9620_p2 = scmp.ne.s32.totalorder %s355_s28, %s9619_s21  ;;  %p9628_p3 = scmp.lt.s32.totalorder %s9619_s21, %s9619_s21 }
  0x5d   : > { %p9622_p6 = pnand %p9620_p2, %p10033_p13  ;;  %p9629_p4 = por %p9628_p3, %p9627_p10 }
  0x5f   : > { %p9623_p5 = pneg %p9622_p6 }
  0x61   : > { %p9630_p7 = pnand %p9629_p4, %p9623_p5 }
  0x63   : > { %9633 = shalt.err (!%p9630_p7)
}
  0x64   : > { %s9888_s27 = smov 128   ;;  %s9889_s14 = smov 8  }
  0x65   : > { %8512 = dma.hbm_to_vmem [thread:$0]  (!%p10027_p12), %s10765_s1, 8064, %s355_s28, [#allocation3], %s9888_s27, %s9888_s27, %s9889_s14  }
  0x66   : > { %s9890_s19 = smov [#allocation7]   ;;  %s9891_s22 = smov [#allocation10]  }
  0x67   : > { %s380_s25 = sshll.u32 %s9890_s19, 4  ;;  %s404_s24 = sshll.u32 %s9891_s22, 4  ;;  %s381_s25 = int_to_ptr.vmem [resolvable:$true] %s380_s25  ;;  %s405_s24 = int_to_ptr.vmem [resolvable:$true] %s404_s24 }
  0x68   : > { %s9645_s21 = scalar_lea.vmem %s381_s25, 576  ;;  %p9653_p1 = scmp.lt.s32.totalorder %s381_s25, %s381_s25 }
  0x69   : > { %p9646_p8 = scmp.ne.s32.totalorder %s381_s25, %s9645_s21  ;;  %p9654_p9 = scmp.lt.s32.totalorder %s9645_s21, %s9645_s21 }
  0x6b   : > { %p9648_p11 = pnand %p9646_p8, %p10033_p13  ;;  %p9655_p2 = por %p9654_p9, %p9653_p1 }
  0x6d   : > { %p9649_p0 = pneg %p9648_p11 }
  0x6f   : > { %p9656_p6 = pnand %p9655_p2, %p9649_p0 }
  0x71   : > { %9659 = shalt.err (!%p9656_p6)
}
  0x72   : > { %s10801_s28 = smov 64   ;;  %s9671_s19 = scalar_lea.vmem %s405_s24, 18432 }
  0x73   : > { %8518 = dma.hbm_to_vmem [thread:$0]  (!%p10027_p12), %s10767_s3, 576, %s381_s25, [#allocation6], %s10801_s28, %s10801_s28, %s10789_s15  }
  0x74   : > { %p9672_p5 = scmp.ne.s32.totalorder %s405_s24, %s9671_s19  ;;  %p9679_p4 = scmp.lt.s32.totalorder %s405_s24, %s405_s24 }
  0x75   : > { %p9680_p7 = scmp.lt.s32.totalorder %s9671_s19, %s9671_s19 }
  0x76   : > { %p9674_p10 = pnand %p9672_p5, %p10033_p13 }
  0x77   : > { %p9681_p8 = por %p9680_p7, %p9679_p4 }
  0x78   : > { %p9675_p3 = pneg %p9674_p10 }
  0x7a   : > { %p9682_p11 = pnand %p9681_p8, %p9675_p3 }
  0x7c   : > { %9685 = shalt.err (!%p9682_p11)
}
  0x7d   : > { %8524 = dma.hbm_to_vmem [thread:$0]  (!%p10027_p12), %s10769_s5, 18432, %s405_s24, [#allocation9], %s9888_s27, %s9888_s27, %s9889_s14  }
  0x7e   : > { %s9892_s25 = smov [#allocation13]   ;;  %s9893_s16 = smov [#allocation16]  }
  0x7f   : > { %s428_s30 = sshll.u32 %s9892_s25, 4  ;;  %s452_s15 = sshll.u32 %s9893_s16, 4  ;;  %s429_s30 = int_to_ptr.vmem [resolvable:$true] %s428_s30  ;;  %s453_s15 = int_to_ptr.vmem [resolvable:$true] %s452_s15 }
  0x80   : > { %s9697_s19 = scalar_lea.vmem %s429_s30, 36864  ;;  %p9705_p2 = scmp.lt.s32.totalorder %s429_s30, %s429_s30 }
  0x81   : > { %p9698_p0 = scmp.ne.s32.totalorder %s429_s30, %s9697_s19  ;;  %p9706_p6 = scmp.lt.s32.totalorder %s9697_s19, %s9697_s19 }
  0x83   : > { %p9700_p1 = pnand %p9698_p0, %p10033_p13  ;;  %p9707_p5 = por %p9706_p6, %p9705_p2 }
  0x85   : > { %p9701_p9 = pneg %p9700_p1 }
  0x87   : > { %p9708_p10 = pnand %p9707_p5, %p9701_p9 }
  0x89   : > { %9711 = shalt.err (!%p9708_p10)
}
  0x8a   : > { %8530 = dma.hbm_to_vmem [thread:$0]  (!%p10027_p12), %s10771_s7, 36864, %s429_s30, [#allocation12], %s9888_s27, %s9888_s27, %s9889_s14  }
  0x8b   : > { %s9723_s21 = scalar_lea.vmem %s453_s15, 4096  ;;  %p9731_p8 = scmp.lt.s32.totalorder %s453_s15, %s453_s15 }
  0x8c   : > { %p9724_p3 = scmp.ne.s32.totalorder %s453_s15, %s9723_s21  ;;  %p9732_p11 = scmp.lt.s32.totalorder %s9723_s21, %s9723_s21 }
  0x8e   : > { %p9726_p4 = pnand %p9724_p3, %p10033_p13  ;;  %p9733_p0 = por %p9732_p11, %p9731_p8 }
  0x90   : > { %p9727_p7 = pneg %p9726_p4 }
  0x92   : > { %p9734_p1 = pnand %p9733_p0, %p9727_p7 }
  0x94   : > { %9737 = shalt.err (!%p9734_p1)
}
  0x95   : > { %8536 = dma.hbm_to_vmem [thread:$0]  (!%p10027_p12), %s10773_s9, 4096, %s453_s15, [#allocation15], %s9888_s27, %s9888_s27, %s9889_s14  }
  0x96   : > { %s9894_s30 = smov [#allocation19]   ;;  %s9895_s24 = smov [#allocation20]  }
  0x97   : > { %s476_s19 = sshll.u32 %s9894_s30, 4  ;;  %s490_s22 = sshll.u32 %s9895_s24, 4  ;;  %s477_s19 = int_to_ptr.vmem [resolvable:$true] %s476_s19  ;;  %s491_s22 = int_to_ptr.vmem [resolvable:$true] %s490_s22 }
  0x98   : > { %s9749_s21 = scalar_lea.vmem %s477_s19, 2048  ;;  %p9757_p5 = scmp.lt.s32.totalorder %s477_s19, %s477_s19 }
  0x99   : > { %p9750_p9 = scmp.ne.s32.totalorder %s477_s19, %s9749_s21  ;;  %p9758_p10 = scmp.lt.s32.totalorder %s9749_s21, %s9749_s21 }
  0x9b   : > { %p9752_p2 = pnand %p9750_p9, %p10033_p13  ;;  %p9759_p3 = por %p9758_p10, %p9757_p5 }
  0x9d   : > { %p9753_p6 = pneg %p9752_p2 }
  0x9f   : > { %p9760_p4 = pnand %p9759_p3, %p9753_p6 }
  0xa1   : > { %9763 = shalt.err (!%p9760_p4)
}
  0xa2   : > { %s10802_s25 = smov 4   ;;  %s9775_s14 = scalar_lea.vmem %s491_s22, 16 }
  0xa3   : > { %8542 = dma.hbm_to_vmem [thread:$0]  (!%p10027_p12), %s10775_s11, 2048, %s477_s19, [#allocation18], %s10801_s28, %s10801_s28, %s10802_s25  }
  0xa4   : > { %p9776_p7 = scmp.ne.s32.totalorder %s491_s22, %s9775_s14  ;;  %s9782_s16 = scalar_lea.vmem %s491_s22, 32 }
  0xa5   : > { %p9783_p0 = scmp.lt.s32.totalorder %s491_s22, %s491_s22  ;;  %p9784_p1 = scmp.lt.s32.totalorder %s9782_s16, %s9775_s14 }
  0xa6   : > { %p9778_p8 = pnand %p9776_p7, %p10033_p13 }
  0xa7   : > { %p9785_p9 = por %p9784_p1, %p9783_p0 }
  0xa8   : > { %p9779_p11 = pneg %p9778_p8 }
  0xaa   : > { %p9786_p2 = pnand %p9785_p9, %p9779_p11 }
  0xac   : > { %9789 = shalt.err (!%p9786_p2)
}
  0xad   : > { %8545 = dma.hbm_to_vmem [thread:$0]  (!%p10027_p12), %s10776_s12, 16, %s491_s22, [#allocation21]  }
  0xae   : > { %p10803_p6 = scmp.ne.s32.totalorder %s10798_s20, 0 }
  0xaf   : > { %p10804_p5 = scmp.eq.s32.totalorder (!%p10803_p6), %s9991_s29, 0 }
  0xb0   : > { %511 = sbr.rel (%p10803_p6) target bundleno = 3908 (0xf44), region = 72 }
  0xb5   : > { %9833 = dma.done.wait (%p10804_p5), [#allocation3], 8064   ;;  %p10805_p13 = pmov %p10804_p5 }
  0xb6   : > { %p10806_p10 = pmov %p10804_p5 }
  0xb7   : > { %9835 = vsyncadd (%p10805_p13), [#allocation3], 4294959232 }
  0xb8   : > { %9837 = dma.done.wait (%p10806_p10), [#allocation6], 1728   ;;  %p10807_p3 = pmov %p10804_p5 }
  0xba   : > { %9839 = vsyncadd (%p10807_p3), [#allocation6], 4294965568  ;;  %p10808_p4 = pmov %p10807_p3 }
  0xbb   : > { %p10809_p12 = pmov %p10807_p3 }
  0xbc   : > { %9841 = dma.done.wait (%p10808_p4), [#allocation9], 18448  }
  0xbd   : > { %9843 = vsyncadd (%p10809_p12), [#allocation9], 4294948848  ;;  %p10810_p7 = pmov %p10807_p3 }
  0xbe   : > { %p10811_p8 = pmov %p10807_p3 }
  0xbf   : > { %9845 = dma.done.wait (%p10810_p7), [#allocation12], 36896  }
  0xc0   : > { %9847 = vsyncadd (%p10811_p8), [#allocation12], 4294930400  ;;  %p10812_p11 = pmov %p10807_p3 }
  0xc1   : > { %p10813_p0 = pmov %p10807_p3 }
  0xc2   : > { %9849 = dma.done.wait (%p10812_p11), [#allocation15], 4128  }
  0xc3   : > { %9851 = vsyncadd (%p10813_p0), [#allocation15], 4294963168  ;;  %p10814_p1 = pmov %p10813_p0 }
  0xc4   : > { %p10815_p9 = pmov %p10813_p0 }
  0xc5   : > { %9853 = dma.done.wait (%p10814_p1), [#allocation18], 2080  }
  0xc6   : > { %9855 = vsyncadd (%p10815_p9), [#allocation18], 4294965216  ;;  %p10816_p2 = pmov %p10813_p0 }
  0xc7   : > { %p10817_p6 = pmov %p10813_p0 }
  0xc8   : > { %9857 = dma.done.wait (%p10816_p2), [#allocation21], 16  }
  0xc9   : > { %9859 = vsyncadd (%p10817_p6), [#allocation21], 4294967280  ;;  %p598_p5 = scmp.lt.s32.totalorder %s9991_s29, 1  ;;  %v8644_v11 = vld [vmem:[#allocation2 + $0x4] ss:$8 sps:$4 sm:$0xff]   ;;  %vm973_vm0 = vcmask 1043456  }
  0xca   : > { %v8647_v12 = vld [vmem:[#allocation2 + $0x3c] ss:$8 sps:$4 sm:$0xff]   ;;  %808 = vmatprep.mubr.bf16.mxu0 %v8644_v11  ;;  %v8642_v19 = vld [vmem:[#allocation2] ss:$8 sps:$4 sm:$0xff]   ;;  %v8650_v22 = vld [vmem:[#allocation2 + $0x4c] ss:$8 sps:$4 sm:$0xff]  }
  0xcb   : > { %s599_s17 = scalar_select %p598_p5, %s9991_s29, 1  ;;  %922 = vmatprep.mubr.bf16.mxu1 %v8647_v12  ;;  %v959_v18 = vld [vmem:[#allocation7 + $0x4] sm:$0xf]  ;;  %v8645_v20 = vld [vmem:[#allocation2 + $0x38] ss:$8 sps:$4 sm:$0xff]   ;;  %vm960_vm1 = vcmask 64512  }
  0xcc   : > { %v8648_v21 = vld [vmem:[#allocation2 + $0x14] ss:$8 sps:$4 sm:$0xff]   ;;  %v975_v23 = vsel %vm973_vm0, %v959_v18, 0  ;;  %v8652_v24 = vld [vmem:[#allocation2 + $0x10] ss:$8 sps:$4 sm:$0xff]   ;;  %vm9898_vm2 = vmmov 0  }
  0xcd   : > { %s7779_s20 = sshll.u32 %s599_s17, 7  ;;  %v8653_v25 = vld [vmem:[#allocation2 + $0x48] ss:$8 sps:$4 sm:$0xff]   ;;  %v8654_v26 = vld [vmem:[#allocation2 + $0x24] ss:$8 sps:$4 sm:$0xff]   ;;  %vm2563_vm3 = vcmask 1040384  }
  0xce   : > { %s10177_s19 = scalar_lea.vmem %s10764_s0, %s7779_s20  ;;  %v8656_v27 = vld [vmem:[#allocation2 + $0x5c] ss:$8 sps:$4 sm:$0xff]   ;;  %v642_v28 = vld [vmem:[#allocation2 + $0x30] sm:$0x11]  ;;  %v852_v29 = vld [vmem:[#allocation2 + $0x68] sm:$0x11] }
  0xcf   : > { %v10180_v0 = vld [vmem:[%s10177_s19 + $0x78] sm:$0xff]   ;;  %v8628_v2 = vld [vmem:[%s10177_s19 + $0x70] sm:$0xff]   ;;  %v8630_v4 = vld [vmem:[%s10177_s19 + $0x68] sm:$0xff]   ;;  %v7160_v32 = vcombine.high %v642_v28, %v642_v28  ;;  %v7184_v33 = vcombine.high %v852_v29, %v852_v29  ;;  %v7159_v34 = vcombine.low %v642_v28, %v642_v28  ;;  %v7183_v35 = vcombine.low %v852_v29, %v852_v29  ;;  %s596_s22 = sand.u32 1, %s9870_s26   ;;  %s7776_s21 = sshll.u32 %s9991_s29, 4 }
  0xd0   : > { %v8627_v1 = vld [vmem:[%s10177_s19 + $0x38] sm:$0xff]   ;;  %7780 = vmatprep.subr.bf16.mxu0 %v10180_v0  ;;  %7820 = vmatprep.subr.bf16.mxu1 %v10180_v0  ;;  %v8629_v3 = vld [vmem:[%s10177_s19 + $0x30] sm:$0xff]   ;;  %v8631_v5 = vld [vmem:[%s10177_s19 + $0x28] sm:$0xff]   ;;  %vm2559_vm4 = vcmask 400384   ;;  %s597_s25 = scalar_lea.vmem [#allocation22], %s596_s22  ;;  %s10729_s16 = scalar_lea.hbm %s10777_s13, %s7776_s21 }
  0xd1   : > { %7781 = vmatpush3.bf16.msra.mxu0 %v8627_v1  ;;  %7821 = vmatpush3.bf16.msra.mxu1 %v8627_v1  ;;  %v8632_v6 = vld [vmem:[%s10177_s19 + $0x60] sm:$0xff]   ;;  %v8634_v8 = vld [vmem:[%s10177_s19 + $0x58] sm:$0xff]   ;;  %v8636_v10 = vld [vmem:[%s10177_s19 + $0x50] sm:$0xff]   ;;  %s6951_s15 = sshll.u32 %s597_s25, 4  ;;  %s6939_s30 = scalar_lea.sflag [#allocation4], %s596_s22  ;;  %s6952_s15 = int_to_ptr.vmem [resolvable:$true] %s6951_s15 }
  0xd2   : > { %7782 = vmatprep.subr.bf16.mxu0 %v8628_v2  ;;  %7822 = vmatprep.subr.bf16.mxu1 %v8628_v2  ;;  %v8633_v7 = vld [vmem:[%s10177_s19 + $0x20] sm:$0xff]   ;;  %v8635_v9 = vld [vmem:[%s10177_s19 + $0x18] sm:$0xff]   ;;  %v8637_v13 = vld [vmem:[%s10177_s19 + $0x10] sm:$0xff]   ;;  %s9790_s24 = scalar_lea.vmem %s6952_s15, 16  ;;  %p10818_p10 = scmp.ne.s32.totalorder %s10795_s18, 0 }
  0xd3   : > { %v8638_v14 = vld [vmem:[%s10177_s19 + $0x48] sm:$0xff]   ;;  %v8640_v16 = vld [vmem:[%s10177_s19 + $0x40] sm:$0xff]   ;;  %v10213_v11 = vld [vmem:[%s10177_s19 + $0x70] sm:$0xff]   ;;  %p9791_p13 = scmp.ne.s32.totalorder %s6952_s15, %s9790_s24  ;;  %s9899_s29 = smov [#allocation22]  }
  0xd4   : > { %v8639_v15 = vld [vmem:[%s10177_s19 + $0x8] sm:$0xff]   ;;  %v8641_v17 = vld [vmem:[%s10177_s19] sm:$0xff]   ;;  %v8666_v28 = vld [vmem:[#allocation2 + $0x74] ss:$8 sps:$4 sm:$0xff]   ;;  %s9794_s17 = sshll.u32 %s9899_s29, 4  ;;  %s9795_s17 = int_to_ptr.vmem [resolvable:$false] %s9794_s17 }
  0xd5   : > { %7783 = vmatpush3.bf16.msra.mxu0 %v8629_v3  ;;  %7823 = vmatpush3.bf16.msra.mxu1 %v8629_v3  ;;  %v8658_v30 = vld [vmem:[#allocation2 + $0x20] ss:$8 sps:$4 sm:$0xff]   ;;  %p9792_p3 = pnand %p9791_p13, %p10818_p10  ;;  %s9796_s20 = scalar_lea.vmem %s9795_s17, 32 }
  0xd6   : > { %7784 = vmatprep.subr.bf16.mxu0 %v8630_v4  ;;  %7824 = vmatprep.subr.bf16.mxu1 %v8630_v4  ;;  %v8659_v31 = vld [vmem:[#allocation2 + $0x58] ss:$8 sps:$4 sm:$0xff]   ;;  %p9797_p12 = scmp.lt.s32.totalorder %s6952_s15, %s9795_s17  ;;  %p9798_p7 = scmp.lt.s32.totalorder %s9796_s20, %s9790_s24 }
  0xd7   : > { %v844_v36 = vld [vmem:[#allocation7] sm:$0xf]  ;;  %p9793_p4 = pneg %p9792_p3 }
  0xd8   : > { %v1054_v37 = vsel %vm973_vm0, %v844_v36, 0  ;;  %p9799_p8 = por %p9798_p7, %p9797_p12 }
  0xd9   : > { %7785 = vmatpush3.bf16.msra.mxu0 %v8631_v5  ;;  %7825 = vmatpush3.bf16.msra.mxu1 %v8631_v5 }
  0xda   : > { %7786 = vmatprep.subr.bf16.mxu0 %v8632_v6  ;;  %7826 = vmatprep.subr.bf16.mxu1 %v8632_v6  ;;  %v10209_v6 = vld [vmem:[%s10177_s19 + $0x38] sm:$0xff]   ;;  %p9800_p11 = pnand %p9799_p8, %p9793_p4 }
  0xdd   : > { %7787 = vmatpush3.bf16.msra.mxu0 %v8633_v7  ;;  %7827 = vmatpush3.bf16.msra.mxu1 %v8633_v7 }
  0xde   : > { %7788 = vmatprep.subr.bf16.mxu0 %v8634_v8  ;;  %7828 = vmatprep.subr.bf16.mxu1 %v8634_v8 }
  0xe1   : > { %7789 = vmatpush3.bf16.msra.mxu0 %v8635_v9  ;;  %7829 = vmatpush3.bf16.msra.mxu1 %v8635_v9 }
  0xe2   : > { %7790 = vmatprep.subr.bf16.mxu0 %v8636_v10  ;;  %7830 = vmatprep.subr.bf16.mxu1 %v8636_v10 }
  0xe5   : > { %7791 = vmatpush3.bf16.msra.mxu0 %v8637_v13  ;;  %7831 = vmatpush3.bf16.msra.mxu1 %v8637_v13 }
  0xe6   : > { %7792 = vmatprep.subr.bf16.mxu0 %v8638_v14  ;;  %7832 = vmatprep.subr.bf16.mxu1 %v8638_v14 }
  0xe9   : > { %7793 = vmatpush3.bf16.msra.mxu0 %v8639_v15  ;;  %7833 = vmatpush3.bf16.msra.mxu1 %v8639_v15 }
  0xea   : > { %7794 = vmatprep.subr.bf16.mxu0 %v8640_v16  ;;  %7834 = vmatprep.subr.bf16.mxu1 %v8640_v16  ;;  %v10217_v16 = vld [vmem:[%s10177_s19 + $0x30] sm:$0xff]  }
  0xed   : > { %7795 = vmatpush3.bf16.msra.mxu0 %v8641_v17  ;;  %7835 = vmatpush3.bf16.msra.mxu1 %v8641_v17 }
  0xee   : > { %8450 = vmatprep.subr.msk.bf16.mxu0 %vm973_vm0, %v959_v18  ;;  %8451 = vmatprep.subr.msk.bf16.mxu1 %vm973_vm0, %v844_v36  ;;  %v10241_v36 = vld [vmem:[%s10177_s19 + $0x58] sm:$0xff]  }
  0xf0   : > { %809 = vmatmul.mubr.bf16.vlgmr.msra.gmra.mxu0 %v8642_v19  ;;  %923 = vmatmul.mubr.bf16.vlgmr.msra.gmra.mxu1 %v8645_v20 }
  0xf1   : > { %816 = vmatprep.mubr.bf16.mxu0 %v8648_v21  ;;  %930 = vmatprep.mubr.bf16.mxu1 %v8650_v22  ;;  %v10221_v21 = vld [vmem:[%s10177_s19 + $0x68] sm:$0xff]  }
  0xf2   : > { %8253 = vmatpush3.bf16.msra.mxu0 %v975_v23  ;;  %8263 = vmatpush3.bf16.msra.mxu1 %v1054_v37  ;;  %v10245_v37 = vld [vmem:[%s10177_s19 + $0x18] sm:$0xff]  }
  0xf3   : > { %7870 = vmatprep.subr.bf16.mxu0 %v10180_v0 }
  0xf8   : > { %817 = vmatmul.mubr.bf16.gmra.mxu0 %v8652_v24  ;;  %931 = vmatmul.mubr.bf16.gmra.mxu1 %v8653_v25 }
  0xf9   : > { %824 = vmatprep.mubr.bf16.mxu0 %v8654_v26  ;;  %938 = vmatprep.mubr.bf16.mxu1 %v8656_v27  ;;  %v10227_v26 = vld [vmem:[%s10177_s19 + $0x28] sm:$0xff]  }
 0x100   : > { %825 = vmatmul.mubr.bf16.gmra.mxu0 %v8658_v30  ;;  %939 = vmatmul.mubr.bf16.gmra.mxu1 %v8659_v31 }
 0x101   : > { %832 = vmatprep.mubr.bf16.mxu0 %v7160_v32  ;;  %946 = vmatprep.mubr.bf16.mxu1 %v7184_v33  ;;  %v10231_v32 = vld [vmem:[%s10177_s19 + $0x60] sm:$0xff]  }
 0x108   : > { %833 = vmatmul.mubr.bf16.gmra.mxu0 %v7159_v34  ;;  %947 = vmatmul.mubr.bf16.gmra.mxu1 %v7183_v35  ;;  %v10237_v35 = vld [vmem:[%s10177_s19 + $0x20] sm:$0xff]  }
 0x1b0   : > { %v7796_v38 = vpop.f32.mrf.mxu0  ;;  %v7836_v39 = vpop.f32.mrf.mxu1 }
 0x1b2   : > { %v7797_v40 = vpop.f32.mrf.mxu0  ;;  %v7837_v41 = vpop.f32.mrf.mxu1 }
 0x1b3   : > { %v7798_v44 = vadd.f32 %v7797_v40, %v7796_v38  ;;  %v7838_v47 = vadd.f32 %v7837_v41, %v7836_v39  ;;  %v10249_v38 = vld [vmem:[%s10177_s19 + $0x50] sm:$0xff]   ;;  %v10257_v40 = vld [vmem:[%s10177_s19 + $0x48] sm:$0xff]  }
 0x1b4   : > { %v7799_v42 = vpop.f32.mrf.mxu0  ;;  %v7839_v43 = vpop.f32.mrf.mxu1  ;;  %v10253_v39 = vld [vmem:[%s10177_s19 + $0x10] sm:$0xff]   ;;  %v10261_v41 = vld [vmem:[%s10177_s19 + $0x8] sm:$0xff]  }
 0x1b6   : > { %v7800_v45 = vpop.f32.mrf.mxu0  ;;  %v7840_v46 = vpop.f32.mrf.mxu1 }
 0x1b7   : > { %v7801_v48 = vadd.f32 %v7800_v45, %v7799_v42  ;;  %v7841_v49 = vadd.f32 %v7840_v46, %v7839_v43  ;;  %v10265_v42 = vld [vmem:[%s10177_s19 + $0x40] sm:$0xff]   ;;  %v8664_v43 = vld [vmem:[#allocation2 + $0x70] ss:$8 sps:$4 sm:$0xff]  }
 0x1b8   : > { %v7802_v50 = vpop.f32.mrf.mxu0  ;;  %v7842_v51 = vpop.f32.mrf.mxu1  ;;  %v8667_v45 = vld [vmem:[#allocation2 + $0x84] ss:$8 sps:$4 sm:$0xff]   ;;  %v8669_v46 = vld [vmem:[#allocation2 + $0x80] ss:$8 sps:$4 sm:$0xff]  }
 0x1b9   : > { %v840_v52 = vpack.c.bf16 %v7801_v48, %v7798_v44  ;;  %v954_v53 = vpack.c.bf16 %v7841_v49, %v7838_v47  ;;  %v10269_v44 = vld [vmem:[%s10177_s19] sm:$0xff]   ;;  %v8670_v47 = vld [vmem:[#allocation2 + $0x94] ss:$8 sps:$4 sm:$0xff]   ;;  %v8672_v49 = vld [vmem:[#allocation2 + $0x90] ss:$8 sps:$4 sm:$0xff]  }
 0x1ba   : > { %v7803_v54 = vpop.f32.mrf.mxu0  ;;  %v7843_v55 = vpop.f32.mrf.mxu1  ;;  %v1127_v48 = vld [vmem:[#allocation2 + $0xa0] sm:$0x11] }
 0x1bb   : > { %8254 = vmatprep.mubr.msk.bf16.mxu0 %vm960_vm1, %v954_v53  ;;  %8264 = vmatprep.mubr.msk.bf16.mxu1 %vm960_vm1, %v840_v52  ;;  %v7804_v58 = vadd.f32 %v7803_v54, %v7802_v50  ;;  %v7844_v61 = vadd.f32 %v7843_v55, %v7842_v51  ;;  %v7200_v50 = vcombine.high %v1127_v48, %v1127_v48  ;;  %v1234_v52 = vld [vmem:[#allocation7 + $0x8] sm:$0xf]  ;;  %v10275_v54 = vld [vmem:[%s10177_s19 + $0x78] sm:$0xff]  }
 0x1bc   : > { %v7805_v56 = vpop.f32.mrf.mxu0  ;;  %v7845_v57 = vpop.f32.mrf.mxu1  ;;  %v7199_v51 = vcombine.low %v1127_v48, %v1127_v48  ;;  %8452 = vmatprep.subr.msk.bf16.mxu1 %vm973_vm0, %v1234_v52  ;;  %v1248_v53 = vsel %vm973_vm0, %v1234_v52, 0 }
 0x1be   : > { %v7806_v59 = vpop.f32.mrf.mxu0  ;;  %v7846_v60 = vpop.f32.mrf.mxu1 }
 0x1bf   : > { %v7807_v62 = vadd.f32 %v7806_v59, %v7805_v56  ;;  %v7847_v63 = vadd.f32 %v7846_v60, %v7845_v57 }
 0x1c0   : > { %v7808_v0 = vpop.f32.mrf.mxu0  ;;  %v7848_v1 = vpop.f32.mrf.mxu1 }
 0x1c1   : > { %v841_v2 = vpack.c.bf16 %v7807_v62, %v7804_v58  ;;  %v955_v3 = vpack.c.bf16 %v7847_v63, %v7844_v61 }
 0x1c2   : > { %v7809_v4 = vpop.f32.mrf.mxu0  ;;  %v7849_v5 = vpop.f32.mrf.mxu1 }
 0x1c3   : > { %8255 = vmatmul.mubr.msk.bf16.vlgmr.msra.gmra.mxu0 %vm960_vm1, %v955_v3  ;;  %8265 = vmatmul.mubr.msk.bf16.vlgmr.msra.gmra.mxu1 %vm960_vm1, %v841_v2  ;;  %v7810_v9 = vadd.f32 %v7809_v4, %v7808_v0  ;;  %v7850_v10 = vadd.f32 %v7849_v5, %v7848_v1 }
 0x1c4   : > { %7871 = vmatpush3.bf16.msra.mxu0 %v10209_v6  ;;  %v7811_v7 = vpop.f32.mrf.mxu0  ;;  %v7851_v8 = vpop.f32.mrf.mxu1  ;;  %8273 = vmatpush3.bf16.msra.mxu1 %v1248_v53 }
 0x1c5   : > { %7872 = vmatprep.subr.bf16.mxu0 %v10213_v11  ;;  %7915 = vmatprep.subr.bf16.mxu1 %v10275_v54 }
 0x1c6   : > { %v7812_v12 = vpop.f32.mrf.mxu0  ;;  %v7852_v13 = vpop.f32.mrf.mxu1 }
 0x1c7   : > { %v7813_v14 = vadd.f32 %v7812_v12, %v7811_v7  ;;  %v7853_v15 = vadd.f32 %v7852_v13, %v7851_v8 }
 0x1c8   : > { %7873 = vmatpush3.bf16.msra.mxu0 %v10217_v16  ;;  %v7814_v17 = vpop.f32.mrf.mxu0  ;;  %v7854_v18 = vpop.f32.mrf.mxu1 }
 0x1c9   : > { %v842_v19 = vpack.c.bf16 %v7813_v14, %v7810_v9  ;;  %v956_v20 = vpack.c.bf16 %v7853_v15, %v7850_v10  ;;  %7874 = vmatprep.subr.bf16.mxu0 %v10221_v21 }
 0x1ca   : > { %v7815_v22 = vpop.f32.mrf.mxu0  ;;  %v7855_v23 = vpop.f32.mrf.mxu1 }
 0x1cb   : > { %v7816_v24 = vadd.f32 %v7815_v22, %v7814_v17  ;;  %v7856_v25 = vadd.f32 %v7855_v23, %v7854_v18  ;;  %8258 = vmatprep.mubr.msk.bf16.mxu0 %vm960_vm1, %v956_v20  ;;  %8268 = vmatprep.mubr.msk.bf16.mxu1 %vm960_vm1, %v842_v19 }
 0x1cc   : > { %7875 = vmatpush3.bf16.msra.mxu0 %v10227_v26  ;;  %v7857_v27 = vpop.f32.mrf.mxu1  ;;  %v7817_v29 = vpop.f32.mrf.mxu0 }
 0x1cd   : > { %v843_v30 = vpack.c.bf16 %v7816_v24, %v7816_v24  ;;  %v957_v31 = vpack.c.bf16 %v7856_v25, %v7856_v25  ;;  %7876 = vmatprep.subr.bf16.mxu0 %v10231_v32 }
 0x1ce   : > { %v7858_v33 = vpop.f32.mrf.mxu1  ;;  %v7818_v34 = vpop.f32.mrf.mxu0 }
 0x1cf   : > { %8259 = vmatmul.mubr.msk.bf16.gmra.mxu0 %vm960_vm1, %v957_v31  ;;  %8269 = vmatmul.mubr.msk.bf16.gmra.mxu1 %vm960_vm1, %v843_v30 }
 0x1d0   : > { %7877 = vmatpush3.bf16.msra.mxu0 %v10237_v35  ;;  %1197 = vmatprep.mubr.bf16.mxu0 %v8666_v28 }
 0x1d1   : > { %7878 = vmatprep.subr.bf16.mxu0 %v10241_v36 }
 0x1d4   : > { %7879 = vmatpush3.bf16.msra.mxu0 %v10245_v37 }
 0x1d5   : > { %7880 = vmatprep.subr.bf16.mxu0 %v10249_v38 }
 0x1d8   : > { %7881 = vmatpush3.bf16.msra.mxu0 %v10253_v39 }
 0x1d9   : > { %7882 = vmatprep.subr.bf16.mxu0 %v10257_v40 }
 0x1dc   : > { %7883 = vmatpush3.bf16.msra.mxu0 %v10261_v41 }
 0x1dd   : > { %7884 = vmatprep.subr.bf16.mxu0 %v10265_v42 }
 0x1e0   : > { %7885 = vmatpush3.bf16.msra.mxu0 %v10269_v44 }
 0x1e3   : > { %1198 = vmatmul.mubr.bf16.vlgmr.msra.gmra.mxu0 %v8664_v43 }
 0x1e4   : > { %1205 = vmatprep.mubr.bf16.mxu0 %v8667_v45 }
 0x1eb   : > { %1206 = vmatmul.mubr.bf16.gmra.mxu0 %v8669_v46 }
 0x1ec   : > { %1213 = vmatprep.mubr.bf16.mxu0 %v8670_v47 }
 0x1f3   : > { %1214 = vmatmul.mubr.bf16.gmra.mxu0 %v8672_v49 }
 0x1f4   : > { %1221 = vmatprep.mubr.bf16.mxu0 %v7200_v50 }
 0x1fb   : > { %1222 = vmatmul.mubr.bf16.gmra.mxu0 %v7199_v51  ;;  %v8677_v51 = vld [vmem:[#allocation2 + $0xac] ss:$8 sps:$4 sm:$0xff]  }
 0x283   : > { %v8256_v55 = vpop.f32.mrf.mxu0  ;;  %v8266_v56 = vpop.f32.mrf.mxu1 }
 0x284   : > { %v10278_v57 = vadd.f32 %v8266_v56, %v8256_v55  ;;  %v8675_v55 = vld [vmem:[#allocation2 + $0xa8] ss:$8 sps:$4 sm:$0xff]   ;;  %v8678_v56 = vld [vmem:[#allocation2 + $0xbc] ss:$8 sps:$4 sm:$0xff]  }
 0x285   : > { %v1011_v58 = vpop.f32.mrf.mxu0  ;;  %v1090_v59 = vpop.f32.mrf.mxu1 }
 0x286   : > { %v10280_v60 = vadd.f32 %v1090_v59, %v1011_v58  ;;  %v8680_v58 = vld [vmem:[#allocation2 + $0xb8] ss:$8 sps:$4 sm:$0xff]   ;;  %v8681_v59 = vld [vmem:[#allocation2 + $0xcc] ss:$8 sps:$4 sm:$0xff]  }
 0x287   : > { %v8257_v61 = vpop.f32.mrf.mxu0  ;;  %v8267_v62 = vpop.f32.mrf.mxu1 }
 0x288   : > { %v10282_v63 = vadd.f32 %v8267_v62, %v8257_v61  ;;  %v1328_v61 = vld [vmem:[#allocation2 + $0xd8] sm:$0x11]  ;;  %v8683_v62 = vld [vmem:[#allocation2 + $0xc8] ss:$8 sps:$4 sm:$0xff]  }
 0x289   : > { %v10284_v0 = vpop.f32.mrf.mxu0  ;;  %v10286_v1 = vpop.f32.mrf.mxu1 }
 0x28f   : > { %v8260_v2 = vpop.f32.mrf.mxu0  ;;  %v8270_v3 = vpop.f32.mrf.mxu1 }
 0x290   : > { %v10288_v4 = vadd.f32 %v8270_v3, %v8260_v2  ;;  %v7212_v2 = vcombine.high %v1328_v61, %v1328_v61  ;;  %v7211_v3 = vcombine.low %v1328_v61, %v1328_v61 }
 0x291   : > { %v1027_v5 = vpop.f32.mrf.mxu0  ;;  %v1106_v7 = vpop.f32.mrf.mxu1 }
 0x292   : > { %v10290_v8 = vadd.f32 %v1106_v7, %v1027_v5  ;;  %v8688_v5 = vld [vmem:[#allocation2 + $0xe4] ss:$8 sps:$4 sm:$0xff]   ;;  %v8686_v7 = vld [vmem:[#allocation2 + $0xe0] ss:$8 sps:$4 sm:$0xff]  }
 0x293   : > { %v8261_v9 = vpop.f32.mrf.mxu0  ;;  %v8271_v10 = vpop.f32.mrf.mxu1 }
 0x294   : > { %v8689_v9 = vld [vmem:[#allocation2 + $0xf4] ss:$8 sps:$4 sm:$0xff]   ;;  %v8691_v10 = vld [vmem:[#allocation2 + $0xf0] ss:$8 sps:$4 sm:$0xff]  }
 0x295   : > { %v10292_v12 = vpop.f32.mrf.mxu0 }
 0x2a3   : > { %v7886_v13 = vpop.f32.mrf.mxu0 }
 0x2a5   : > { %v7887_v14 = vpop.f32.mrf.mxu0 }
 0x2a6   : > { %v7888_v18 = vadd.f32 %v7887_v14, %v7886_v13  ;;  %v8692_v13 = vld [vmem:[#allocation2 + $0x104] ss:$8 sps:$4 sm:$0xff]   ;;  %v1529_v14 = vld [vmem:[#allocation2 + $0x110] sm:$0x11] }
 0x2a7   : > { %v7889_v15 = vpop.f32.mrf.mxu0 }
 0x2a9   : > { %v7890_v17 = vpop.f32.mrf.mxu0 }
 0x2aa   : > { %v7891_v19 = vadd.f32 %v7890_v17, %v7889_v15  ;;  %v8694_v15 = vld [vmem:[#allocation2 + $0x100] ss:$8 sps:$4 sm:$0xff]   ;;  %v7224_v17 = vcombine.high %v1529_v14, %v1529_v14 }
 0x2ab   : > { %v7892_v20 = vpop.f32.mrf.mxu0 }
 0x2ac   : > { %v1229_v22 = vpack.c.bf16 %v7891_v19, %v7888_v18  ;;  %v7223_v18 = vcombine.low %v1529_v14, %v1529_v14  ;;  %v1435_v19 = vld [vmem:[#allocation7 + $0xc] sm:$0xf] }
 0x2ad   : > { %v7893_v23 = vpop.f32.mrf.mxu0  ;;  %8453 = vmatprep.subr.msk.bf16.mxu0 %vm973_vm0, %v1435_v19 }
 0x2ae   : > { %8274 = vmatprep.mubr.msk.bf16.mxu1 %vm960_vm1, %v1229_v22  ;;  %v7894_v27 = vadd.f32 %v7893_v23, %v7892_v20  ;;  %v1449_v20 = vsel %vm973_vm0, %v1435_v19, 0  ;;  %v1636_v22 = vld [vmem:[#allocation7 + $0x10] sm:$0xf]  ;;  %v10332_v23 = vpop.f32.mrf.mxu1 }
 0x2af   : > { %v7895_v24 = vpop.f32.mrf.mxu0  ;;  %8283 = vmatpush3.bf16.msra.mxu0 %v1449_v20  ;;  %v1650_v61 = vsel %vm973_vm0, %v1636_v22, 0 }
 0x2b0   : > { %8454 = vmatprep.subr.msk.bf16.mxu0 %vm973_vm0, %v1636_v22 }
 0x2b1   : > { %v7896_v25 = vpop.f32.mrf.mxu0 }
 0x2b2   : > { %v7897_v28 = vadd.f32 %v7896_v25, %v7895_v24 }
 0x2b3   : > { %v7898_v29 = vpop.f32.mrf.mxu0 }
 0x2b4   : > { %v1230_v30 = vpack.c.bf16 %v7897_v28, %v7894_v27 }
 0x2b5   : > { %v7899_v31 = vpop.f32.mrf.mxu0 }
 0x2b6   : > { %8275 = vmatmul.mubr.msk.bf16.vlgmr.msra.gmra.mxu1 %vm960_vm1, %v1230_v30  ;;  %v7900_v34 = vadd.f32 %v7899_v31, %v7898_v29 }
 0x2b7   : > { %7916 = vmatpush3.bf16.msra.mxu1 %v10209_v6  ;;  %v7901_v33 = vpop.f32.mrf.mxu0 }
 0x2b8   : > { %7917 = vmatprep.subr.bf16.mxu1 %v10213_v11 }
 0x2b9   : > { %v7902_v43 = vpop.f32.mrf.mxu0 }
 0x2ba   : > { %v7903_v45 = vadd.f32 %v7902_v43, %v7901_v33 }
 0x2bb   : > { %7918 = vmatpush3.bf16.msra.mxu1 %v10217_v16  ;;  %v7904_v46 = vpop.f32.mrf.mxu0 }
 0x2bc   : > { %v1231_v47 = vpack.c.bf16 %v7903_v45, %v7900_v34  ;;  %7919 = vmatprep.subr.bf16.mxu1 %v10221_v21 }
 0x2bd   : > { %v7905_v48 = vpop.f32.mrf.mxu0 }
 0x2be   : > { %v7906_v49 = vadd.f32 %v7905_v48, %v7904_v46  ;;  %8278 = vmatprep.mubr.msk.bf16.mxu1 %vm960_vm1, %v1231_v47 }
 0x2bf   : > { %7920 = vmatpush3.bf16.msra.mxu1 %v10227_v26  ;;  %v7907_v50 = vpop.f32.mrf.mxu0 }
 0x2c0   : > { %v1232_v52 = vpack.c.bf16 %v7906_v49, %v7906_v49  ;;  %7921 = vmatprep.subr.bf16.mxu1 %v10231_v32 }
 0x2c1   : > { %v7908_v53 = vpop.f32.mrf.mxu0 }
 0x2c2   : > { %8279 = vmatmul.mubr.msk.bf16.gmra.mxu1 %vm960_vm1, %v1232_v52 }
 0x2c3   : > { %7922 = vmatpush3.bf16.msra.mxu1 %v10237_v35  ;;  %1398 = vmatprep.mubr.bf16.mxu1 %v8677_v51 }
 0x2c4   : > { %7923 = vmatprep.subr.bf16.mxu1 %v10241_v36 }
 0x2c7   : > { %7924 = vmatpush3.bf16.msra.mxu1 %v10245_v37 }
 0x2c8   : > { %7925 = vmatprep.subr.bf16.mxu1 %v10249_v38 }
 0x2cb   : > { %7926 = vmatpush3.bf16.msra.mxu1 %v10253_v39 }
 0x2cc   : > { %7927 = vmatprep.subr.bf16.mxu1 %v10257_v40 }
 0x2cf   : > { %7928 = vmatpush3.bf16.msra.mxu1 %v10261_v41 }
 0x2d0   : > { %7929 = vmatprep.subr.bf16.mxu1 %v10265_v42 }
 0x2d3   : > { %7930 = vmatpush3.bf16.msra.mxu1 %v10269_v44 }
 0x2d4   : > { %7960 = vmatprep.subr.bf16.mxu1 %v10275_v54 }
 0x2d6   : > { %1399 = vmatmul.mubr.bf16.vlgmr.msra.gmra.mxu1 %v8675_v55 }
 0x2d7   : > { %7961 = vmatpush3.bf16.msra.mxu1 %v10209_v6  ;;  %1406 = vmatprep.mubr.bf16.mxu1 %v8678_v56 }
 0x2d8   : > { %7962 = vmatprep.subr.bf16.mxu1 %v10213_v11 }
 0x2db   : > { %7963 = vmatpush3.bf16.msra.mxu1 %v10217_v16 }
 0x2dc   : > { %7964 = vmatprep.subr.bf16.mxu1 %v10221_v21 }
 0x2de   : > { %1407 = vmatmul.mubr.bf16.gmra.mxu1 %v8680_v58 }
 0x2df   : > { %7965 = vmatpush3.bf16.msra.mxu1 %v10227_v26  ;;  %1414 = vmatprep.mubr.bf16.mxu1 %v8681_v59 }
 0x2e0   : > { %7966 = vmatprep.subr.bf16.mxu1 %v10231_v32 }
 0x2e3   : > { %7967 = vmatpush3.bf16.msra.mxu1 %v10237_v35 }
 0x2e4   : > { %7968 = vmatprep.subr.bf16.mxu1 %v10241_v36 }
 0x2e6   : > { %1415 = vmatmul.mubr.bf16.gmra.mxu1 %v8683_v62 }
 0x2e7   : > { %7969 = vmatpush3.bf16.msra.mxu1 %v10245_v37  ;;  %1422 = vmatprep.mubr.bf16.mxu1 %v7212_v2 }
 0x2e8   : > { %7970 = vmatprep.subr.bf16.mxu1 %v10249_v38 }
 0x2eb   : > { %7971 = vmatpush3.bf16.msra.mxu1 %v10253_v39 }
 0x2ec   : > { %7972 = vmatprep.subr.bf16.mxu1 %v10257_v40 }
 0x2ee   : > { %1423 = vmatmul.mubr.bf16.gmra.mxu1 %v7211_v3 }
 0x2ef   : > { %7973 = vmatpush3.bf16.msra.mxu1 %v10261_v41  ;;  %1599 = vmatprep.mubr.bf16.mxu1 %v8688_v5 }
 0x2f0   : > { %7974 = vmatprep.subr.bf16.mxu1 %v10265_v42 }
 0x2f3   : > { %7975 = vmatpush3.bf16.msra.mxu1 %v10269_v44 }
 0x2f6   : > { %1600 = vmatmul.mubr.bf16.vlgmr.msra.gmra.mxu1 %v8686_v7 }
 0x2f7   : > { %1607 = vmatprep.mubr.bf16.mxu1 %v8689_v9 }
 0x2fe   : > { %1608 = vmatmul.mubr.bf16.gmra.mxu1 %v8691_v10 }
 0x2ff   : > { %1615 = vmatprep.mubr.bf16.mxu1 %v8692_v13 }
 0x306   : > { %1616 = vmatmul.mubr.bf16.gmra.mxu1 %v8694_v15 }
 0x307   : > { %1623 = vmatprep.mubr.bf16.mxu1 %v7224_v17 }
 0x30e   : > { %1624 = vmatmul.mubr.bf16.gmra.mxu1 %v7223_v18 }
 0x376   : > { %v8276_v24 = vpop.f32.mrf.mxu1 }
 0x377   : > { %v10335_v25 = vadd.f32 %v8276_v24, %v10278_v57 }
 0x378   : > { %v1284_v27 = vpop.f32.mrf.mxu1 }
 0x379   : > { %v10338_v28 = vadd.f32 %v1284_v27, %v10280_v60 }
 0x37a   : > { %v8277_v29 = vpop.f32.mrf.mxu1 }
 0x37b   : > { %v10341_v30 = vadd.f32 %v8277_v29, %v10282_v63 }
 0x37c   : > { %v10343_v31 = vpop.f32.mrf.mxu1 }
 0x382   : > { %v8280_v33 = vpop.f32.mrf.mxu1 }
 0x383   : > { %v10346_v34 = vadd.f32 %v8280_v33, %v10288_v4 }
 0x384   : > { %v1300_v43 = vpop.f32.mrf.mxu1 }
 0x385   : > { %v10349_v45 = vadd.f32 %v1300_v43, %v10290_v8 }
 0x386   : > { %v8281_v57 = vpop.f32.mrf.mxu1 }
 0x388   : > { %v10351_v46 = vpop.f32.mrf.mxu1 }
 0x396   : > { %v7931_v47 = vpop.f32.mrf.mxu1 }
 0x398   : > { %v7932_v60 = vpop.f32.mrf.mxu1 }
 0x399   : > { %v7933_v50 = vadd.f32 %v7932_v60, %v7931_v47 }
 0x39a   : > { %v7934_v48 = vpop.f32.mrf.mxu1 }
 0x39c   : > { %v7935_v49 = vpop.f32.mrf.mxu1 }
 0x39d   : > { %v7936_v63 = vadd.f32 %v7935_v49, %v7934_v48 }
 0x39e   : > { %v7937_v51 = vpop.f32.mrf.mxu1 }
 0x39f   : > { %v1430_v52 = vpack.c.bf16 %v7936_v63, %v7933_v50 }
 0x3a0   : > { %v7938_v53 = vpop.f32.mrf.mxu1 }
 0x3a1   : > { %8284 = vmatprep.mubr.msk.bf16.mxu0 %vm960_vm1, %v1430_v52  ;;  %v7939_v56 = vadd.f32 %v7938_v53, %v7937_v51 }
 0x3a2   : > { %v7940_v4 = vpop.f32.mrf.mxu1 }
 0x3a4   : > { %v7941_v55 = vpop.f32.mrf.mxu1 }
 0x3a5   : > { %v7942_v58 = vadd.f32 %v7941_v55, %v7940_v4 }
 0x3a6   : > { %v7943_v8 = vpop.f32.mrf.mxu1 }
 0x3a7   : > { %v1431_v59 = vpack.c.bf16 %v7942_v58, %v7939_v56 }
 0x3a8   : > { %v7944_v62 = vpop.f32.mrf.mxu1 }
 0x3a9   : > { %8285 = vmatmul.mubr.msk.bf16.vlgmr.msra.gmra.mxu0 %vm960_vm1, %v1431_v59  ;;  %v7945_v5 = vadd.f32 %v7944_v62, %v7943_v8  ;;  %v8699_v62 = vld [vmem:[#allocation2 + $0x11c] ss:$8 sps:$4 sm:$0xff]  }
 0x3aa   : > { %v7946_v2 = vpop.f32.mrf.mxu1  ;;  %8293 = vmatpush3.bf16.msra.mxu0 %v1650_v61 }
 0x3ab   : > { %8005 = vmatprep.subr.bf16.mxu0 %v10275_v54 }
 0x3ac   : > { %v7947_v3 = vpop.f32.mrf.mxu1 }
 0x3ad   : > { %v7948_v7 = vadd.f32 %v7947_v3, %v7946_v2 }
 0x3ae   : > { %v7949_v9 = vpop.f32.mrf.mxu1 }
 0x3af   : > { %v1432_v10 = vpack.c.bf16 %v7948_v7, %v7945_v5  ;;  %v8697_v5 = vld [vmem:[#allocation2 + $0x118] ss:$8 sps:$4 sm:$0xff]   ;;  %v8700_v7 = vld [vmem:[#allocation2 + $0x12c] ss:$8 sps:$4 sm:$0xff]  }
 0x3b0   : > { %v7950_v13 = vpop.f32.mrf.mxu1 }
 0x3b1   : > { %v7951_v14 = vadd.f32 %v7950_v13, %v7949_v9  ;;  %8288 = vmatprep.mubr.msk.bf16.mxu0 %vm960_vm1, %v1432_v10  ;;  %v8702_v9 = vld [vmem:[#allocation2 + $0x128] ss:$8 sps:$4 sm:$0xff]   ;;  %v8703_v10 = vld [vmem:[#allocation2 + $0x13c] ss:$8 sps:$4 sm:$0xff]  }
 0x3b2   : > { %v7952_v15 = vpop.f32.mrf.mxu1  ;;  %v1730_v13 = vld [vmem:[#allocation2 + $0x148] sm:$0x11] }
 0x3b3   : > { %v1433_v17 = vpack.c.bf16 %v7951_v14, %v7951_v14  ;;  %v8705_v14 = vld [vmem:[#allocation2 + $0x138] ss:$8 sps:$4 sm:$0xff]   ;;  %v7236_v15 = vcombine.high %v1730_v13, %v1730_v13 }
 0x3b4   : > { %v7953_v18 = vpop.f32.mrf.mxu1 }
 0x3b5   : > { %8289 = vmatmul.mubr.msk.bf16.gmra.mxu0 %vm960_vm1, %v1433_v17  ;;  %v7235_v17 = vcombine.low %v1730_v13, %v1730_v13  ;;  %v8710_v18 = vld [vmem:[#allocation2 + $0x154] ss:$8 sps:$4 sm:$0xff]  }
 0x3b6   : > { %v7976_v19 = vpop.f32.mrf.mxu1 }
 0x3b8   : > { %v7977_v20 = vpop.f32.mrf.mxu1 }
 0x3b9   : > { %v7978_v27 = vadd.f32 %v7977_v20, %v7976_v19  ;;  %v8708_v19 = vld [vmem:[#allocation2 + $0x150] ss:$8 sps:$4 sm:$0xff]   ;;  %v8711_v20 = vld [vmem:[#allocation2 + $0x164] ss:$8 sps:$4 sm:$0xff]  }
 0x3ba   : > { %v7979_v22 = vpop.f32.mrf.mxu1 }
 0x3bc   : > { %v7980_v24 = vpop.f32.mrf.mxu1 }
 0x3bd   : > { %v7981_v29 = vadd.f32 %v7980_v24, %v7979_v22  ;;  %v8713_v22 = vld [vmem:[#allocation2 + $0x160] ss:$8 sps:$4 sm:$0xff]   ;;  %v8714_v24 = vld [vmem:[#allocation2 + $0x174] ss:$8 sps:$4 sm:$0xff]  }
 0x3be   : > { %v7982_v33 = vpop.f32.mrf.mxu1 }
 0x3bf   : > { %v1631_v43 = vpack.c.bf16 %v7981_v29, %v7978_v27  ;;  %v1931_v27 = vld [vmem:[#allocation2 + $0x180] sm:$0x11]  ;;  %v8716_v29 = vld [vmem:[#allocation2 + $0x170] ss:$8 sps:$4 sm:$0xff]  }
 0x3c0   : > { %v7983_v57 = vpop.f32.mrf.mxu1 }
 0x3c1   : > { %8294 = vmatprep.mubr.msk.bf16.mxu0 %vm960_vm1, %v1631_v43  ;;  %v7984_v48 = vadd.f32 %v7983_v57, %v7982_v33  ;;  %v7248_v33 = vcombine.high %v1931_v27, %v1931_v27  ;;  %v7247_v43 = vcombine.low %v1931_v27, %v1931_v27  ;;  %v1837_v57 = vld [vmem:[#allocation7 + $0x14] sm:$0xf] }
 0x3c2   : > { %v7985_v47 = vpop.f32.mrf.mxu1  ;;  %8455 = vmatprep.subr.msk.bf16.mxu1 %vm973_vm0, %v1837_v57 }
 0x3c4   : > { %v7986_v60 = vpop.f32.mrf.mxu1 }
 0x3c5   : > { %v7987_v49 = vadd.f32 %v7986_v60, %v7985_v47  ;;  %v1851_v47 = vsel %vm973_vm0, %v1837_v57, 0  ;;  %v2038_v60 = vld [vmem:[#allocation7 + $0x18] sm:$0xf] }
 0x3c6   : > { %v7988_v50 = vpop.f32.mrf.mxu1  ;;  %8303 = vmatpush3.bf16.msra.mxu1 %v1851_v47 }
 0x3c7   : > { %v1632_v63 = vpack.c.bf16 %v7987_v49, %v7984_v48  ;;  %8456 = vmatprep.subr.msk.bf16.mxu1 %vm973_vm0, %v2038_v60 }
 0x3c8   : > { %v7989_v51 = vpop.f32.mrf.mxu1 }
 0x3c9   : > { %8295 = vmatmul.mubr.msk.bf16.vlgmr.msra.gmra.mxu0 %vm960_vm1, %v1632_v63  ;;  %v7990_v53 = vadd.f32 %v7989_v51, %v7988_v50 }
 0x3ca   : > { %8006 = vmatpush3.bf16.msra.mxu0 %v10209_v6  ;;  %v7991_v52 = vpop.f32.mrf.mxu1 }
 0x3cb   : > { %8007 = vmatprep.subr.bf16.mxu0 %v10213_v11 }
 0x3cc   : > { %v7992_v4 = vpop.f32.mrf.mxu1 }
 0x3cd   : > { %v7993_v55 = vadd.f32 %v7992_v4, %v7991_v52 }
 0x3ce   : > { %8008 = vmatpush3.bf16.msra.mxu0 %v10217_v16  ;;  %v7994_v56 = vpop.f32.mrf.mxu1 }
 0x3cf   : > { %v1633_v58 = vpack.c.bf16 %v7993_v55, %v7990_v53  ;;  %8009 = vmatprep.subr.bf16.mxu0 %v10221_v21 }
 0x3d0   : > { %v7995_v8 = vpop.f32.mrf.mxu1 }
 0x3d1   : > { %v7996_v59 = vadd.f32 %v7995_v8, %v7994_v56  ;;  %8298 = vmatprep.mubr.msk.bf16.mxu0 %vm960_vm1, %v1633_v58 }
 0x3d2   : > { %8010 = vmatpush3.bf16.msra.mxu0 %v10227_v26  ;;  %v7997_v61 = vpop.f32.mrf.mxu1 }
 0x3d3   : > { %v1634_v2 = vpack.c.bf16 %v7996_v59, %v7996_v59  ;;  %8011 = vmatprep.subr.bf16.mxu0 %v10231_v32 }
 0x3d4   : > { %v7998_v3 = vpop.f32.mrf.mxu1 }
 0x3d5   : > { %8299 = vmatmul.mubr.msk.bf16.gmra.mxu0 %vm960_vm1, %v1634_v2 }
 0x3d6   : > { %8012 = vmatpush3.bf16.msra.mxu0 %v10237_v35  ;;  %1800 = vmatprep.mubr.bf16.mxu0 %v8699_v62 }
 0x3d7   : > { %8013 = vmatprep.subr.bf16.mxu0 %v10241_v36 }
 0x3da   : > { %8014 = vmatpush3.bf16.msra.mxu0 %v10245_v37 }
 0x3db   : > { %8015 = vmatprep.subr.bf16.mxu0 %v10249_v38 }
 0x3de   : > { %8016 = vmatpush3.bf16.msra.mxu0 %v10253_v39 }
 0x3df   : > { %8017 = vmatprep.subr.bf16.mxu0 %v10257_v40 }
 0x3e2   : > { %8018 = vmatpush3.bf16.msra.mxu0 %v10261_v41 }
 0x3e3   : > { %8019 = vmatprep.subr.bf16.mxu0 %v10265_v42 }
 0x3e6   : > { %8020 = vmatpush3.bf16.msra.mxu0 %v10269_v44 }
 0x3e7   : > { %8050 = vmatprep.subr.bf16.mxu0 %v10275_v54 }
 0x3e9   : > { %1801 = vmatmul.mubr.bf16.vlgmr.msra.gmra.mxu0 %v8697_v5 }
 0x3ea   : > { %8051 = vmatpush3.bf16.msra.mxu0 %v10209_v6  ;;  %1808 = vmatprep.mubr.bf16.mxu0 %v8700_v7 }
 0x3eb   : > { %8052 = vmatprep.subr.bf16.mxu0 %v10213_v11 }
 0x3ee   : > { %8053 = vmatpush3.bf16.msra.mxu0 %v10217_v16 }
 0x3ef   : > { %8054 = vmatprep.subr.bf16.mxu0 %v10221_v21 }
 0x3f1   : > { %1809 = vmatmul.mubr.bf16.gmra.mxu0 %v8702_v9 }
 0x3f2   : > { %8055 = vmatpush3.bf16.msra.mxu0 %v10227_v26  ;;  %1816 = vmatprep.mubr.bf16.mxu0 %v8703_v10 }
 0x3f3   : > { %8056 = vmatprep.subr.bf16.mxu0 %v10231_v32 }
 0x3f6   : > { %8057 = vmatpush3.bf16.msra.mxu0 %v10237_v35 }
 0x3f7   : > { %8058 = vmatprep.subr.bf16.mxu0 %v10241_v36 }
 0x3f9   : > { %1817 = vmatmul.mubr.bf16.gmra.mxu0 %v8705_v14 }
 0x3fa   : > { %8059 = vmatpush3.bf16.msra.mxu0 %v10245_v37  ;;  %1824 = vmatprep.mubr.bf16.mxu0 %v7236_v15 }
 0x3fb   : > { %8060 = vmatprep.subr.bf16.mxu0 %v10249_v38 }
 0x3fe   : > { %8061 = vmatpush3.bf16.msra.mxu0 %v10253_v39 }
 0x3ff   : > { %8062 = vmatprep.subr.bf16.mxu0 %v10257_v40 }
 0x401   : > { %1825 = vmatmul.mubr.bf16.gmra.mxu0 %v7235_v17 }
 0x402   : > { %8063 = vmatpush3.bf16.msra.mxu0 %v10261_v41  ;;  %2001 = vmatprep.mubr.bf16.mxu0 %v8710_v18 }
 0x403   : > { %8064 = vmatprep.subr.bf16.mxu0 %v10265_v42 }
 0x406   : > { %8065 = vmatpush3.bf16.msra.mxu0 %v10269_v44 }
 0x409   : > { %2002 = vmatmul.mubr.bf16.vlgmr.msra.gmra.mxu0 %v8708_v19 }
 0x40a   : > { %2009 = vmatprep.mubr.bf16.mxu0 %v8711_v20 }
 0x411   : > { %2010 = vmatmul.mubr.bf16.gmra.mxu0 %v8713_v22 }
 0x412   : > { %2017 = vmatprep.mubr.bf16.mxu0 %v8714_v24 }
 0x419   : > { %2018 = vmatmul.mubr.bf16.gmra.mxu0 %v8716_v29 }
 0x41a   : > { %2025 = vmatprep.mubr.bf16.mxu0 %v7248_v33 }
 0x421   : > { %2026 = vmatmul.mubr.bf16.gmra.mxu0 %v7247_v43 }
 0x469   : > { %v8286_v48 = vpop.f32.mrf.mxu0 }
 0x46a   : > { %v1517_v49 = vadd.f32 %v8286_v48, %v10335_v25  ;;  %v2052_v48 = vsel %vm973_vm0, %v2038_v60, 0 }
 0x46b   : > { %v1485_v50 = vpop.f32.mrf.mxu0 }
 0x46c   : > { %v1515_v63 = vadd.f32 %v1485_v50, %v10338_v28 }
 0x46d   : > { %v8287_v51 = vpop.f32.mrf.mxu0 }
 0x46e   : > { %v1518_v52 = vadd.f32 %v8287_v51, %v10341_v30 }
 0x46f   : > { %v10400_v53 = vpop.f32.mrf.mxu0 }
 0x475   : > { %v8290_v4 = vpop.f32.mrf.mxu0 }
 0x476   : > { %v1521_v55 = vadd.f32 %v8290_v4, %v10346_v34 }
 0x477   : > { %v1501_v56 = vpop.f32.mrf.mxu0 }
 0x478   : > { %v1519_v58 = vadd.f32 %v1501_v56, %v10349_v45 }
 0x479   : > { %v8291_v8 = vpop.f32.mrf.mxu0 }
 0x47b   : > { %v10404_v59 = vpop.f32.mrf.mxu0 }
 0x489   : > { %v8296_v61 = vpop.f32.mrf.mxu0 }
 0x48a   : > { %v10406_v62 = vadd.f32 %v8296_v61, %v1517_v49 }
 0x48b   : > { %v1686_v25 = vpop.f32.mrf.mxu0 }
 0x48c   : > { %v10408_v2 = vadd.f32 %v1686_v25, %v1515_v63 }
 0x48d   : > { %v8297_v28 = vpop.f32.mrf.mxu0 }
 0x48e   : > { %v10410_v3 = vadd.f32 %v8297_v28, %v1518_v52 }
 0x48f   : > { %v10412_v30 = vpop.f32.mrf.mxu0 }
 0x495   : > { %v8300_v5 = vpop.f32.mrf.mxu0 }
 0x496   : > { %v10414_v7 = vadd.f32 %v8300_v5, %v1521_v55 }
 0x497   : > { %v1702_v34 = vpop.f32.mrf.mxu0 }
 0x498   : > { %v10416_v9 = vadd.f32 %v1702_v34, %v1519_v58 }
 0x499   : > { %v8301_v45 = vpop.f32.mrf.mxu0 }
 0x49b   : > { %v10418_v10 = vpop.f32.mrf.mxu0 }
 0x4a9   : > { %v8021_v13 = vpop.f32.mrf.mxu0 }
 0x4ab   : > { %v8022_v14 = vpop.f32.mrf.mxu0 }
 0x4ac   : > { %v8023_v18 = vadd.f32 %v8022_v14, %v8021_v13 }
 0x4ad   : > { %v8024_v15 = vpop.f32.mrf.mxu0 }
 0x4af   : > { %v8025_v17 = vpop.f32.mrf.mxu0 }
 0x4b0   : > { %v8026_v19 = vadd.f32 %v8025_v17, %v8024_v15 }
 0x4b1   : > { %v8027_v20 = vpop.f32.mrf.mxu0 }
 0x4b2   : > { %v1832_v22 = vpack.c.bf16 %v8026_v19, %v8023_v18 }
 0x4b3   : > { %v8028_v24 = vpop.f32.mrf.mxu0 }
 0x4b4   : > { %8304 = vmatprep.mubr.msk.bf16.mxu1 %vm960_vm1, %v1832_v22  ;;  %v8029_v33 = vadd.f32 %v8028_v24, %v8027_v20 }
 0x4b5   : > { %v8030_v27 = vpop.f32.mrf.mxu0 }
 0x4b7   : > { %v8031_v29 = vpop.f32.mrf.mxu0 }
 0x4b8   : > { %v8032_v43 = vadd.f32 %v8031_v29, %v8030_v27 }
 0x4b9   : > { %v8033_v57 = vpop.f32.mrf.mxu0 }
 0x4ba   : > { %v1833_v47 = vpack.c.bf16 %v8032_v43, %v8029_v33 }
 0x4bb   : > { %v8034_v49 = vpop.f32.mrf.mxu0 }
 0x4bc   : > { %8305 = vmatmul.mubr.msk.bf16.vlgmr.msra.gmra.mxu1 %vm960_vm1, %v1833_v47  ;;  %v8035_v51 = vadd.f32 %v8034_v49, %v8033_v57 }
 0x4bd   : > { %v8036_v50 = vpop.f32.mrf.mxu0  ;;  %8313 = vmatpush3.bf16.msra.mxu1 %v2052_v48 }
 0x4be   : > { %8095 = vmatprep.subr.bf16.mxu1 %v10275_v54 }
 0x4bf   : > { %v8037_v63 = vpop.f32.mrf.mxu0 }
 0x4c0   : > { %v8038_v52 = vadd.f32 %v8037_v63, %v8036_v50 }
 0x4c1   : > { %v8039_v4 = vpop.f32.mrf.mxu0 }
 0x4c2   : > { %v1834_v55 = vpack.c.bf16 %v8038_v52, %v8035_v51  ;;  %v8721_v52 = vld [vmem:[#allocation2 + $0x18c] ss:$8 sps:$4 sm:$0xff]  }
 0x4c3   : > { %v8040_v56 = vpop.f32.mrf.mxu0 }
 0x4c4   : > { %v8041_v58 = vadd.f32 %v8040_v56, %v8039_v4  ;;  %8308 = vmatprep.mubr.msk.bf16.mxu1 %vm960_vm1, %v1834_v55  ;;  %v8719_v56 = vld [vmem:[#allocation2 + $0x188] ss:$8 sps:$4 sm:$0xff]  }
 0x4c5   : > { %v8042_v8 = vpop.f32.mrf.mxu0 }
 0x4c6   : > { %v1835_v61 = vpack.c.bf16 %v8041_v58, %v8041_v58  ;;  %v8722_v58 = vld [vmem:[#allocation2 + $0x19c] ss:$8 sps:$4 sm:$0xff]   ;;  %v8724_v8 = vld [vmem:[#allocation2 + $0x198] ss:$8 sps:$4 sm:$0xff]  }
 0x4c7   : > { %v8043_v25 = vpop.f32.mrf.mxu0 }
 0x4c8   : > { %8309 = vmatmul.mubr.msk.bf16.gmra.mxu1 %vm960_vm1, %v1835_v61  ;;  %v8725_v61 = vld [vmem:[#allocation2 + $0x1ac] ss:$8 sps:$4 sm:$0xff]   ;;  %v2132_v25 = vld [vmem:[#allocation2 + $0x1b8] sm:$0x11] }
 0x4c9   : > { %v8066_v60 = vpop.f32.mrf.mxu0 }
 0x4cb   : > { %v8067_v28 = vpop.f32.mrf.mxu0 }
 0x4cc   : > { %v8068_v45 = vadd.f32 %v8067_v28, %v8066_v60 }
 0x4cd   : > { %v8069_v5 = vpop.f32.mrf.mxu0 }
 0x4cf   : > { %v8070_v34 = vpop.f32.mrf.mxu0 }
 0x4d0   : > { %v8071_v13 = vadd.f32 %v8070_v34, %v8069_v5 }
 0x4d1   : > { %v8072_v14 = vpop.f32.mrf.mxu0 }
 0x4d2   : > { %v2033_v15 = vpack.c.bf16 %v8071_v13, %v8068_v45 }
 0x4d3   : > { %v8073_v17 = vpop.f32.mrf.mxu0 }
 0x4d4   : > { %8314 = vmatprep.mubr.msk.bf16.mxu1 %vm960_vm1, %v2033_v15  ;;  %v8074_v20 = vadd.f32 %v8073_v17, %v8072_v14  ;;  %v1110_v14 = vadd.f32 %v10332_v23, %v10292_v12 }
 0x4d5   : > { %v8075_v18 = vpop.f32.mrf.mxu0 }
 0x4d6   : > { %v1319_v17 = vadd.f32 %v10351_v46, %v1110_v14 }
 0x4d7   : > { %v8076_v19 = vpop.f32.mrf.mxu0 }
 0x4d8   : > { %v8077_v22 = vadd.f32 %v8076_v19, %v8075_v18 }
 0x4d9   : > { %v8078_v24 = vpop.f32.mrf.mxu0 }
 0x4da   : > { %v2034_v27 = vpack.c.bf16 %v8077_v22, %v8074_v20  ;;  %v1520_v20 = vadd.f32 %v10404_v59, %v1319_v17 }
 0x4db   : > { %v8079_v29 = vpop.f32.mrf.mxu0 }
 0x4dc   : > { %8315 = vmatmul.mubr.msk.bf16.vlgmr.msra.gmra.mxu1 %vm960_vm1, %v2034_v27  ;;  %v8080_v43 = vadd.f32 %v8079_v29, %v8078_v24 }
 0x4dd   : > { %8096 = vmatpush3.bf16.msra.mxu1 %v10209_v6  ;;  %v8081_v33 = vpop.f32.mrf.mxu0 }
 0x4de   : > { %8097 = vmatprep.subr.bf16.mxu1 %v10213_v11 }
 0x4df   : > { %v8082_v57 = vpop.f32.mrf.mxu0 }
 0x4e0   : > { %v8083_v47 = vadd.f32 %v8082_v57, %v8081_v33 }
 0x4e1   : > { %8098 = vmatpush3.bf16.msra.mxu1 %v10217_v16  ;;  %v8084_v48 = vpop.f32.mrf.mxu0 }
 0x4e2   : > { %v2035_v49 = vpack.c.bf16 %v8083_v47, %v8080_v43  ;;  %8099 = vmatprep.subr.bf16.mxu1 %v10221_v21 }
 0x4e3   : > { %v8085_v50 = vpop.f32.mrf.mxu0 }
 0x4e4   : > { %v8086_v63 = vadd.f32 %v8085_v50, %v8084_v48  ;;  %8318 = vmatprep.mubr.msk.bf16.mxu1 %vm960_vm1, %v2035_v49 }
 0x4e5   : > { %8100 = vmatpush3.bf16.msra.mxu1 %v10227_v26  ;;  %v8087_v51 = vpop.f32.mrf.mxu0 }
 0x4e6   : > { %v2036_v4 = vpack.c.bf16 %v8086_v63, %v8086_v63  ;;  %8101 = vmatprep.subr.bf16.mxu1 %v10231_v32 }
 0x4e7   : > { %v8088_v55 = vpop.f32.mrf.mxu0 }
 0x4e8   : > { %8319 = vmatmul.mubr.msk.bf16.gmra.mxu1 %vm960_vm1, %v2036_v4 }
 0x4e9   : > { %8102 = vmatpush3.bf16.msra.mxu1 %v10237_v35  ;;  %2202 = vmatprep.mubr.bf16.mxu1 %v8721_v52 }
 0x4ea   : > { %8103 = vmatprep.subr.bf16.mxu1 %v10241_v36 }
 0x4ed   : > { %8104 = vmatpush3.bf16.msra.mxu1 %v10245_v37 }
 0x4ee   : > { %8105 = vmatprep.subr.bf16.mxu1 %v10249_v38 }
 0x4f1   : > { %8106 = vmatpush3.bf16.msra.mxu1 %v10253_v39 }
 0x4f2   : > { %8107 = vmatprep.subr.bf16.mxu1 %v10257_v40 }
 0x4f5   : > { %8108 = vmatpush3.bf16.msra.mxu1 %v10261_v41 }
 0x4f6   : > { %8109 = vmatprep.subr.bf16.mxu1 %v10265_v42 }
 0x4f9   : > { %8110 = vmatpush3.bf16.msra.mxu1 %v10269_v44 }
 0x4fa   : > { %8140 = vmatprep.subr.bf16.mxu1 %v10275_v54  ;;  %v8727_v54 = vld [vmem:[#allocation2 + $0x1a8] ss:$8 sps:$4 sm:$0xff]  }
 0x4fc   : > { %2203 = vmatmul.mubr.bf16.vlgmr.msra.gmra.mxu1 %v8719_v56 }
 0x4fd   : > { %8141 = vmatpush3.bf16.msra.mxu1 %v10209_v6  ;;  %2210 = vmatprep.mubr.bf16.mxu1 %v8722_v58  ;;  %v7260_v6 = vcombine.high %v2132_v25, %v2132_v25 }
 0x4fe   : > { %8142 = vmatprep.subr.bf16.mxu1 %v10213_v11  ;;  %v7259_v11 = vcombine.low %v2132_v25, %v2132_v25 }
 0x501   : > { %8143 = vmatpush3.bf16.msra.mxu1 %v10217_v16  ;;  %v8732_v16 = vld [vmem:[#allocation2 + $0x1c4] ss:$8 sps:$4 sm:$0xff]  }
 0x502   : > { %8144 = vmatprep.subr.bf16.mxu1 %v10221_v21  ;;  %v8730_v21 = vld [vmem:[#allocation2 + $0x1c0] ss:$8 sps:$4 sm:$0xff]  }
 0x504   : > { %2211 = vmatmul.mubr.bf16.gmra.mxu1 %v8724_v8 }
 0x505   : > { %8145 = vmatpush3.bf16.msra.mxu1 %v10227_v26  ;;  %2218 = vmatprep.mubr.bf16.mxu1 %v8725_v61  ;;  %v8733_v26 = vld [vmem:[#allocation2 + $0x1d4] ss:$8 sps:$4 sm:$0xff]  }
 0x506   : > { %8146 = vmatprep.subr.bf16.mxu1 %v10231_v32  ;;  %v8735_v32 = vld [vmem:[#allocation2 + $0x1d0] ss:$8 sps:$4 sm:$0xff]  }
 0x509   : > { %8147 = vmatpush3.bf16.msra.mxu1 %v10237_v35  ;;  %v8736_v35 = vld [vmem:[#allocation2 + $0x1e4] ss:$8 sps:$4 sm:$0xff]  }
 0x50a   : > { %8148 = vmatprep.subr.bf16.mxu1 %v10241_v36  ;;  %v2333_v36 = vld [vmem:[#allocation2 + $0x1f0] sm:$0x11] }
 0x50c   : > { %2219 = vmatmul.mubr.bf16.gmra.mxu1 %v8727_v54 }
 0x50d   : > { %8149 = vmatpush3.bf16.msra.mxu1 %v10245_v37  ;;  %2226 = vmatprep.mubr.bf16.mxu1 %v7260_v6  ;;  %v8738_v37 = vld [vmem:[#allocation2 + $0x1e0] ss:$8 sps:$4 sm:$0xff]  }
 0x50e   : > { %8150 = vmatprep.subr.bf16.mxu1 %v10249_v38  ;;  %v7272_v38 = vcombine.high %v2333_v36, %v2333_v36 }
 0x511   : > { %8151 = vmatpush3.bf16.msra.mxu1 %v10253_v39  ;;  %v7271_v39 = vcombine.low %v2333_v36, %v2333_v36 }
 0x512   : > { %8152 = vmatprep.subr.bf16.mxu1 %v10257_v40  ;;  %v2239_v40 = vld [vmem:[#allocation7 + $0x1c] sm:$0xf] }
 0x513   : > { %8457 = vmatprep.subr.msk.bf16.mxu0 %vm973_vm0, %v2239_v40 }
 0x514   : > { %2227 = vmatmul.mubr.bf16.gmra.mxu1 %v7259_v11 }
 0x515   : > { %8153 = vmatpush3.bf16.msra.mxu1 %v10261_v41  ;;  %2403 = vmatprep.mubr.bf16.mxu1 %v8732_v16  ;;  %v2253_v41 = vsel %vm973_vm0, %v2239_v40, 0 }
 0x516   : > { %8154 = vmatprep.subr.bf16.mxu1 %v10265_v42  ;;  %8323 = vmatpush3.bf16.msra.mxu0 %v2253_v41  ;;  %v2440_v42 = vld [vmem:[#allocation7 + $0x20] sm:$0xf] }
 0x517   : > { %8458 = vmatprep.subr.msk.bf16.mxu0 %vm973_vm0, %v2440_v42 }
 0x519   : > { %8155 = vmatpush3.bf16.msra.mxu1 %v10269_v44 }
 0x51c   : > { %2404 = vmatmul.mubr.bf16.vlgmr.msra.gmra.mxu1 %v8730_v21  ;;  %v2454_v21 = vsel %vm973_vm0, %v2440_v42, 0 }
 0x51d   : > { %2411 = vmatprep.mubr.bf16.mxu1 %v8733_v26 }
 0x524   : > { %2412 = vmatmul.mubr.bf16.gmra.mxu1 %v8735_v32 }
 0x525   : > { %2419 = vmatprep.mubr.bf16.mxu1 %v8736_v35 }
 0x52c   : > { %2420 = vmatmul.mubr.bf16.gmra.mxu1 %v8738_v37 }
 0x52d   : > { %2427 = vmatprep.mubr.bf16.mxu1 %v7272_v38 }
 0x534   : > { %2428 = vmatmul.mubr.bf16.gmra.mxu1 %v7271_v39 }
 0x57c   : > { %v8306_v44 = vpop.f32.mrf.mxu1 }
 0x57d   : > { %v1919_v60 = vadd.f32 %v8306_v44, %v10406_v62 }
 0x57e   : > { %v1887_v28 = vpop.f32.mrf.mxu1 }
 0x57f   : > { %v1917_v5 = vadd.f32 %v1887_v28, %v10408_v2  ;;  %v1721_v2 = vadd.f32 %v10418_v10, %v1520_v20 }
 0x580   : > { %v8307_v34 = vpop.f32.mrf.mxu1 }
 0x581   : > { %v1920_v45 = vadd.f32 %v8307_v34, %v10410_v3  ;;  %v1094_v3 = vadd.f32 %v10286_v1, %v10284_v0 }
 0x582   : > { %v1890_v13 = vpop.f32.mrf.mxu1 }
 0x583   : > { %v1315_v12 = vadd.f32 %v10343_v31, %v1094_v3 }
 0x585   : > { %v1516_v46 = vadd.f32 %v10400_v53, %v1315_v12 }
 0x587   : > { %v1717_v59 = vadd.f32 %v10412_v30, %v1516_v46 }
 0x588   : > { %v8310_v15 = vpop.f32.mrf.mxu1 }
 0x589   : > { %v1923_v18 = vadd.f32 %v8310_v15, %v10414_v7  ;;  %v1918_v43 = vadd.f32 %v1890_v13, %v1717_v59 }
 0x58a   : > { %v1903_v19 = vpop.f32.mrf.mxu1 }
 0x58b   : > { %v1921_v62 = vadd.f32 %v1903_v19, %v10416_v9 }
 0x58c   : > { %v8311_v22 = vpop.f32.mrf.mxu1 }
 0x58e   : > { %v1906_v24 = vpop.f32.mrf.mxu1 }
 0x58f   : > { %v1922_v27 = vadd.f32 %v1906_v24, %v1721_v2 }
 0x59c   : > { %v8316_v23 = vpop.f32.mrf.mxu1 }
 0x59d   : > { %v10478_v29 = vadd.f32 %v8316_v23, %v1919_v60 }
 0x59e   : > { %v2088_v7 = vpop.f32.mrf.mxu1 }
 0x59f   : > { %v10481_v33 = vadd.f32 %v2088_v7, %v1917_v5 }
 0x5a0   : > { %v8317_v9 = vpop.f32.mrf.mxu1 }
 0x5a1   : > { %v10483_v10 = vadd.f32 %v8317_v9, %v1920_v45 }
 0x5a2   : > { %v2091_v57 = vpop.f32.mrf.mxu1 }
 0x5a3   : > { %v10485_v47 = vadd.f32 %v2091_v57, %v1918_v43 }
 0x5a8   : > { %v8320_v0 = vpop.f32.mrf.mxu1 }
 0x5a9   : > { %v10487_v1 = vadd.f32 %v8320_v0, %v1923_v18 }
 0x5aa   : > { %v2104_v31 = vpop.f32.mrf.mxu1 }
 0x5ab   : > { %v10489_v48 = vadd.f32 %v2104_v31, %v1921_v62 }
 0x5ac   : > { %v8321_v53 = vpop.f32.mrf.mxu1 }
 0x5ad   : > { %v9896_v53 = vmov 0  }
 0x5ae   : > { %v2107_v49 = vpop.f32.mrf.mxu1  ;;  %2809 = vmatprep.mubr.bf16.mxu1 %v9896_v53 }
 0x5af   : > { %v10491_v50 = vadd.f32 %v2107_v49, %v1922_v27  ;;  %v9897_v49 = vmov 0.0  }
 0x5bc   : > { %v8111_v30 = vpop.f32.mrf.mxu1 }
 0x5be   : > { %v8112_v63 = vpop.f32.mrf.mxu1 }
 0x5bf   : > { %v8113_v4 = vadd.f32 %v8112_v63, %v8111_v30  ;;  %v8755_v30 = vld [vmem:[#allocation10 + $0xf0] ss:$8 sps:$4 sm:$0xff]   ;;  %v8757_v63 = vld [vmem:[#allocation10 + $0xf4] ss:$8 sps:$4 sm:$0xff]  }
 0x5c0   : > { %v8114_v51 = vpop.f32.mrf.mxu1  ;;  %2777 = vmatprep.subr.bf16.mxu1 %v8757_v63  ;;  %v8751_v63 = vld [vmem:[#allocation10 + $0x54] ss:$8 sps:$4 sm:$0xff]  }
 0x5c1   : > { %2778 = vmatpush1.bf16.msra.mxu1 %v8755_v30  ;;  %v8746_v30 = vld [vmem:[#allocation10 + $0x60] ss:$8 sps:$4 sm:$0xff]  }
 0x5c2   : > { %v8115_v52 = vpop.f32.mrf.mxu1 }
 0x5c3   : > { %v8116_v55 = vadd.f32 %v8115_v52, %v8114_v51  ;;  %v8761_v51 = vld [vmem:[#allocation10 + $0xe0] ss:$8 sps:$4 sm:$0xff]   ;;  %v8763_v52 = vld [vmem:[#allocation10 + $0xe4] ss:$8 sps:$4 sm:$0xff]  }
 0x5c4   : > { %v8117_v56 = vpop.f32.mrf.mxu1  ;;  %2779 = vmatprep.subr.bf16.mxu1 %v8763_v52  ;;  %v8754_v52 = vld [vmem:[#allocation10 + $0x44] ss:$8 sps:$4 sm:$0xff]  }
 0x5c5   : > { %v2234_v58 = vpack.c.bf16 %v8116_v55, %v8113_v4  ;;  %2780 = vmatpush1.bf16.msra.mxu1 %v8761_v51  ;;  %v8767_v4 = vld [vmem:[#allocation10 + $0xd0] ss:$8 sps:$4 sm:$0xff]   ;;  %v8769_v55 = vld [vmem:[#allocation10 + $0xd4] ss:$8 sps:$4 sm:$0xff]  }
 0x5c6   : > { %v8118_v8 = vpop.f32.mrf.mxu1  ;;  %2781 = vmatprep.subr.bf16.mxu1 %v8769_v55  ;;  %v8749_v51 = vld [vmem:[#allocation10 + $0x50] ss:$8 sps:$4 sm:$0xff]   ;;  %v8760_v55 = vld [vmem:[#allocation10 + $0x34] ss:$8 sps:$4 sm:$0xff]  }
 0x5c7   : > { %8324 = vmatprep.mubr.msk.bf16.mxu0 %vm960_vm1, %v2234_v58  ;;  %v8119_v54 = vadd.f32 %v8118_v8, %v8117_v56 }
 0x5c8   : > { %v8120_v61 = vpop.f32.mrf.mxu1 }
 0x5c9   : > { %2782 = vmatpush1.bf16.msra.mxu1 %v8767_v4  ;;  %v8752_v4 = vld [vmem:[#allocation10 + $0x40] ss:$8 sps:$4 sm:$0xff]  }
 0x5ca   : > { %v8121_v25 = vpop.f32.mrf.mxu1 }
 0x5cb   : > { %v8122_v6 = vadd.f32 %v8121_v25, %v8120_v61 }
 0x5cc   : > { %v8123_v11 = vpop.f32.mrf.mxu1 }
 0x5cd   : > { %v2235_v16 = vpack.c.bf16 %v8122_v6, %v8119_v54 }
 0x5ce   : > { %v8124_v26 = vpop.f32.mrf.mxu1 }
 0x5cf   : > { %8325 = vmatmul.mubr.msk.bf16.vlgmr.msra.gmra.mxu0 %vm960_vm1, %v2235_v16  ;;  %v8125_v36 = vadd.f32 %v8124_v26, %v8123_v11 }
 0x5d0   : > { %v8126_v32 = vpop.f32.mrf.mxu1  ;;  %8333 = vmatpush3.bf16.msra.mxu0 %v2454_v21 }
 0x5d1   : > { %8342 = vmatprep.subr.bf16.mxu0 %v9897_v49 }
 0x5d2   : > { %v8127_v35 = vpop.f32.mrf.mxu1 }
 0x5d3   : > { %v8128_v37 = vadd.f32 %v8127_v35, %v8126_v32  ;;  %v7277_v35 = vld [vmem:[#allocation8] ss:$0 sm:$0xff] }
 0x5d4   : > { %v8129_v38 = vpop.f32.mrf.mxu1 }
 0x5d5   : > { %v2236_v39 = vpack.c.bf16 %v8128_v37, %v8125_v36 }
 0x5d6   : > { %v8130_v40 = vpop.f32.mrf.mxu1 }
 0x5d7   : > { %v8131_v41 = vadd.f32 %v8130_v40, %v8129_v38  ;;  %8328 = vmatprep.mubr.msk.bf16.mxu0 %vm960_vm1, %v2236_v39 }
 0x5d8   : > { %v8132_v44 = vpop.f32.mrf.mxu1 }
 0x5d9   : > { %v2237_v60 = vpack.c.bf16 %v8131_v41, %v8131_v41 }
 0x5da   : > { %v8133_v28 = vpop.f32.mrf.mxu1 }
 0x5db   : > { %8329 = vmatmul.mubr.msk.bf16.gmra.mxu0 %vm960_vm1, %v2237_v60 }
 0x5dc   : > { %v8156_v42 = vpop.f32.mrf.mxu1 }
 0x5de   : > { %v8157_v5 = vpop.f32.mrf.mxu1 }
 0x5df   : > { %v8158_v13 = vadd.f32 %v8157_v5, %v8156_v42 }
 0x5e0   : > { %v8159_v34 = vpop.f32.mrf.mxu1 }
 0x5e2   : > { %v8160_v45 = vpop.f32.mrf.mxu1 }
 0x5e3   : > { %v8161_v14 = vadd.f32 %v8160_v45, %v8159_v34 }
 0x5e4   : > { %v8162_v15 = vpop.f32.mrf.mxu1 }
 0x5e5   : > { %v2435_v17 = vpack.c.bf16 %v8161_v14, %v8158_v13 }
 0x5e6   : > { %v8163_v18 = vpop.f32.mrf.mxu1 }
 0x5e7   : > { %8334 = vmatprep.mubr.msk.bf16.mxu0 %vm960_vm1, %v2435_v17  ;;  %v8164_v62 = vadd.f32 %v8163_v18, %v8162_v15 }
 0x5e8   : > { %v8165_v19 = vpop.f32.mrf.mxu1 }
 0x5ea   : > { %v8166_v20 = vpop.f32.mrf.mxu1 }
 0x5eb   : > { %v8167_v22 = vadd.f32 %v8166_v20, %v8165_v19 }
 0x5ec   : > { %v8168_v2 = vpop.f32.mrf.mxu1 }
 0x5ed   : > { %v2436_v24 = vpack.c.bf16 %v8167_v22, %v8164_v62 }
 0x5ee   : > { %v8169_v27 = vpop.f32.mrf.mxu1 }
 0x5ef   : > { %8335 = vmatmul.mubr.msk.bf16.vlgmr.msra.gmra.mxu0 %vm960_vm1, %v2436_v24  ;;  %v8170_v23 = vadd.f32 %v8169_v27, %v8168_v2 }
 0x5f0   : > { %v8171_v3 = vpop.f32.mrf.mxu1 }
 0x5f2   : > { %v8172_v12 = vpop.f32.mrf.mxu1 }
 0x5f3   : > { %v8173_v46 = vadd.f32 %v8172_v12, %v8171_v3 }
 0x5f4   : > { %v8174_v7 = vpop.f32.mrf.mxu1 }
 0x5f5   : > { %v2437_v59 = vpack.c.bf16 %v8173_v46, %v8170_v23 }
 0x5f6   : > { %v8175_v9 = vpop.f32.mrf.mxu1 }
 0x5f7   : > { %v8176_v43 = vadd.f32 %v8175_v9, %v8174_v7  ;;  %8338 = vmatprep.mubr.msk.bf16.mxu0 %vm960_vm1, %v2437_v59 }
 0x5f8   : > { %v8177_v57 = vpop.f32.mrf.mxu1 }
 0x5f9   : > { %v2438_v0 = vpack.c.bf16 %v8176_v43, %v8176_v43  ;;  %v8745_v43 = vld [vmem:[#allocation10 + $0x74] ss:$8 sps:$4 sm:$0xff]  }
 0x5fa   : > { %v8178_v31 = vpop.f32.mrf.mxu1  ;;  %v8742_v57 = vld [vmem:[#allocation5 + $0x8] sm:$0x1f]  }
 0x5fb   : > { %8339 = vmatmul.mubr.msk.bf16.gmra.mxu0 %vm960_vm1, %v2438_v0  ;;  %v8743_v0 = vld [vmem:[#allocation10 + $0x70] ss:$8 sps:$4 sm:$0xff]   ;;  %v8748_v31 = vld [vmem:[#allocation10 + $0x64] ss:$8 sps:$4 sm:$0xff]  }
 0x5fc   : > { %8350 = vmatprep.mubr.msk.bf16.mxu0 %vm9898_vm2, %v9897_v49 }
 0x68f   : > { %v8326_v56 = vpop.f32.mrf.mxu0 }
 0x690   : > { %v2321_v16 = vadd.f32 %v8326_v56, %v10478_v29  ;;  %v8758_v56 = vld [vmem:[#allocation10 + $0x30] ss:$8 sps:$4 sm:$0xff]  }
 0x691   : > { %v2289_v58 = vpop.f32.mrf.mxu0 }
 0x692   : > { %v2319_v26 = vadd.f32 %v2289_v58, %v10481_v33  ;;  %v8766_v58 = vld [vmem:[#allocation10 + $0x24] ss:$8 sps:$4 sm:$0xff]  }
 0x693   : > { %v8327_v8 = vpop.f32.mrf.mxu0 }
 0x694   : > { %v2322_v37 = vadd.f32 %v8327_v8, %v10483_v10  ;;  %v8764_v8 = vld [vmem:[#allocation10 + $0x20] ss:$8 sps:$4 sm:$0xff]  }
 0x695   : > { %v2292_v61 = vpop.f32.mrf.mxu0 }
 0x696   : > { %v2320_v40 = vadd.f32 %v2292_v61, %v10485_v47  ;;  %v8772_v61 = vld [vmem:[#allocation10 + $0x14] ss:$8 sps:$4 sm:$0xff]  }
 0x69b   : > { %v8330_v25 = vpop.f32.mrf.mxu0 }
 0x69c   : > { %v2325_v33 = vadd.f32 %v8330_v25, %v10487_v1  ;;  %v2565_v1 = vsel %vm2563_vm3, 65535, %v9896_v53  ;;  %v8770_v25 = vld [vmem:[#allocation10 + $0x10] ss:$8 sps:$4 sm:$0xff]  }
 0x69d   : > { %v2305_v54 = vpop.f32.mrf.mxu0 }
 0x69e   : > { %v2323_v17 = vadd.f32 %v2305_v54, %v10489_v48  ;;  %v8775_v54 = vld [vmem:[#allocation10 + $0xc4] ss:$8 sps:$4 sm:$0xff]  }
 0x69f   : > { %v8331_v6 = vpop.f32.mrf.mxu0  ;;  %2783 = vmatprep.subr.bf16.mxu1 %v8775_v54 }
 0x6a0   : > { %v8778_v6 = vld [vmem:[#allocation10 + $0x4] ss:$8 sps:$4 sm:$0xff]  }
 0x6a1   : > { %v2308_v11 = vpop.f32.mrf.mxu0 }
 0x6a2   : > { %v2324_v2 = vadd.f32 %v2308_v11, %v10491_v50  ;;  %v8741_v50 = vld [vmem:[#allocation5] sm:$0x1f]   ;;  %v8773_v11 = vld [vmem:[#allocation10 + $0xc0] ss:$8 sps:$4 sm:$0xff]  }
 0x6a3   : > { %2784 = vmatpush1.bf16.msra.mxu1 %v8773_v11 }
 0x6af   : > { %v8336_v21 = vpop.f32.mrf.mxu0 }
 0x6b0   : > { %v2522_v32 = vadd.f32 %v8336_v21, %v2321_v16  ;;  %v8776_v16 = vld [vmem:[#allocation10] ss:$8 sps:$4 sm:$0xff]   ;;  %v8781_v21 = vld [vmem:[#allocation10 + $0xb4] ss:$8 sps:$4 sm:$0xff]  }
 0x6b1   : > { %v2490_v36 = vpop.f32.mrf.mxu0  ;;  %2785 = vmatprep.subr.bf16.mxu1 %v8781_v21 }
 0x6b2   : > { %v2520_v38 = vadd.f32 %v2490_v36, %v2319_v26  ;;  %v2536_v41 = vadd.f32 %v7277_v35, %v2522_v32  ;;  %v8779_v26 = vld [vmem:[#allocation10 + $0xb0] ss:$8 sps:$4 sm:$0xff]   ;;  %v8782_v32 = vld [vmem:[#allocation10 + $0xa0] ss:$8 sps:$4 sm:$0xff]  }
 0x6b3   : > { %v8337_v39 = vpop.f32.mrf.mxu0  ;;  %2786 = vmatpush1.bf16.msra.mxu1 %v8779_v26  ;;  %v8785_v36 = vld [vmem:[#allocation10 + $0x90] ss:$8 sps:$4 sm:$0xff]  }
 0x6b4   : > { %v2523_v44 = vadd.f32 %v8337_v39, %v2322_v37  ;;  %v2534_v28 = vadd.f32 %v7277_v35, %v2520_v38  ;;  %v2543_v34 = vmax.f32 %v2536_v41, 0.0  ;;  %v8787_v37 = vld [vmem:[#allocation10 + $0x94] ss:$8 sps:$4 sm:$0xff]   ;;  %v8790_v38 = vld [vmem:[#allocation10 + $0x84] ss:$8 sps:$4 sm:$0xff]  }
 0x6b5   : > { %v2493_v60 = vpop.f32.mrf.mxu0  ;;  %v8788_v39 = vld [vmem:[#allocation10 + $0x80] ss:$8 sps:$4 sm:$0xff]  }
 0x6b6   : > { %v2537_v42 = vadd.f32 %v7277_v35, %v2523_v44  ;;  %v2521_v5 = vadd.f32 %v2493_v60, %v2320_v40  ;;  %v2541_v13 = vmax.f32 %v2534_v28, 0.0 }
 0x6b8   : > { %v2544_v29 = vmax.f32 %v2537_v42, 0.0  ;;  %v2535_v45 = vadd.f32 %v7277_v35, %v2521_v5  ;;  %v8795_v5 = vld [vmem:[#allocation10 + $0x1f4] ss:$8 sps:$4 sm:$0xff]  }
 0x6ba   : > { %v10511_v14 = vpack.c.bf16 %v2544_v29, %v2543_v34  ;;  %v2542_v15 = vmax.f32 %v2535_v45, 0.0  ;;  %v8791_v29 = vld [vmem:[#allocation5 + $0x18] sm:$0x1f]  }
 0x6bb   : > { %v8340_v10 = vpop.f32.mrf.mxu0 }
 0x6bc   : > { %v10514_v18 = vpack.c.bf16 %v2542_v15, %v2541_v13  ;;  %v2526_v47 = vadd.f32 %v8340_v10, %v2325_v33  ;;  %v8793_v13 = vld [vmem:[#allocation10 + $0x1f0] ss:$8 sps:$4 sm:$0xff]   ;;  %v8798_v10 = vld [vmem:[#allocation10 + $0x1e4] ss:$8 sps:$4 sm:$0xff]  }
 0x6bd   : > { %v2506_v19 = vpop.f32.mrf.mxu0 }
 0x6be   : > { %v2540_v20 = vadd.f32 %v7277_v35, %v2526_v47  ;;  %v2524_v62 = vadd.f32 %v2506_v19, %v2323_v17  ;;  %v8796_v17 = vld [vmem:[#allocation10 + $0x1e0] ss:$8 sps:$4 sm:$0xff]   ;;  %v8801_v47 = vld [vmem:[#allocation10 + $0x1d4] ss:$8 sps:$4 sm:$0xff]   ;;  %v8799_v19 = vld [vmem:[#allocation10 + $0x1d0] ss:$8 sps:$4 sm:$0xff]  }
 0x6bf   : > { %v8341_v22 = vpop.f32.mrf.mxu0 }
 0x6c0   : > { %v2547_v24 = vmax.f32 %v2540_v20, 0.0  ;;  %v2538_v12 = vadd.f32 %v7277_v35, %v2524_v62  ;;  %v8792_v20 = vld [vmem:[#allocation5 + $0x10] sm:$0x1f]  }
 0x6c1   : > { %v2509_v27 = vpop.f32.mrf.mxu0  ;;  %v8802_v62 = vld [vmem:[#allocation10 + $0x1c0] ss:$8 sps:$4 sm:$0xff]   ;;  %v8804_v22 = vld [vmem:[#allocation10 + $0x1c4] ss:$8 sps:$4 sm:$0xff]  }
 0x6c2   : > { %v2551_v3 = vpack.c.bf16 %v2547_v24, %v2547_v24  ;;  %v2525_v23 = vadd.f32 %v2509_v27, %v2324_v2  ;;  %v2545_v7 = vmax.f32 %v2538_v12, 0.0  ;;  %v8805_v2 = vld [vmem:[#allocation10 + $0x170] ss:$8 sps:$4 sm:$0xff]   ;;  %v8807_v24 = vld [vmem:[#allocation10 + $0x174] ss:$8 sps:$4 sm:$0xff]  }
 0x6c3   : > { %v8810_v27 = vld [vmem:[#allocation10 + $0x1b4] ss:$8 sps:$4 sm:$0xff]   ;;  %v8811_v12 = vld [vmem:[#allocation10 + $0x160] ss:$8 sps:$4 sm:$0xff]  }
 0x6c4   : > { %v10518_v46 = vand.u32 %v2565_v1, %v2551_v3  ;;  %v2539_v48 = vadd.f32 %v7277_v35, %v2525_v23  ;;  %v8784_v35 = vld [vmem:[#allocation10 + $0xa4] ss:$8 sps:$4 sm:$0xff]   ;;  %v8808_v1 = vld [vmem:[#allocation10 + $0x1b0] ss:$8 sps:$4 sm:$0xff]  }
 0x6c5   : > { %2787 = vmatprep.subr.bf16.mxu1 %v8784_v35  ;;  %v8813_v3 = vld [vmem:[#allocation10 + $0x164] ss:$8 sps:$4 sm:$0xff]  }
 0x6c6   : > { %v2546_v59 = vmax.f32 %v2539_v48, 0.0  ;;  %8343 = vmatpush3.bf16.msra.mxu0 %v10518_v46  ;;  %2788 = vmatpush1.bf16.msra.mxu1 %v8782_v32  ;;  %v8816_v23 = vld [vmem:[#allocation10 + $0x1a4] ss:$8 sps:$4 sm:$0xff]   ;;  %v8814_v48 = vld [vmem:[#allocation10 + $0x1a0] ss:$8 sps:$4 sm:$0xff]  }
 0x6c7   : > { %8344 = vmatprep.subr.bf16.mxu0 %v9897_v49  ;;  %2789 = vmatprep.subr.bf16.mxu1 %v8787_v37 }
 0x6c8   : > { %v10522_v9 = vpack.c.bf16 %v2546_v59, %v2545_v7  ;;  %v8819_v7 = vld [vmem:[#allocation10 + $0x154] ss:$8 sps:$4 sm:$0xff]  }
 0x6c9   : > { %v8822_v59 = vld [vmem:[#allocation10 + $0x194] ss:$8 sps:$4 sm:$0xff]  }
 0x6ca   : > { %8345 = vmatpush3.bf16.msra.mxu0 %v10522_v9  ;;  %2790 = vmatpush1.bf16.msra.mxu1 %v8785_v36 }
 0x6cb   : > { %8346 = vmatprep.subr.bf16.mxu0 %v9897_v49  ;;  %2791 = vmatprep.subr.bf16.mxu1 %v8790_v38 }
 0x6ce   : > { %8347 = vmatpush3.bf16.msra.mxu0 %v10511_v14  ;;  %2792 = vmatpush1.bf16.msra.mxu1 %v8788_v39 }
 0x6cf   : > { %8348 = vmatprep.subr.bf16.mxu0 %v9897_v49  ;;  %8366 = vmatprep.subr.bf16.mxu1 %v9897_v49 }
 0x6d2   : > { %8349 = vmatpush3.bf16.msra.mxu0 %v10514_v18 }
 0x6d3   : > { %8354 = vmatprep.subr.bf16.mxu0 %v9897_v49 }
 0x6d5   : > { %8351 = vmatmul.mubr.msk.bf16.vlgmr.msra.gmra.mxu0 %vm2559_vm4, %v8741_v50  ;;  %v8817_v50 = vld [vmem:[#allocation10 + $0x150] ss:$8 sps:$4 sm:$0xff]  }
 0x6d6   : > { %8355 = vmatpush3.bf16.msra.mxu0 %v10518_v46  ;;  %8362 = vmatprep.mubr.msk.bf16.mxu0 %vm9898_vm2, %v9897_v49 }
 0x6d7   : > { %8356 = vmatprep.subr.bf16.mxu0 %v9897_v49 }
 0x6da   : > { %8357 = vmatpush3.bf16.msra.mxu0 %v10522_v9 }
 0x6db   : > { %8358 = vmatprep.subr.bf16.mxu0 %v9897_v49 }
 0x6de   : > { %8359 = vmatpush3.bf16.msra.mxu0 %v10511_v14 }
 0x6df   : > { %8360 = vmatprep.subr.bf16.mxu0 %v9897_v49 }
 0x6e2   : > { %8361 = vmatpush3.bf16.msra.mxu0 %v10514_v18 }
 0x6e3   : > { %2900 = vmatprep.subr.bf16.mxu0 %v8745_v43  ;;  %v8820_v43 = vld [vmem:[#allocation10 + $0x190] ss:$8 sps:$4 sm:$0xff]  }
 0x6e5   : > { %8363 = vmatmul.mubr.msk.bf16.vlgmr.msra.gmra.mxu0 %vm2559_vm4, %v8742_v57  ;;  %v8825_v57 = vld [vmem:[#allocation10 + $0x144] ss:$8 sps:$4 sm:$0xff]  }
 0x6e6   : > { %2901 = vmatpush1.bf16.msra.mxu0 %v8743_v0  ;;  %2932 = vmatprep.mubr.bf16.mxu0 %v9896_v53  ;;  %v8828_v0 = vld [vmem:[#allocation10 + $0x184] ss:$8 sps:$4 sm:$0xff]  }
 0x6e7   : > { %2902 = vmatprep.subr.bf16.mxu0 %v8748_v31  ;;  %v8823_v31 = vld [vmem:[#allocation10 + $0x140] ss:$8 sps:$4 sm:$0xff]  }
 0x6ea   : > { %2903 = vmatpush1.bf16.msra.mxu0 %v8746_v30  ;;  %v8826_v30 = vld [vmem:[#allocation10 + $0x180] ss:$8 sps:$4 sm:$0xff]  }
 0x6eb   : > { %2904 = vmatprep.subr.bf16.mxu0 %v8751_v63  ;;  %v8831_v63 = vld [vmem:[#allocation10 + $0x134] ss:$8 sps:$4 sm:$0xff]  }
 0x6ee   : > { %2905 = vmatpush1.bf16.msra.mxu0 %v8749_v51  ;;  %v8829_v51 = vld [vmem:[#allocation10 + $0x130] ss:$8 sps:$4 sm:$0xff]  }
 0x6ef   : > { %2906 = vmatprep.subr.bf16.mxu0 %v8754_v52  ;;  %v8832_v52 = vld [vmem:[#allocation10 + $0x120] ss:$8 sps:$4 sm:$0xff]  }
 0x6f2   : > { %2907 = vmatpush1.bf16.msra.mxu0 %v8752_v4  ;;  %v8834_v4 = vld [vmem:[#allocation10 + $0x124] ss:$8 sps:$4 sm:$0xff]  }
 0x6f3   : > { %2908 = vmatprep.subr.bf16.mxu0 %v8760_v55  ;;  %v8835_v55 = vld [vmem:[#allocation10 + $0x110] ss:$8 sps:$4 sm:$0xff]  }
 0x6f6   : > { %2909 = vmatpush1.bf16.msra.mxu0 %v8758_v56  ;;  %v8837_v56 = vld [vmem:[#allocation10 + $0x114] ss:$8 sps:$4 sm:$0xff]  }
 0x6f7   : > { %2910 = vmatprep.subr.bf16.mxu0 %v8766_v58  ;;  %v8840_v58 = vld [vmem:[#allocation10 + $0x104] ss:$8 sps:$4 sm:$0xff]  }
 0x6fa   : > { %2911 = vmatpush1.bf16.msra.mxu0 %v8764_v8  ;;  %v8838_v8 = vld [vmem:[#allocation10 + $0x100] ss:$8 sps:$4 sm:$0xff]  }
 0x6fb   : > { %2912 = vmatprep.subr.bf16.mxu0 %v8772_v61 }
 0x6fe   : > { %2913 = vmatpush1.bf16.msra.mxu0 %v8770_v25 }
 0x6ff   : > { %2914 = vmatprep.subr.bf16.mxu0 %v8778_v6 }
 0x702   : > { %2915 = vmatpush1.bf16.msra.mxu0 %v8776_v16 }
 0x703   : > { %8378 = vmatprep.subr.bf16.mxu0 %v9897_v49 }
 0x795   : > { %v2603_v40 = vpop.f32.mrf.mxu0 }
 0x797   : > { %v8352_v41 = vpop.f32.mrf.mxu0 }
 0x799   : > { %v2606_v44 = vpop.f32.mrf.mxu0 }
 0x79a   : > { %v2610_v60 = vpack.c.bf16 %v2606_v44, %v2603_v40 }
 0x79b   : > { %v8353_v28 = vpop.f32.mrf.mxu0 }
 0x79c   : > { %2933 = vmatmul.mubr.bf16.vlgmr.msra.gmra.mxu0 %v2610_v60  ;;  %v8845_v28 = vld [vmem:[#allocation10 + $0x2f4] ss:$8 sps:$4 sm:$0xff]  }
 0x79d   : > { %8379 = vmatpush3.bf16.msra.mxu0 %v10518_v46  ;;  %8386 = vmatprep.mubr.msk.bf16.mxu0 %vm9898_vm2, %v9897_v49 }
 0x79e   : > { %8380 = vmatprep.subr.bf16.mxu0 %v9897_v49 }
 0x7a1   : > { %8381 = vmatpush3.bf16.msra.mxu0 %v10522_v9 }
 0x7a2   : > { %8382 = vmatprep.subr.bf16.mxu0 %v9897_v49 }
 0x7a5   : > { %8383 = vmatpush3.bf16.msra.mxu0 %v10511_v14  ;;  %v2672_v42 = vpop.f32.mrf.mxu0 }
 0x7a6   : > { %8384 = vmatprep.subr.bf16.mxu0 %v9897_v49 }
 0x7a7   : > { %v8364_v34 = vpop.f32.mrf.mxu0 }
 0x7a9   : > { %8385 = vmatpush3.bf16.msra.mxu0 %v10514_v18  ;;  %v2675_v45 = vpop.f32.mrf.mxu0 }
 0x7aa   : > { %v2679_v33 = vpack.c.bf16 %v2675_v45, %v2672_v42  ;;  %3290 = vmatprep.subr.bf16.mxu0 %v8795_v5  ;;  %v8841_v5 = vld [vmem:[#allocation5 + $0x28] sm:$0x1f]  }
 0x7ab   : > { %v8365_v15 = vpop.f32.mrf.mxu0  ;;  %v8843_v45 = vld [vmem:[#allocation10 + $0x2f0] ss:$8 sps:$4 sm:$0xff]  }
 0x7ac   : > { %8387 = vmatmul.mubr.msk.bf16.vlgmr.msra.gmra.mxu0 %vm2559_vm4, %v8791_v29  ;;  %2810 = vmatmul.mubr.bf16.vlgmr.msra.gmra.mxu1 %v2679_v33  ;;  %v8846_v15 = vld [vmem:[#allocation10 + $0x2e0] ss:$8 sps:$4 sm:$0xff]  }
 0x7ad   : > { %8367 = vmatpush3.bf16.msra.mxu1 %v10518_v46  ;;  %8374 = vmatprep.mubr.msk.bf16.mxu1 %vm9898_vm2, %v9897_v49 }
 0x7ae   : > { %8368 = vmatprep.subr.bf16.mxu1 %v9897_v49  ;;  %3291 = vmatpush1.bf16.msra.mxu0 %v8793_v13  ;;  %v8848_v13 = vld [vmem:[#allocation10 + $0x2e4] ss:$8 sps:$4 sm:$0xff]  }
 0x7af   : > { %3292 = vmatprep.subr.bf16.mxu0 %v8798_v10  ;;  %3322 = vmatprep.mubr.bf16.mxu0 %v9896_v53  ;;  %v8851_v10 = vld [vmem:[#allocation10 + $0x2d4] ss:$8 sps:$4 sm:$0xff]  }
 0x7b1   : > { %8369 = vmatpush3.bf16.msra.mxu1 %v10522_v9 }
 0x7b2   : > { %8370 = vmatprep.subr.bf16.mxu1 %v9897_v49  ;;  %3293 = vmatpush1.bf16.msra.mxu0 %v8796_v17  ;;  %v8849_v17 = vld [vmem:[#allocation10 + $0x2d0] ss:$8 sps:$4 sm:$0xff]  }
 0x7b3   : > { %3294 = vmatprep.subr.bf16.mxu0 %v8801_v47  ;;  %v8854_v47 = vld [vmem:[#allocation10 + $0x2c4] ss:$8 sps:$4 sm:$0xff]  }
 0x7b5   : > { %8371 = vmatpush3.bf16.msra.mxu1 %v10511_v14 }
 0x7b6   : > { %8372 = vmatprep.subr.bf16.mxu1 %v9897_v49  ;;  %3295 = vmatpush1.bf16.msra.mxu0 %v8799_v19  ;;  %v8852_v19 = vld [vmem:[#allocation10 + $0x2c0] ss:$8 sps:$4 sm:$0xff]  }
 0x7b7   : > { %3296 = vmatprep.subr.bf16.mxu0 %v8804_v22  ;;  %v8842_v22 = vld [vmem:[#allocation5 + $0x20] sm:$0x1f]  }
 0x7b9   : > { %8373 = vmatpush3.bf16.msra.mxu1 %v10514_v18 }
 0x7ba   : > { %3297 = vmatpush1.bf16.msra.mxu0 %v8802_v62  ;;  %3093 = vmatprep.subr.bf16.mxu1 %v8807_v24  ;;  %v8860_v62 = vld [vmem:[#allocation10 + $0x2b4] ss:$8 sps:$4 sm:$0xff]   ;;  %v8858_v24 = vld [vmem:[#allocation10 + $0x2b0] ss:$8 sps:$4 sm:$0xff]  }
 0x7bb   : > { %3298 = vmatprep.subr.bf16.mxu0 %v8810_v27  ;;  %v8863_v27 = vld [vmem:[#allocation10 + $0x264] ss:$8 sps:$4 sm:$0xff]  }
 0x7bc   : > { %8375 = vmatmul.mubr.msk.bf16.vlgmr.msra.gmra.mxu1 %vm2559_vm4, %v8792_v20  ;;  %v8857_v20 = vld [vmem:[#allocation10 + $0x274] ss:$8 sps:$4 sm:$0xff]  }
 0x7bd   : > { %3125 = vmatprep.mubr.bf16.mxu1 %v9896_v53  ;;  %3094 = vmatpush1.bf16.msra.mxu1 %v8805_v2  ;;  %v8855_v2 = vld [vmem:[#allocation10 + $0x270] ss:$8 sps:$4 sm:$0xff]  }
 0x7be   : > { %3299 = vmatpush1.bf16.msra.mxu0 %v8808_v1  ;;  %3095 = vmatprep.subr.bf16.mxu1 %v8813_v3  ;;  %v8861_v1 = vld [vmem:[#allocation10 + $0x260] ss:$8 sps:$4 sm:$0xff]  }
 0x7bf   : > { %3300 = vmatprep.subr.bf16.mxu0 %v8816_v23  ;;  %v8864_v3 = vld [vmem:[#allocation10 + $0x2a0] ss:$8 sps:$4 sm:$0xff]   ;;  %v8867_v23 = vld [vmem:[#allocation10 + $0x250] ss:$8 sps:$4 sm:$0xff]  }
 0x7c1   : > { %3096 = vmatpush1.bf16.msra.mxu1 %v8811_v12  ;;  %v8866_v12 = vld [vmem:[#allocation10 + $0x2a4] ss:$8 sps:$4 sm:$0xff]  }
 0x7c2   : > { %3301 = vmatpush1.bf16.msra.mxu0 %v8814_v48  ;;  %3097 = vmatprep.subr.bf16.mxu1 %v8819_v7  ;;  %v8869_v48 = vld [vmem:[#allocation10 + $0x254] ss:$8 sps:$4 sm:$0xff]   ;;  %v8870_v7 = vld [vmem:[#allocation10 + $0x290] ss:$8 sps:$4 sm:$0xff]  }
 0x7c3   : > { %3302 = vmatprep.subr.bf16.mxu0 %v8822_v59  ;;  %v8872_v59 = vld [vmem:[#allocation10 + $0x294] ss:$8 sps:$4 sm:$0xff]  }
 0x7c5   : > { %3098 = vmatpush1.bf16.msra.mxu1 %v8817_v50  ;;  %v8875_v50 = vld [vmem:[#allocation10 + $0x244] ss:$8 sps:$4 sm:$0xff]  }
 0x7c6   : > { %3303 = vmatpush1.bf16.msra.mxu0 %v8820_v43  ;;  %3099 = vmatprep.subr.bf16.mxu1 %v8825_v57  ;;  %v8878_v43 = vld [vmem:[#allocation10 + $0x284] ss:$8 sps:$4 sm:$0xff]   ;;  %v8873_v57 = vld [vmem:[#allocation10 + $0x240] ss:$8 sps:$4 sm:$0xff]  }
 0x7c7   : > { %3304 = vmatprep.subr.bf16.mxu0 %v8828_v0  ;;  %v8876_v0 = vld [vmem:[#allocation10 + $0x280] ss:$8 sps:$4 sm:$0xff]  }
 0x7c9   : > { %3100 = vmatpush1.bf16.msra.mxu1 %v8823_v31  ;;  %v8881_v31 = vld [vmem:[#allocation10 + $0x234] ss:$8 sps:$4 sm:$0xff]  }
 0x7ca   : > { %3305 = vmatpush1.bf16.msra.mxu0 %v8826_v30  ;;  %3101 = vmatprep.subr.bf16.mxu1 %v8831_v63  ;;  %v8879_v30 = vld [vmem:[#allocation10 + $0x230] ss:$8 sps:$4 sm:$0xff]   ;;  %v8882_v63 = vld [vmem:[#allocation10 + $0x220] ss:$8 sps:$4 sm:$0xff]  }
 0x7cb   : > { %8402 = vmatprep.subr.bf16.mxu0 %v9897_v49 }
 0x7cd   : > { %3102 = vmatpush1.bf16.msra.mxu1 %v8829_v51  ;;  %v8884_v51 = vld [vmem:[#allocation10 + $0x224] ss:$8 sps:$4 sm:$0xff]  }
 0x7ce   : > { %3103 = vmatprep.subr.bf16.mxu1 %v8834_v4  ;;  %v8887_v4 = vld [vmem:[#allocation10 + $0x214] ss:$8 sps:$4 sm:$0xff]  }
 0x7d1   : > { %3104 = vmatpush1.bf16.msra.mxu1 %v8832_v52  ;;  %v8885_v52 = vld [vmem:[#allocation10 + $0x210] ss:$8 sps:$4 sm:$0xff]  }
 0x7d2   : > { %3105 = vmatprep.subr.bf16.mxu1 %v8837_v56  ;;  %v8888_v56 = vld [vmem:[#allocation10 + $0x200] ss:$8 sps:$4 sm:$0xff]  }
 0x7d5   : > { %3106 = vmatpush1.bf16.msra.mxu1 %v8835_v55  ;;  %v8890_v55 = vld [vmem:[#allocation10 + $0x204] ss:$8 sps:$4 sm:$0xff]  }
 0x7d6   : > { %3107 = vmatprep.subr.bf16.mxu1 %v8840_v58 }
 0x7d9   : > { %3108 = vmatpush1.bf16.msra.mxu1 %v8838_v8 }
 0x7da   : > { %8390 = vmatprep.subr.bf16.mxu1 %v9897_v49 }
 0x85c   : > { %v2934_v61 = vpop.f32.mrf.mxu0 }
 0x85e   : > { %v2936_v25 = vpop.f32.mrf.mxu0 }
 0x860   : > { %v2938_v54 = vpop.f32.mrf.mxu0 }
 0x862   : > { %v2940_v6 = vpop.f32.mrf.mxu0 }
 0x86c   : > { %v3185_v11 = vpop.f32.mrf.mxu0  ;;  %v2811_v16 = vpop.f32.mrf.mxu1 }
 0x86d   : > { %v10568_v21 = vadd.f32 %v2934_v61, %v2811_v16 }
 0x86e   : > { %v8388_v26 = vpop.f32.mrf.mxu0  ;;  %v2813_v32 = vpop.f32.mrf.mxu1 }
 0x86f   : > { %v10570_v35 = vadd.f32 %v2936_v25, %v2813_v32 }
 0x870   : > { %v3188_v36 = vpop.f32.mrf.mxu0  ;;  %v2815_v37 = vpop.f32.mrf.mxu1 }
 0x871   : > { %v3192_v38 = vpack.c.bf16 %v3188_v36, %v3185_v11  ;;  %v10572_v39 = vadd.f32 %v2938_v54, %v2815_v37 }
 0x872   : > { %v2817_v40 = vpop.f32.mrf.mxu1  ;;  %v8389_v41 = vpop.f32.mrf.mxu0 }
 0x873   : > { %v10574_v44 = vadd.f32 %v2940_v6, %v2817_v40  ;;  %3323 = vmatmul.mubr.bf16.vlgmr.msra.gmra.mxu0 %v3192_v38 }
 0x874   : > { %8403 = vmatpush3.bf16.msra.mxu0 %v10518_v46  ;;  %8410 = vmatprep.mubr.msk.bf16.mxu0 %vm9898_vm2, %v9897_v49 }
 0x875   : > { %8404 = vmatprep.subr.bf16.mxu0 %v9897_v49 }
 0x878   : > { %8405 = vmatpush3.bf16.msra.mxu0 %v10522_v9 }
 0x879   : > { %8406 = vmatprep.subr.bf16.mxu0 %v9897_v49 }
 0x87c   : > { %8407 = vmatpush3.bf16.msra.mxu0 %v10511_v14  ;;  %v2988_v60 = vpop.f32.mrf.mxu1 }
 0x87d   : > { %8408 = vmatprep.subr.bf16.mxu0 %v9897_v49 }
 0x87e   : > { %v8376_v42 = vpop.f32.mrf.mxu1 }
 0x880   : > { %8409 = vmatpush3.bf16.msra.mxu0 %v10514_v18  ;;  %v2991_v34 = vpop.f32.mrf.mxu1 }
 0x881   : > { %v2995_v29 = vpack.c.bf16 %v2991_v34, %v2988_v60  ;;  %3684 = vmatprep.subr.bf16.mxu0 %v8845_v28 }
 0x882   : > { %v8377_v33 = vpop.f32.mrf.mxu1 }
 0x883   : > { %8411 = vmatmul.mubr.msk.bf16.vlgmr.msra.gmra.mxu0 %vm2559_vm4, %v8841_v5  ;;  %3126 = vmatmul.mubr.bf16.vlgmr.msra.gmra.mxu1 %v2995_v29  ;;  %v8892_v29 = vld [vmem:[#allocation5 + $0x38] sm:$0x1f]  }
 0x884   : > { %8391 = vmatpush3.bf16.msra.mxu1 %v10518_v46  ;;  %8398 = vmatprep.mubr.msk.bf16.mxu1 %vm9898_vm2, %v9897_v49 }
 0x885   : > { %8392 = vmatprep.subr.bf16.mxu1 %v9897_v49  ;;  %3685 = vmatpush1.bf16.msra.mxu0 %v8843_v45 }
 0x886   : > { %3686 = vmatprep.subr.bf16.mxu0 %v8848_v13  ;;  %3716 = vmatprep.mubr.bf16.mxu0 %v9896_v53  ;;  %v8896_v13 = vld [vmem:[#allocation10 + $0x3f0] ss:$8 sps:$4 sm:$0xff]  }
 0x888   : > { %8393 = vmatpush3.bf16.msra.mxu1 %v10522_v9 }
 0x889   : > { %8394 = vmatprep.subr.bf16.mxu1 %v9897_v49  ;;  %3687 = vmatpush1.bf16.msra.mxu0 %v8846_v15 }
 0x88a   : > { %3688 = vmatprep.subr.bf16.mxu0 %v8851_v10  ;;  %v8904_v10 = vld [vmem:[#allocation10 + $0x3e4] ss:$8 sps:$4 sm:$0xff]  }
 0x88c   : > { %8395 = vmatpush3.bf16.msra.mxu1 %v10511_v14 }
 0x88d   : > { %8396 = vmatprep.subr.bf16.mxu1 %v9897_v49  ;;  %3689 = vmatpush1.bf16.msra.mxu0 %v8849_v17  ;;  %v8902_v17 = vld [vmem:[#allocation10 + $0x3e0] ss:$8 sps:$4 sm:$0xff]  }
 0x88e   : > { %3690 = vmatprep.subr.bf16.mxu0 %v8854_v47  ;;  %v8895_v47 = vld [vmem:[#allocation10 + $0x374] ss:$8 sps:$4 sm:$0xff]  }
 0x890   : > { %8397 = vmatpush3.bf16.msra.mxu1 %v10514_v18 }
 0x891   : > { %3691 = vmatpush1.bf16.msra.mxu0 %v8852_v19  ;;  %3487 = vmatprep.subr.bf16.mxu1 %v8857_v20  ;;  %v8891_v19 = vld [vmem:[#allocation5 + $0x30] sm:$0x1f]   ;;  %v8893_v20 = vld [vmem:[#allocation10 + $0x370] ss:$8 sps:$4 sm:$0xff]  }
 0x892   : > { %3692 = vmatprep.subr.bf16.mxu0 %v8860_v62  ;;  %v8901_v62 = vld [vmem:[#allocation10 + $0x364] ss:$8 sps:$4 sm:$0xff]  }
 0x893   : > { %8399 = vmatmul.mubr.msk.bf16.vlgmr.msra.gmra.mxu1 %vm2559_vm4, %v8842_v22  ;;  %v8899_v22 = vld [vmem:[#allocation10 + $0x360] ss:$8 sps:$4 sm:$0xff]  }
 0x894   : > { %3488 = vmatpush1.bf16.msra.mxu1 %v8855_v2  ;;  %3519 = vmatprep.mubr.bf16.mxu1 %v9896_v53  ;;  %v8907_v2 = vld [vmem:[#allocation10 + $0x354] ss:$8 sps:$4 sm:$0xff]  }
 0x895   : > { %3693 = vmatpush1.bf16.msra.mxu0 %v8858_v24  ;;  %3489 = vmatprep.subr.bf16.mxu1 %v8863_v27  ;;  %v8905_v24 = vld [vmem:[#allocation10 + $0x350] ss:$8 sps:$4 sm:$0xff]  }
 0x896   : > { %3694 = vmatprep.subr.bf16.mxu0 %v8866_v12  ;;  %v8908_v27 = vld [vmem:[#allocation10 + $0x3d0] ss:$8 sps:$4 sm:$0xff]   ;;  %v8911_v12 = vld [vmem:[#allocation10 + $0x340] ss:$8 sps:$4 sm:$0xff]  }
 0x898   : > { %3490 = vmatpush1.bf16.msra.mxu1 %v8861_v1  ;;  %v8910_v1 = vld [vmem:[#allocation10 + $0x3d4] ss:$8 sps:$4 sm:$0xff]  }
 0x899   : > { %3695 = vmatpush1.bf16.msra.mxu0 %v8864_v3  ;;  %3491 = vmatprep.subr.bf16.mxu1 %v8869_v48  ;;  %v8913_v3 = vld [vmem:[#allocation10 + $0x344] ss:$8 sps:$4 sm:$0xff]   ;;  %v8914_v48 = vld [vmem:[#allocation10 + $0x3c0] ss:$8 sps:$4 sm:$0xff]  }
 0x89a   : > { %3696 = vmatprep.subr.bf16.mxu0 %v8872_v59  ;;  %v8917_v59 = vld [vmem:[#allocation10 + $0x330] ss:$8 sps:$4 sm:$0xff]  }
 0x89c   : > { %3492 = vmatpush1.bf16.msra.mxu1 %v8867_v23  ;;  %v8916_v23 = vld [vmem:[#allocation10 + $0x3c4] ss:$8 sps:$4 sm:$0xff]  }
 0x89d   : > { %3697 = vmatpush1.bf16.msra.mxu0 %v8870_v7  ;;  %3493 = vmatprep.subr.bf16.mxu1 %v8875_v50  ;;  %v8919_v7 = vld [vmem:[#allocation10 + $0x334] ss:$8 sps:$4 sm:$0xff]  }
 0x89e   : > { %3698 = vmatprep.subr.bf16.mxu0 %v8878_v43  ;;  %v8922_v50 = vld [vmem:[#allocation10 + $0x3b4] ss:$8 sps:$4 sm:$0xff]   ;;  %v8920_v43 = vld [vmem:[#allocation10 + $0x3b0] ss:$8 sps:$4 sm:$0xff]  }
 0x8a0   : > { %3494 = vmatpush1.bf16.msra.mxu1 %v8873_v57  ;;  %v8925_v57 = vld [vmem:[#allocation10 + $0x324] ss:$8 sps:$4 sm:$0xff]  }
 0x8a1   : > { %3699 = vmatpush1.bf16.msra.mxu0 %v8876_v0  ;;  %3495 = vmatprep.subr.bf16.mxu1 %v8881_v31  ;;  %v8923_v0 = vld [vmem:[#allocation10 + $0x320] ss:$8 sps:$4 sm:$0xff]   ;;  %v8928_v31 = vld [vmem:[#allocation10 + $0x3a4] ss:$8 sps:$4 sm:$0xff]  }
 0x8a2   : > { %8426 = vmatprep.subr.bf16.mxu0 %v9897_v49 }
 0x8a4   : > { %3496 = vmatpush1.bf16.msra.mxu1 %v8879_v30  ;;  %v8926_v30 = vld [vmem:[#allocation10 + $0x3a0] ss:$8 sps:$4 sm:$0xff]  }
 0x8a5   : > { %3497 = vmatprep.subr.bf16.mxu1 %v8884_v51  ;;  %v8929_v51 = vld [vmem:[#allocation10 + $0x310] ss:$8 sps:$4 sm:$0xff]  }
 0x8a8   : > { %3498 = vmatpush1.bf16.msra.mxu1 %v8882_v63  ;;  %v8931_v63 = vld [vmem:[#allocation10 + $0x314] ss:$8 sps:$4 sm:$0xff]  }
 0x8a9   : > { %3499 = vmatprep.subr.bf16.mxu1 %v8887_v4  ;;  %v8932_v4 = vld [vmem:[#allocation10 + $0x390] ss:$8 sps:$4 sm:$0xff]  }
 0x8ac   : > { %3500 = vmatpush1.bf16.msra.mxu1 %v8885_v52  ;;  %v8934_v52 = vld [vmem:[#allocation10 + $0x394] ss:$8 sps:$4 sm:$0xff]  }
 0x8ad   : > { %3501 = vmatprep.subr.bf16.mxu1 %v8890_v55  ;;  %v8937_v55 = vld [vmem:[#allocation10 + $0x304] ss:$8 sps:$4 sm:$0xff]  }
 0x8b0   : > { %3502 = vmatpush1.bf16.msra.mxu1 %v8888_v56  ;;  %v8935_v56 = vld [vmem:[#allocation10 + $0x300] ss:$8 sps:$4 sm:$0xff]  }
 0x8b1   : > { %8414 = vmatprep.subr.bf16.mxu1 %v9897_v49 }
 0x933   : > { %v3324_v58 = vpop.f32.mrf.mxu0 }
 0x935   : > { %v3326_v8 = vpop.f32.mrf.mxu0 }
 0x937   : > { %v3328_v61 = vpop.f32.mrf.mxu0 }
 0x939   : > { %v3330_v25 = vpop.f32.mrf.mxu0 }
 0x943   : > { %v3579_v54 = vpop.f32.mrf.mxu0  ;;  %v3127_v6 = vpop.f32.mrf.mxu1 }
 0x944   : > { %v3136_v11 = vadd.f32 %v3127_v6, %v10568_v21 }
 0x945   : > { %v8412_v16 = vpop.f32.mrf.mxu0  ;;  %v3129_v26 = vpop.f32.mrf.mxu1 }
 0x946   : > { %v3137_v32 = vadd.f32 %v3129_v26, %v10570_v35  ;;  %v10602_v36 = vadd.f32 %v3324_v58, %v3136_v11  ;;  %v8940_v58 = vld [vmem:[#allocation10 + $0x384] ss:$8 sps:$4 sm:$0xff]  }
 0x947   : > { %v3582_v37 = vpop.f32.mrf.mxu0  ;;  %v3131_v38 = vpop.f32.mrf.mxu1 }
 0x948   : > { %v3586_v40 = vpack.c.bf16 %v3582_v37, %v3579_v54  ;;  %v3138_v41 = vadd.f32 %v3131_v38, %v10572_v39  ;;  %v10605_v60 = vadd.f32 %v3326_v8, %v3137_v32  ;;  %v8898_v39 = vld [vmem:[#allocation10 + $0x3f4] ss:$8 sps:$4 sm:$0xff]   ;;  %v8938_v8 = vld [vmem:[#allocation10 + $0x380] ss:$8 sps:$4 sm:$0xff]  }
 0x949   : > { %v3133_v28 = vpop.f32.mrf.mxu1  ;;  %v8413_v42 = vpop.f32.mrf.mxu0 }
 0x94a   : > { %v3139_v5 = vadd.f32 %v3133_v28, %v10574_v44  ;;  %3717 = vmatmul.mubr.bf16.vlgmr.msra.gmra.mxu0 %v3586_v40  ;;  %v10608_v34 = vadd.f32 %v3328_v61, %v3138_v41 }
 0x94b   : > { %8427 = vmatpush3.bf16.msra.mxu0 %v10518_v46  ;;  %8434 = vmatprep.mubr.msk.bf16.mxu0 %vm9898_vm2, %v9897_v49 }
 0x94c   : > { %8428 = vmatprep.subr.bf16.mxu0 %v9897_v49  ;;  %v10614_v21 = vadd.f32 %v3330_v25, %v3139_v5 }
 0x94f   : > { %8429 = vmatpush3.bf16.msra.mxu0 %v10522_v9 }
 0x950   : > { %8430 = vmatprep.subr.bf16.mxu0 %v9897_v49 }
 0x953   : > { %8431 = vmatpush3.bf16.msra.mxu0 %v10511_v14  ;;  %v3382_v35 = vpop.f32.mrf.mxu1 }
 0x954   : > { %8432 = vmatprep.subr.bf16.mxu0 %v9897_v49 }
 0x955   : > { %v8400_v44 = vpop.f32.mrf.mxu1 }
 0x957   : > { %8433 = vmatpush3.bf16.msra.mxu0 %v10514_v18  ;;  %v3385_v45 = vpop.f32.mrf.mxu1 }
 0x958   : > { %v3389_v33 = vpack.c.bf16 %v3385_v45, %v3382_v35  ;;  %4078 = vmatprep.subr.bf16.mxu0 %v8898_v39 }
 0x959   : > { %v8401_v15 = vpop.f32.mrf.mxu1 }
 0x95a   : > { %3520 = vmatmul.mubr.bf16.vlgmr.msra.gmra.mxu1 %v3389_v33  ;;  %8435 = vmatmul.mubr.msk.bf16.vlgmr.msra.gmra.mxu0 %vm2559_vm4, %v8892_v29 }
 0x95b   : > { %8415 = vmatpush3.bf16.msra.mxu1 %v10518_v46  ;;  %8422 = vmatprep.mubr.msk.bf16.mxu1 %vm9898_vm2, %v9897_v49 }
 0x95c   : > { %8416 = vmatprep.subr.bf16.mxu1 %v9897_v49  ;;  %4079 = vmatpush1.bf16.msra.mxu0 %v8896_v13 }
 0x95d   : > { %4080 = vmatprep.subr.bf16.mxu0 %v8904_v10  ;;  %4110 = vmatprep.mubr.bf16.mxu0 %v9896_v53 }
 0x95f   : > { %8417 = vmatpush3.bf16.msra.mxu1 %v10522_v9 }
 0x960   : > { %8418 = vmatprep.subr.bf16.mxu1 %v9897_v49  ;;  %4081 = vmatpush1.bf16.msra.mxu0 %v8902_v17  ;;  %v8942_v17 = vld [vmem:[#allocation10 + $0x470] ss:$8 sps:$4 sm:$0xff]  }
 0x961   : > { %4082 = vmatprep.subr.bf16.mxu0 %v8910_v1  ;;  %v8963_v1 = vld [vmem:[#allocation10 + $0x400] ss:$8 sps:$4 sm:$0xff]  }
 0x963   : > { %8419 = vmatpush3.bf16.msra.mxu1 %v10511_v14 }
 0x964   : > { %8420 = vmatprep.subr.bf16.mxu1 %v9897_v49  ;;  %4083 = vmatpush1.bf16.msra.mxu0 %v8908_v27  ;;  %v8968_v27 = vld [vmem:[#allocation13 + $0x74] ss:$8 sps:$4 sm:$0xff]  }
 0x965   : > { %4084 = vmatprep.subr.bf16.mxu0 %v8916_v23  ;;  %v8975_v23 = vld [vmem:[#allocation13 + $0x160] ss:$8 sps:$4 sm:$0xff]  }
 0x967   : > { %8421 = vmatpush3.bf16.msra.mxu1 %v10514_v18 }
 0x968   : > { %3881 = vmatprep.subr.bf16.mxu1 %v8895_v47  ;;  %4085 = vmatpush1.bf16.msra.mxu0 %v8914_v48  ;;  %v8945_v47 = vld [vmem:[#allocation10 + $0x460] ss:$8 sps:$4 sm:$0xff]  }
 0x969   : > { %4086 = vmatprep.subr.bf16.mxu0 %v8922_v50  ;;  %v8977_v48 = vld [vmem:[#allocation13 + $0x164] ss:$8 sps:$4 sm:$0xff]   ;;  %v8987_v50 = vld [vmem:[#allocation13 + $0x140] ss:$8 sps:$4 sm:$0xff]  }
 0x96a   : > { %8423 = vmatmul.mubr.msk.bf16.vlgmr.msra.gmra.mxu1 %vm2559_vm4, %v8891_v19  ;;  %v8948_v19 = vld [vmem:[#allocation10 + $0x450] ss:$8 sps:$4 sm:$0xff]  }
 0x96b   : > { %3882 = vmatpush1.bf16.msra.mxu1 %v8893_v20  ;;  %3913 = vmatprep.mubr.bf16.mxu1 %v9896_v53  ;;  %v8954_v20 = vld [vmem:[#allocation10 + $0x430] ss:$8 sps:$4 sm:$0xff]  }
 0x96c   : > { %3883 = vmatprep.subr.bf16.mxu1 %v8901_v62  ;;  %4087 = vmatpush1.bf16.msra.mxu0 %v8920_v43  ;;  %v8957_v62 = vld [vmem:[#allocation10 + $0x420] ss:$8 sps:$4 sm:$0xff]  }
 0x96d   : > { %4088 = vmatprep.subr.bf16.mxu0 %v8928_v31  ;;  %v8989_v43 = vld [vmem:[#allocation13 + $0x144] ss:$8 sps:$4 sm:$0xff]   ;;  %v8999_v31 = vld [vmem:[#allocation13 + $0x120] ss:$8 sps:$4 sm:$0xff]  }
 0x96f   : > { %3884 = vmatpush1.bf16.msra.mxu1 %v8899_v22  ;;  %v8959_v22 = vld [vmem:[#allocation10 + $0x424] ss:$8 sps:$4 sm:$0xff]  }
 0x970   : > { %3885 = vmatprep.subr.bf16.mxu1 %v8907_v2  ;;  %4089 = vmatpush1.bf16.msra.mxu0 %v8926_v30  ;;  %v8962_v2 = vld [vmem:[#allocation10 + $0x414] ss:$8 sps:$4 sm:$0xff]   ;;  %v9001_v30 = vld [vmem:[#allocation13 + $0x124] ss:$8 sps:$4 sm:$0xff]  }
 0x971   : > { %4090 = vmatprep.subr.bf16.mxu0 %v8934_v52  ;;  %v9011_v52 = vld [vmem:[#allocation13 + $0x100] ss:$8 sps:$4 sm:$0xff]  }
 0x973   : > { %3886 = vmatpush1.bf16.msra.mxu1 %v8905_v24  ;;  %v8965_v24 = vld [vmem:[#allocation10 + $0x404] ss:$8 sps:$4 sm:$0xff]  }
 0x974   : > { %3887 = vmatprep.subr.bf16.mxu1 %v8913_v3  ;;  %4091 = vmatpush1.bf16.msra.mxu0 %v8932_v4  ;;  %v8969_v3 = vld [vmem:[#allocation13 + $0x170] ss:$8 sps:$4 sm:$0xff]   ;;  %v9013_v4 = vld [vmem:[#allocation13 + $0x104] ss:$8 sps:$4 sm:$0xff]  }
 0x975   : > { %4092 = vmatprep.subr.bf16.mxu0 %v8940_v58  ;;  %v9023_v58 = vld [vmem:[#allocation13 + $0x1e0] ss:$8 sps:$4 sm:$0xff]  }
 0x977   : > { %3888 = vmatpush1.bf16.msra.mxu1 %v8911_v12  ;;  %v8971_v12 = vld [vmem:[#allocation13 + $0x174] ss:$8 sps:$4 sm:$0xff]  }
 0x978   : > { %3889 = vmatprep.subr.bf16.mxu1 %v8919_v7  ;;  %4093 = vmatpush1.bf16.msra.mxu0 %v8938_v8  ;;  %v8981_v7 = vld [vmem:[#allocation13 + $0x150] ss:$8 sps:$4 sm:$0xff]   ;;  %v9025_v8 = vld [vmem:[#allocation13 + $0x1e4] ss:$8 sps:$4 sm:$0xff]  }
 0x979   : > { %4577 = vmatprep.subr.bf16.mxu0 %v8971_v12  ;;  %v9044_v12 = vld [vmem:[#allocation13 + $0xa0] ss:$8 sps:$4 sm:$0xff]  }
 0x97b   : > { %3890 = vmatpush1.bf16.msra.mxu1 %v8917_v59  ;;  %v8983_v59 = vld [vmem:[#allocation13 + $0x154] ss:$8 sps:$4 sm:$0xff]  }
 0x97c   : > { %3891 = vmatprep.subr.bf16.mxu1 %v8925_v57  ;;  %v8993_v57 = vld [vmem:[#allocation13 + $0x130] ss:$8 sps:$4 sm:$0xff]  }
 0x97f   : > { %3892 = vmatpush1.bf16.msra.mxu1 %v8923_v0  ;;  %v8995_v0 = vld [vmem:[#allocation13 + $0x134] ss:$8 sps:$4 sm:$0xff]  }
 0x980   : > { %3893 = vmatprep.subr.bf16.mxu1 %v8931_v63  ;;  %v9005_v63 = vld [vmem:[#allocation13 + $0x110] ss:$8 sps:$4 sm:$0xff]  }
 0x983   : > { %3894 = vmatpush1.bf16.msra.mxu1 %v8929_v51  ;;  %v9007_v51 = vld [vmem:[#allocation13 + $0x114] ss:$8 sps:$4 sm:$0xff]  }
 0x984   : > { %3895 = vmatprep.subr.bf16.mxu1 %v8937_v55  ;;  %v9017_v55 = vld [vmem:[#allocation13 + $0x1f0] ss:$8 sps:$4 sm:$0xff]  }
 0x987   : > { %3896 = vmatpush1.bf16.msra.mxu1 %v8935_v56  ;;  %v9019_v56 = vld [vmem:[#allocation13 + $0x1f4] ss:$8 sps:$4 sm:$0xff]  }
 0x988   : > { %8438 = vmatprep.subr.bf16.mxu1 %v9897_v49 }
 0xa0a   : > { %v3718_v61 = vpop.f32.mrf.mxu0 }
 0xa0c   : > { %v3720_v25 = vpop.f32.mrf.mxu0 }
 0xa0e   : > { %v3722_v54 = vpop.f32.mrf.mxu0 }
 0xa10   : > { %v3724_v6 = vpop.f32.mrf.mxu0 }
 0xa1a   : > { %v3521_v11 = vpop.f32.mrf.mxu1  ;;  %v3973_v16 = vpop.f32.mrf.mxu0 }
 0xa1b   : > { %v3530_v26 = vadd.f32 %v3521_v11, %v10602_v36 }
 0xa1c   : > { %v3523_v32 = vpop.f32.mrf.mxu1  ;;  %v8436_v37 = vpop.f32.mrf.mxu0 }
 0xa1d   : > { %v3531_v38 = vadd.f32 %v3523_v32, %v10605_v60  ;;  %v10637_v40 = vadd.f32 %v3718_v61, %v3530_v26  ;;  %v9029_v61 = vld [vmem:[#allocation13 + $0x1d0] ss:$8 sps:$4 sm:$0xff]  }
 0xa1e   : > { %v3525_v41 = vpop.f32.mrf.mxu1  ;;  %v3976_v28 = vpop.f32.mrf.mxu0 }
 0xa1f   : > { %v3532_v42 = vadd.f32 %v3525_v41, %v10608_v34  ;;  %v10640_v5 = vadd.f32 %v3720_v25, %v3531_v38  ;;  %v3980_v35 = vpack.c.bf16 %v3976_v28, %v3973_v16  ;;  %v8944_v34 = vld [vmem:[#allocation10 + $0x474] ss:$8 sps:$4 sm:$0xff]  }
 0xa20   : > { %v3527_v39 = vpop.f32.mrf.mxu1  ;;  %v8437_v44 = vpop.f32.mrf.mxu0  ;;  %v9031_v25 = vld [vmem:[#allocation13 + $0x1d4] ss:$8 sps:$4 sm:$0xff]  }
 0xa21   : > { %v3533_v29 = vadd.f32 %v3527_v39, %v10614_v21  ;;  %v10643_v45 = vadd.f32 %v3722_v54, %v3532_v42  ;;  %4111 = vmatmul.mubr.bf16.vlgmr.msra.gmra.mxu0 %v3980_v35  ;;  %v8941_v21 = vld [vmem:[#allocation5 + $0x40] sm:$0x1f]   ;;  %v9035_v54 = vld [vmem:[#allocation13 + $0x1c0] ss:$8 sps:$4 sm:$0xff]  }
 0xa22   : > { %4578 = vmatpush1.bf16.msra.mxu0 %v8969_v3  ;;  %v8966_v44 = vld [vmem:[#allocation13 + $0x70] ss:$8 sps:$4 sm:$0xff]   ;;  %v9046_v3 = vld [vmem:[#allocation13 + $0xa4] ss:$8 sps:$4 sm:$0xff]  }
 0xa23   : > { %v10645_v36 = vadd.f32 %v3724_v6, %v3533_v29  ;;  %4579 = vmatprep.subr.bf16.mxu0 %v8977_v48  ;;  %v9037_v6 = vld [vmem:[#allocation13 + $0x1c4] ss:$8 sps:$4 sm:$0xff]   ;;  %v9047_v48 = vld [vmem:[#allocation13 + $0x1a0] ss:$8 sps:$4 sm:$0xff]  }
 0xa26   : > { %4580 = vmatpush1.bf16.msra.mxu0 %v8975_v23  ;;  %v9049_v23 = vld [vmem:[#allocation13 + $0x1a4] ss:$8 sps:$4 sm:$0xff]  }
 0xa27   : > { %4581 = vmatprep.subr.bf16.mxu0 %v8983_v59  ;;  %v9050_v59 = vld [vmem:[#allocation13 + $0x90] ss:$8 sps:$4 sm:$0xff]  }
 0xa2a   : > { %v3776_v33 = vpop.f32.mrf.mxu1  ;;  %4582 = vmatpush1.bf16.msra.mxu0 %v8981_v7  ;;  %v9052_v7 = vld [vmem:[#allocation13 + $0x94] ss:$8 sps:$4 sm:$0xff]  }
 0xa2b   : > { %4583 = vmatprep.subr.bf16.mxu0 %v8989_v43  ;;  %v9053_v43 = vld [vmem:[#allocation13 + $0x190] ss:$8 sps:$4 sm:$0xff]  }
 0xa2c   : > { %v8424_v60 = vpop.f32.mrf.mxu1 }
 0xa2d   : > { %v8972_v60 = vld [vmem:[#allocation13 + $0x60] ss:$8 sps:$4 sm:$0xff]  }
 0xa2e   : > { %v3779_v13 = vpop.f32.mrf.mxu1  ;;  %4584 = vmatpush1.bf16.msra.mxu0 %v8987_v50  ;;  %v9055_v50 = vld [vmem:[#allocation13 + $0x194] ss:$8 sps:$4 sm:$0xff]  }
 0xa2f   : > { %v3783_v15 = vpack.c.bf16 %v3779_v13, %v3776_v33  ;;  %4585 = vmatprep.subr.bf16.mxu0 %v8995_v0  ;;  %v8974_v33 = vld [vmem:[#allocation13 + $0x64] ss:$8 sps:$4 sm:$0xff]   ;;  %v8978_v13 = vld [vmem:[#allocation13 + $0x50] ss:$8 sps:$4 sm:$0xff]   ;;  %v9056_v0 = vld [vmem:[#allocation13 + $0x80] ss:$8 sps:$4 sm:$0xff]  }
 0xa30   : > { %v8425_v10 = vpop.f32.mrf.mxu1 }
 0xa31   : > { %3914 = vmatmul.mubr.bf16.vlgmr.msra.gmra.mxu1 %v3783_v15  ;;  %v8984_v15 = vld [vmem:[#allocation13 + $0x40] ss:$8 sps:$4 sm:$0xff]   ;;  %v8990_v10 = vld [vmem:[#allocation13 + $0x30] ss:$8 sps:$4 sm:$0xff]  }
 0xa32   : > { %8439 = vmatpush3.bf16.msra.mxu1 %v10518_v46  ;;  %8446 = vmatprep.mubr.msk.bf16.mxu1 %vm9898_vm2, %v9897_v49  ;;  %v8947_v46 = vld [vmem:[#allocation10 + $0x464] ss:$8 sps:$4 sm:$0xff]  }
 0xa33   : > { %8440 = vmatprep.subr.bf16.mxu1 %v9897_v49  ;;  %4586 = vmatpush1.bf16.msra.mxu0 %v8993_v57  ;;  %v9058_v57 = vld [vmem:[#allocation13 + $0x84] ss:$8 sps:$4 sm:$0xff]  }
 0xa34   : > { %4587 = vmatprep.subr.bf16.mxu0 %v9001_v30  ;;  %v9059_v30 = vld [vmem:[#allocation13 + $0x180] ss:$8 sps:$4 sm:$0xff]  }
 0xa36   : > { %8441 = vmatpush3.bf16.msra.mxu1 %v10522_v9  ;;  %v8950_v9 = vld [vmem:[#allocation10 + $0x454] ss:$8 sps:$4 sm:$0xff]  }
 0xa37   : > { %8442 = vmatprep.subr.bf16.mxu1 %v9897_v49  ;;  %4588 = vmatpush1.bf16.msra.mxu0 %v8999_v31  ;;  %v9061_v31 = vld [vmem:[#allocation13 + $0x184] ss:$8 sps:$4 sm:$0xff]  }
 0xa38   : > { %4589 = vmatprep.subr.bf16.mxu0 %v9007_v51  ;;  %v9067_v51 = vld [vmem:[#allocation13 + $0x274] ss:$8 sps:$4 sm:$0xff]  }
 0xa3a   : > { %8443 = vmatpush3.bf16.msra.mxu1 %v10511_v14  ;;  %v8951_v14 = vld [vmem:[#allocation10 + $0x440] ss:$8 sps:$4 sm:$0xff]  }
 0xa3b   : > { %8444 = vmatprep.subr.bf16.mxu1 %v9897_v49  ;;  %v8953_v49 = vld [vmem:[#allocation10 + $0x444] ss:$8 sps:$4 sm:$0xff]   ;;  %4590 = vmatpush1.bf16.msra.mxu0 %v9005_v63  ;;  %v9064_v63 = vld [vmem:[#allocation13 + $0x374] ss:$8 sps:$4 sm:$0xff]  }
 0xa3c   : > { %4591 = vmatprep.subr.bf16.mxu0 %v9013_v4 }
 0xa3e   : > { %8445 = vmatpush3.bf16.msra.mxu1 %v10514_v18  ;;  %v8956_v18 = vld [vmem:[#allocation10 + $0x434] ss:$8 sps:$4 sm:$0xff]  }
 0xa3f   : > { %4275 = vmatprep.subr.bf16.mxu1 %v8944_v34  ;;  %4592 = vmatpush1.bf16.msra.mxu0 %v9011_v52  ;;  %v8998_v34 = vld [vmem:[#allocation13 + $0x24] ss:$8 sps:$4 sm:$0xff]   ;;  %v4324_v52 = vlaneseq }
 0xa40   : > { %4593 = vmatprep.subr.bf16.mxu0 %v9019_v56 }
 0xa41   : > { %8447 = vmatmul.mubr.msk.bf16.vlgmr.msra.gmra.mxu1 %vm2559_vm4, %v8941_v21  ;;  %v8996_v21 = vld [vmem:[#allocation13 + $0x20] ss:$8 sps:$4 sm:$0xff]  }
 0xa42   : > { %4276 = vmatpush1.bf16.msra.mxu1 %v8942_v17  ;;  %4307 = vmatprep.mubr.bf16.mxu1 %v9896_v53  ;;  %v8960_v53 = vld [vmem:[#allocation10 + $0x410] ss:$8 sps:$4 sm:$0xff]  }
 0xa43   : > { %4277 = vmatprep.subr.bf16.mxu1 %v8947_v46  ;;  %4594 = vmatpush2.bf16.msra.mxu0 %v9017_v55  ;;  %v9004_v17 = vld [vmem:[#allocation13 + $0x14] ss:$8 sps:$4 sm:$0xff]   ;;  %v9002_v46 = vld [vmem:[#allocation13 + $0x10] ss:$8 sps:$4 sm:$0xff]   ;;  %v4325_v55 = vshrl.u32 %v4324_v52, 7 }
 0xa44   : > { %4595 = vmatprep.subr.bf16.mxu0 %v9025_v8  ;;  %v9109_v52 = vld [vmem:[#allocation13 + $0x204] ss:$8 sps:$4 sm:$0xff]  }
 0xa46   : > { %4278 = vmatpush1.bf16.msra.mxu1 %v8945_v47  ;;  %v9010_v47 = vld [vmem:[#allocation13 + $0x4] ss:$8 sps:$4 sm:$0xff]  }
 0xa47   : > { %4279 = vmatprep.subr.bf16.mxu1 %v8950_v9  ;;  %4596 = vmatpush2.bf16.msra.mxu0 %v9023_v58  ;;  %v9008_v9 = vld [vmem:[#allocation13] ss:$8 sps:$4 sm:$0xff]   ;;  %v10670_v58 = vsub.s32 0, %v4325_v55 }
 0xa48   : > { %4597 = vmatprep.subr.bf16.mxu0 %v9031_v25 }
 0xa4a   : > { %4280 = vmatpush1.bf16.msra.mxu1 %v8948_v19  ;;  %v9016_v19 = vld [vmem:[#allocation13 + $0xf4] ss:$8 sps:$4 sm:$0xff]  }
 0xa4b   : > { %4281 = vmatprep.subr.bf16.mxu1 %v8953_v49  ;;  %4598 = vmatpush2.bf16.msra.mxu0 %v9029_v61  ;;  %v9014_v49 = vld [vmem:[#allocation13 + $0xf0] ss:$8 sps:$4 sm:$0xff]   ;;  %v4322_v61 = vld [vmem:[#allocation11] sm:$0x3] }
 0xa4c   : > { %4599 = vmatprep.subr.bf16.mxu0 %v9037_v6 }
 0xa4e   : > { %4282 = vmatpush1.bf16.msra.mxu1 %v8951_v14  ;;  %v9022_v14 = vld [vmem:[#allocation13 + $0xe4] ss:$8 sps:$4 sm:$0xff]  }
 0xa4f   : > { %4283 = vmatprep.subr.bf16.mxu1 %v8956_v18  ;;  %4600 = vmatpush2.bf16.msra.mxu0 %v9035_v54  ;;  %v9020_v18 = vld [vmem:[#allocation13 + $0xe0] ss:$8 sps:$4 sm:$0xff]   ;;  %v10673_v54 = vsub.s32 1, %v4325_v55  ;;  %v9112_v55 = vld [vmem:[#allocation13 + $0x3f4] ss:$8 sps:$4 sm:$0xff]  }
 0xa52   : > { %4284 = vmatpush1.bf16.msra.mxu1 %v8954_v20  ;;  %v9028_v20 = vld [vmem:[#allocation13 + $0xd4] ss:$8 sps:$4 sm:$0xff]  }
 0xa53   : > { %4285 = vmatprep.subr.bf16.mxu1 %v8959_v22  ;;  %v9034_v22 = vld [vmem:[#allocation13 + $0xc4] ss:$8 sps:$4 sm:$0xff]  }
 0xa56   : > { %4286 = vmatpush1.bf16.msra.mxu1 %v8957_v62  ;;  %v9026_v62 = vld [vmem:[#allocation13 + $0xd0] ss:$8 sps:$4 sm:$0xff]  }
 0xa57   : > { %4287 = vmatprep.subr.bf16.mxu1 %v8962_v2  ;;  %v9032_v2 = vld [vmem:[#allocation13 + $0xc0] ss:$8 sps:$4 sm:$0xff]  }
 0xa5a   : > { %4288 = vmatpush1.bf16.msra.mxu1 %v8960_v53  ;;  %v9040_v53 = vld [vmem:[#allocation13 + $0xb4] ss:$8 sps:$4 sm:$0xff]  }
 0xa5b   : > { %4289 = vmatprep.subr.bf16.mxu1 %v8965_v24  ;;  %v9038_v24 = vld [vmem:[#allocation13 + $0xb0] ss:$8 sps:$4 sm:$0xff]  }
 0xa5e   : > { %4290 = vmatpush1.bf16.msra.mxu1 %v8963_v1  ;;  %v9043_v1 = vld [vmem:[#allocation13 + $0x1b4] ss:$8 sps:$4 sm:$0xff]  }
 0xa5f   : > { %4778 = vmatprep.subr.bf16.mxu1 %v8968_v27  ;;  %v9041_v27 = vld [vmem:[#allocation13 + $0x1b0] ss:$8 sps:$4 sm:$0xff]   ;;  %4601 = vmatprep.subr.bf16.mxu0 %v9043_v1  ;;  %v9085_v1 = vld [vmem:[#allocation13 + $0x244] ss:$8 sps:$4 sm:$0xff]  }
 0xa60   : > { %4602 = vmatpush2.bf16.msra.mxu0 %v9041_v27  ;;  %v9080_v27 = vld [vmem:[#allocation13 + $0x340] ss:$8 sps:$4 sm:$0xff]  }
 0xa61   : > { %4603 = vmatprep.subr.bf16.mxu0 %v9049_v23  ;;  %v9091_v23 = vld [vmem:[#allocation13 + $0x234] ss:$8 sps:$4 sm:$0xff]  }
 0xa64   : > { %4604 = vmatpush2.bf16.msra.mxu0 %v9047_v48  ;;  %v9086_v48 = vld [vmem:[#allocation13 + $0x330] ss:$8 sps:$4 sm:$0xff]  }
 0xa65   : > { %4605 = vmatprep.subr.bf16.mxu0 %v9055_v50  ;;  %v9097_v50 = vld [vmem:[#allocation13 + $0x224] ss:$8 sps:$4 sm:$0xff]  }
 0xa68   : > { %4606 = vmatpush2.bf16.msra.mxu0 %v9053_v43  ;;  %v9092_v43 = vld [vmem:[#allocation13 + $0x320] ss:$8 sps:$4 sm:$0xff]  }
 0xa69   : > { %4607 = vmatprep.subr.bf16.mxu0 %v9061_v31  ;;  %v9103_v31 = vld [vmem:[#allocation13 + $0x214] ss:$8 sps:$4 sm:$0xff]  }
 0xa6c   : > { %4608 = vmatpush2.bf16.msra.mxu0 %v9059_v30  ;;  %v9098_v30 = vld [vmem:[#allocation13 + $0x310] ss:$8 sps:$4 sm:$0xff]  }
 0xa6d   : > { %5018 = vmatprep.subr.bf16.mxu0 %v9067_v51  ;;  %v9101_v51 = vld [vmem:[#allocation13 + $0x210] ss:$8 sps:$4 sm:$0xff]  }
 0xae1   : > { %v4112_v4 = vpop.f32.mrf.mxu0 }
 0xae3   : > { %v4114_v56 = vpop.f32.mrf.mxu0 }
 0xae5   : > { %v4116_v8 = vpop.f32.mrf.mxu0 }
 0xaf1   : > { %v3915_v11 = vpop.f32.mrf.mxu1 }
 0xaf2   : > { %v10659_v16 = vadd.f32 %v3915_v11, %v10637_v40 }
 0xaf3   : > { %v3917_v26 = vpop.f32.mrf.mxu1 }
 0xaf4   : > { %v10662_v32 = vadd.f32 %v3917_v26, %v10640_v5  ;;  %v8980_v5 = vld [vmem:[#allocation13 + $0x54] ss:$8 sps:$4 sm:$0xff]   ;;  %v4121_v25 = vadd.f32 %v4112_v4, %v10659_v16  ;;  %v9104_v4 = vld [vmem:[#allocation13 + $0x300] ss:$8 sps:$4 sm:$0xff]  }
 0xaf5   : > { %v3919_v37 = vpop.f32.mrf.mxu1 }
 0xaf6   : > { %v10665_v38 = vadd.f32 %v3919_v37, %v10643_v45  ;;  %v8986_v45 = vld [vmem:[#allocation13 + $0x44] ss:$8 sps:$4 sm:$0xff]   ;;  %v4122_v11 = vadd.f32 %v4114_v56, %v10662_v32  ;;  %v4327_v37 = vrot.slane %v4322_v61, %v10670_v58  ;;  %v9107_v56 = vld [vmem:[#allocation13 + $0x200] ss:$8 sps:$4 sm:$0xff]  }
 0xaf7   : > { %v3921_v41 = vpop.f32.mrf.mxu1 }
 0xaf8   : > { %v10668_v28 = vadd.f32 %v3921_v41, %v10645_v36  ;;  %v8992_v36 = vld [vmem:[#allocation13 + $0x34] ss:$8 sps:$4 sm:$0xff]   ;;  %v4118_v41 = vpop.f32.mrf.mxu0 }
 0xb01   : > { %v4170_v42 = vpop.f32.mrf.mxu1 }
 0xb03   : > { %v8448_v35 = vpop.f32.mrf.mxu1 }
 0xb04   : > { %v4123_v35 = vadd.f32 %v4116_v8, %v10665_v38  ;;  %v9115_v8 = vld [vmem:[#allocation13 + $0x2f4] ss:$8 sps:$4 sm:$0xff]  }
 0xb05   : > { %v4173_v39 = vpop.f32.mrf.mxu1 }
 0xb06   : > { %v4177_v29 = vpack.c.bf16 %v4173_v39, %v4170_v42 }
 0xb07   : > { %v8449_v40 = vpop.f32.mrf.mxu1 }
 0xb08   : > { %4308 = vmatmul.mubr.bf16.vlgmr.msra.gmra.mxu1 %v4177_v29 }
 0xb09   : > { %4779 = vmatpush1.bf16.msra.mxu1 %v8966_v44  ;;  %v4331_v44 = vrot.slane %v4322_v61, %v10673_v54  ;;  %v9110_v61 = vld [vmem:[#allocation13 + $0x3f0] ss:$8 sps:$4 sm:$0xff]  }
 0xb0a   : > { %4780 = vmatprep.subr.bf16.mxu1 %v8974_v33  ;;  %v4124_v33 = vadd.f32 %v4118_v41, %v10668_v28  ;;  %v9119_v41 = vld [vmem:[#allocation13 + $0x2e0] ss:$8 sps:$4 sm:$0xff]  }
 0xb0d   : > { %4781 = vmatpush1.bf16.msra.mxu1 %v8972_v60 }
 0xb0e   : > { %4782 = vmatprep.subr.bf16.mxu1 %v8980_v5 }
 0xb11   : > { %4783 = vmatpush1.bf16.msra.mxu1 %v8978_v13 }
 0xb12   : > { %4784 = vmatprep.subr.bf16.mxu1 %v8986_v45 }
 0xb15   : > { %4785 = vmatpush1.bf16.msra.mxu1 %v8984_v15 }
 0xb16   : > { %4786 = vmatprep.subr.bf16.mxu1 %v8992_v36 }
 0xb19   : > { %4787 = vmatpush1.bf16.msra.mxu1 %v8990_v10 }
 0xb1a   : > { %4788 = vmatprep.subr.bf16.mxu1 %v8998_v34 }
 0xb1d   : > { %4789 = vmatpush1.bf16.msra.mxu1 %v8996_v21 }
 0xb1e   : > { %4790 = vmatprep.subr.bf16.mxu1 %v9004_v17  ;;  %v9062_v17 = vld [vmem:[#allocation13 + $0x370] ss:$8 sps:$4 sm:$0xff]  }
 0xb21   : > { %4791 = vmatpush1.bf16.msra.mxu1 %v9002_v46  ;;  %v9070_v46 = vld [vmem:[#allocation13 + $0x364] ss:$8 sps:$4 sm:$0xff]  }
 0xb22   : > { %4792 = vmatprep.subr.bf16.mxu1 %v9010_v47  ;;  %v9065_v47 = vld [vmem:[#allocation13 + $0x270] ss:$8 sps:$4 sm:$0xff]  }
 0xb25   : > { %4793 = vmatpush1.bf16.msra.mxu1 %v9008_v9 }
 0xb26   : > { %4794 = vmatprep.subr.bf16.mxu1 %v9016_v19  ;;  %v9073_v19 = vld [vmem:[#allocation13 + $0x264] ss:$8 sps:$4 sm:$0xff]  }
 0xb29   : > { %4795 = vmatpush2.bf16.msra.mxu1 %v9014_v49 }
 0xb2a   : > { %4796 = vmatprep.subr.bf16.mxu1 %v9022_v14  ;;  %v9068_v14 = vld [vmem:[#allocation13 + $0x360] ss:$8 sps:$4 sm:$0xff]  }
 0xb2d   : > { %4797 = vmatpush2.bf16.msra.mxu1 %v9020_v18 }
 0xb2e   : > { %4798 = vmatprep.subr.bf16.mxu1 %v9028_v20  ;;  %v9076_v20 = vld [vmem:[#allocation13 + $0x354] ss:$8 sps:$4 sm:$0xff]  }
 0xb31   : > { %4799 = vmatpush2.bf16.msra.mxu1 %v9026_v62  ;;  %v9071_v62 = vld [vmem:[#allocation13 + $0x260] ss:$8 sps:$4 sm:$0xff]  }
 0xb32   : > { %4800 = vmatprep.subr.bf16.mxu1 %v9034_v22  ;;  %v9079_v22 = vld [vmem:[#allocation13 + $0x254] ss:$8 sps:$4 sm:$0xff]  }
 0xb35   : > { %4801 = vmatpush2.bf16.msra.mxu1 %v9032_v2  ;;  %v9074_v2 = vld [vmem:[#allocation13 + $0x350] ss:$8 sps:$4 sm:$0xff]  }
 0xb36   : > { %4802 = vmatprep.subr.bf16.mxu1 %v9040_v53  ;;  %v9082_v53 = vld [vmem:[#allocation13 + $0x344] ss:$8 sps:$4 sm:$0xff]  }
 0xb39   : > { %4803 = vmatpush2.bf16.msra.mxu1 %v9038_v24  ;;  %v9077_v24 = vld [vmem:[#allocation13 + $0x250] ss:$8 sps:$4 sm:$0xff]  }
 0xb3a   : > { %4804 = vmatprep.subr.bf16.mxu1 %v9046_v3  ;;  %v9088_v3 = vld [vmem:[#allocation13 + $0x334] ss:$8 sps:$4 sm:$0xff]  }
 0xb3d   : > { %4805 = vmatpush2.bf16.msra.mxu1 %v9044_v12  ;;  %v9083_v12 = vld [vmem:[#allocation13 + $0x240] ss:$8 sps:$4 sm:$0xff]  }
 0xb3e   : > { %4806 = vmatprep.subr.bf16.mxu1 %v9052_v7  ;;  %v9094_v7 = vld [vmem:[#allocation13 + $0x324] ss:$8 sps:$4 sm:$0xff]  }
 0xb41   : > { %4807 = vmatpush2.bf16.msra.mxu1 %v9050_v59  ;;  %v9089_v59 = vld [vmem:[#allocation13 + $0x230] ss:$8 sps:$4 sm:$0xff]  }
 0xb42   : > { %4808 = vmatprep.subr.bf16.mxu1 %v9058_v57  ;;  %v9100_v57 = vld [vmem:[#allocation13 + $0x314] ss:$8 sps:$4 sm:$0xff]  }
 0xb45   : > { %4809 = vmatpush2.bf16.msra.mxu1 %v9056_v0  ;;  %v9095_v0 = vld [vmem:[#allocation13 + $0x220] ss:$8 sps:$4 sm:$0xff]  }
 0xb46   : > { %5258 = vmatprep.subr.bf16.mxu1 %v9064_v63  ;;  %v9106_v63 = vld [vmem:[#allocation13 + $0x304] ss:$8 sps:$4 sm:$0xff]  }
 0xbc8   : > { %v4309_v6 = vpop.f32.mrf.mxu1 }
 0xbc9   : > { %v4318_v26 = vadd.f32 %v4309_v6, %v4121_v25  ;;  %v9118_v25 = vld [vmem:[#allocation13 + $0x3e4] ss:$8 sps:$4 sm:$0xff]   ;;  %v9113_v6 = vld [vmem:[#allocation13 + $0x2f0] ss:$8 sps:$4 sm:$0xff]  }
 0xbca   : > { %v4311_v42 = vpop.f32.mrf.mxu1 }
 0xbcb   : > { %v4319_v39 = vadd.f32 %v4311_v42, %v4122_v11  ;;  %v4334_v40 = vadd.f32 %v4327_v37, %v4318_v26  ;;  %v9121_v11 = vld [vmem:[#allocation13 + $0x2e4] ss:$8 sps:$4 sm:$0xff]   ;;  %v9116_v26 = vld [vmem:[#allocation13 + $0x3e0] ss:$8 sps:$4 sm:$0xff]   ;;  %v9127_v42 = vld [vmem:[#allocation13 + $0x2d4] ss:$8 sps:$4 sm:$0xff]  }
 0xbcc   : > { %v4313_v29 = vpop.f32.mrf.mxu1 }
 0xbcd   : > { %v4320_v16 = vadd.f32 %v4313_v29, %v4123_v35  ;;  %v4335_v5 = vadd.f32 %v4331_v44, %v4319_v39  ;;  %v4338_v32 = vmax.f32 %v4334_v40, 0.0  ;;  %v9122_v35 = vld [vmem:[#allocation13 + $0x3d0] ss:$8 sps:$4 sm:$0xff]   ;;  %v9130_v39 = vld [vmem:[#allocation13 + $0x3c4] ss:$8 sps:$4 sm:$0xff]  }
 0xbce   : > { %v4315_v60 = vpop.f32.mrf.mxu1  ;;  %v9133_v29 = vld [vmem:[#allocation13 + $0x2c4] ss:$8 sps:$4 sm:$0xff]   ;;  %v9136_v40 = vld [vmem:[#allocation13 + $0x3b4] ss:$8 sps:$4 sm:$0xff]  }
 0xbcf   : > { %v4336_v13 = vadd.f32 %v4327_v37, %v4320_v16  ;;  %v4321_v45 = vadd.f32 %v4315_v60, %v4124_v33  ;;  %v4339_v10 = vmax.f32 %v4335_v5, 0.0  ;;  %v9124_v37 = vld [vmem:[#allocation13 + $0x3d4] ss:$8 sps:$4 sm:$0xff]   ;;  %v9128_v33 = vld [vmem:[#allocation13 + $0x3c0] ss:$8 sps:$4 sm:$0xff]  }
 0xbd0   : > { %v9131_v16 = vld [vmem:[#allocation13 + $0x2c0] ss:$8 sps:$4 sm:$0xff]   ;;  %v9139_v60 = vld [vmem:[#allocation13 + $0x2b4] ss:$8 sps:$4 sm:$0xff]   ;;  %v9134_v5 = vld [vmem:[#allocation13 + $0x3b0] ss:$8 sps:$4 sm:$0xff]  }
 0xbd1   : > { %v4340_v15 = vmax.f32 %v4336_v13, 0.0  ;;  %v4337_v36 = vadd.f32 %v4331_v44, %v4321_v45  ;;  %v9125_v44 = vld [vmem:[#allocation13 + $0x2d0] ss:$8 sps:$4 sm:$0xff]   ;;  %v9142_v13 = vld [vmem:[#allocation13 + $0x3a4] ss:$8 sps:$4 sm:$0xff]  }
 0xbd2   : > { %v9137_v45 = vld [vmem:[#allocation13 + $0x2b0] ss:$8 sps:$4 sm:$0xff]  }
 0xbd3   : > { %v10680_v34 = vpack.c.bf16 %v4340_v15, %v4338_v32  ;;  %v4341_v21 = vmax.f32 %v4337_v36, 0.0  ;;  %v9145_v32 = vld [vmem:[#allocation13 + $0x2a4] ss:$8 sps:$4 sm:$0xff]   ;;  %v9140_v15 = vld [vmem:[#allocation13 + $0x3a0] ss:$8 sps:$4 sm:$0xff]  }
 0xbd4   : > { %v9148_v36 = vld [vmem:[#allocation13 + $0x394] ss:$8 sps:$4 sm:$0xff]  }
 0xbd5   : > { %v10682_v38 = vpack.c.bf16 %v4341_v21, %v4339_v10  ;;  %v10690_v9 = vshrl.u32 %v10680_v34, 16  ;;  %v9143_v10 = vld [vmem:[#allocation13 + $0x2a0] ss:$8 sps:$4 sm:$0xff]   ;;  %v9151_v21 = vld [vmem:[#allocation13 + $0x294] ss:$8 sps:$4 sm:$0xff]  }
 0xbd7   : > { %4810 = vmatprep.mubr.bf16.mxu1 %v10682_v38  ;;  %v10686_v28 = vshrl.u32 %v10682_v38, 16  ;;  %v4855_v49 = vrot.slane %v10682_v38, 1 }
 0xbd8   : > { %4811 = vmatmul.mubr.bf16.vlgmr.msra.gmra.mxu1 %v10680_v34 }
 0xbd9   : > { %5259 = vmatpush1.bf16.msra.mxu1 %v9062_v17  ;;  %4609 = vmatprep.mubr.bf16.mxu0 %v10686_v28  ;;  %v5095_v18 = vrot.slane %v10686_v28, 1  ;;  %v9146_v17 = vld [vmem:[#allocation13 + $0x390] ss:$8 sps:$4 sm:$0xff]  }
 0xbda   : > { %4610 = vmatmul.mubr.bf16.vlgmr.msra.gmra.mxu0 %v10690_v9  ;;  %5260 = vmatprep.subr.bf16.mxu1 %v9070_v46  ;;  %v9154_v46 = vld [vmem:[#allocation13 + $0x384] ss:$8 sps:$4 sm:$0xff]  }
 0xbdb   : > { %5019 = vmatpush1.bf16.msra.mxu0 %v9065_v47  ;;  %5050 = vmatprep.mubr.bf16.mxu0 %v4855_v49  ;;  %v9149_v47 = vld [vmem:[#allocation13 + $0x290] ss:$8 sps:$4 sm:$0xff]   ;;  %v9152_v49 = vld [vmem:[#allocation13 + $0x380] ss:$8 sps:$4 sm:$0xff]  }
 0xbdc   : > { %5290 = vmatprep.mubr.bf16.mxu1 %v5095_v18  ;;  %5020 = vmatprep.subr.bf16.mxu0 %v9073_v19  ;;  %v9157_v19 = vld [vmem:[#allocation13 + $0x284] ss:$8 sps:$4 sm:$0xff]   ;;  %v9155_v18 = vld [vmem:[#allocation13 + $0x280] ss:$8 sps:$4 sm:$0xff]  }
 0xbdd   : > { %5261 = vmatpush1.bf16.msra.mxu1 %v9068_v14  ;;  %v9160_v14 = vld [vmem:[#allocation13 + $0x574] ss:$8 sps:$4 sm:$0xff]  }
 0xbde   : > { %5262 = vmatprep.subr.bf16.mxu1 %v9076_v20  ;;  %v9163_v20 = vld [vmem:[#allocation13 + $0x474] ss:$8 sps:$4 sm:$0xff]  }
 0xbdf   : > { %5021 = vmatpush1.bf16.msra.mxu0 %v9071_v62  ;;  %v9158_v62 = vld [vmem:[#allocation13 + $0x570] ss:$8 sps:$4 sm:$0xff]  }
 0xbe0   : > { %5022 = vmatprep.subr.bf16.mxu0 %v9079_v22  ;;  %v5094_v22 = vrot.slane %v10690_v9, 1 }
 0xbe1   : > { %5263 = vmatpush1.bf16.msra.mxu1 %v9074_v2  ;;  %v9166_v2 = vld [vmem:[#allocation13 + $0x564] ss:$8 sps:$4 sm:$0xff]  }
 0xbe2   : > { %5264 = vmatprep.subr.bf16.mxu1 %v9082_v53  ;;  %v5575_v53 = vrot.slane %v10686_v28, 2 }
 0xbe3   : > { %5023 = vmatpush1.bf16.msra.mxu0 %v9077_v24  ;;  %v9161_v24 = vld [vmem:[#allocation13 + $0x470] ss:$8 sps:$4 sm:$0xff]  }
 0xbe4   : > { %5024 = vmatprep.subr.bf16.mxu0 %v9085_v1  ;;  %v4854_v1 = vrot.slane %v10680_v34, 1 }
 0xbe5   : > { %5265 = vmatpush1.bf16.msra.mxu1 %v9080_v27  ;;  %v9169_v27 = vld [vmem:[#allocation13 + $0x464] ss:$8 sps:$4 sm:$0xff]  }
 0xbe6   : > { %5266 = vmatprep.subr.bf16.mxu1 %v9088_v3  ;;  %v5335_v3 = vrot.slane %v10682_v38, 2 }
 0xbe7   : > { %5025 = vmatpush1.bf16.msra.mxu0 %v9083_v12  ;;  %v9164_v12 = vld [vmem:[#allocation13 + $0x560] ss:$8 sps:$4 sm:$0xff]  }
 0xbe8   : > { %5026 = vmatprep.subr.bf16.mxu0 %v9091_v23  ;;  %v9172_v23 = vld [vmem:[#allocation13 + $0x554] ss:$8 sps:$4 sm:$0xff]  }
 0xbe9   : > { %5267 = vmatpush1.bf16.msra.mxu1 %v9086_v48  ;;  %v9167_v48 = vld [vmem:[#allocation13 + $0x460] ss:$8 sps:$4 sm:$0xff]  }
 0xbea   : > { %5268 = vmatprep.subr.bf16.mxu1 %v9094_v7  ;;  %v9175_v7 = vld [vmem:[#allocation13 + $0x454] ss:$8 sps:$4 sm:$0xff]  }
 0xbeb   : > { %5027 = vmatpush1.bf16.msra.mxu0 %v9089_v59  ;;  %v9170_v59 = vld [vmem:[#allocation13 + $0x550] ss:$8 sps:$4 sm:$0xff]  }
 0xbec   : > { %5028 = vmatprep.subr.bf16.mxu0 %v9097_v50  ;;  %v9178_v50 = vld [vmem:[#allocation13 + $0x544] ss:$8 sps:$4 sm:$0xff]  }
 0xbed   : > { %5269 = vmatpush1.bf16.msra.mxu1 %v9092_v43  ;;  %v9173_v43 = vld [vmem:[#allocation13 + $0x450] ss:$8 sps:$4 sm:$0xff]  }
 0xbee   : > { %5270 = vmatprep.subr.bf16.mxu1 %v9100_v57  ;;  %v9181_v57 = vld [vmem:[#allocation13 + $0x444] ss:$8 sps:$4 sm:$0xff]  }
 0xbef   : > { %5029 = vmatpush1.bf16.msra.mxu0 %v9095_v0  ;;  %v9176_v0 = vld [vmem:[#allocation13 + $0x540] ss:$8 sps:$4 sm:$0xff]  }
 0xbf0   : > { %5030 = vmatprep.subr.bf16.mxu0 %v9103_v31  ;;  %v9184_v31 = vld [vmem:[#allocation13 + $0x534] ss:$8 sps:$4 sm:$0xff]  }
 0xbf1   : > { %5271 = vmatpush1.bf16.msra.mxu1 %v9098_v30  ;;  %v9179_v30 = vld [vmem:[#allocation13 + $0x440] ss:$8 sps:$4 sm:$0xff]  }
 0xbf2   : > { %5272 = vmatprep.subr.bf16.mxu1 %v9106_v63  ;;  %v9187_v63 = vld [vmem:[#allocation13 + $0x434] ss:$8 sps:$4 sm:$0xff]  }
 0xbf3   : > { %5031 = vmatpush1.bf16.msra.mxu0 %v9101_v51  ;;  %v9182_v51 = vld [vmem:[#allocation13 + $0x530] ss:$8 sps:$4 sm:$0xff]  }
 0xbf4   : > { %5032 = vmatprep.subr.bf16.mxu0 %v9109_v52  ;;  %v9190_v52 = vld [vmem:[#allocation13 + $0x524] ss:$8 sps:$4 sm:$0xff]  }
 0xbf5   : > { %5273 = vmatpush1.bf16.msra.mxu1 %v9104_v4  ;;  %v9185_v4 = vld [vmem:[#allocation13 + $0x430] ss:$8 sps:$4 sm:$0xff]  }
 0xbf6   : > { %5274 = vmatprep.subr.bf16.mxu1 %v9112_v55  ;;  %v9193_v55 = vld [vmem:[#allocation13 + $0x424] ss:$8 sps:$4 sm:$0xff]  }
 0xbf7   : > { %5033 = vmatpush1.bf16.msra.mxu0 %v9107_v56  ;;  %v9188_v56 = vld [vmem:[#allocation13 + $0x520] ss:$8 sps:$4 sm:$0xff]  }
 0xbf8   : > { %5034 = vmatprep.subr.bf16.mxu0 %v9115_v8  ;;  %v9196_v8 = vld [vmem:[#allocation13 + $0x514] ss:$8 sps:$4 sm:$0xff]  }
 0xbf9   : > { %5275 = vmatpush2.bf16.msra.mxu1 %v9110_v61  ;;  %v9191_v61 = vld [vmem:[#allocation13 + $0x420] ss:$8 sps:$4 sm:$0xff]  }
 0xbfa   : > { %5276 = vmatprep.subr.bf16.mxu1 %v9118_v25  ;;  %v9199_v25 = vld [vmem:[#allocation13 + $0x414] ss:$8 sps:$4 sm:$0xff]  }
 0xbfb   : > { %5035 = vmatpush2.bf16.msra.mxu0 %v9113_v6  ;;  %v9194_v6 = vld [vmem:[#allocation13 + $0x510] ss:$8 sps:$4 sm:$0xff]  }
 0xbfc   : > { %5036 = vmatprep.subr.bf16.mxu0 %v9121_v11  ;;  %v9202_v11 = vld [vmem:[#allocation13 + $0x504] ss:$8 sps:$4 sm:$0xff]  }
 0xbfd   : > { %5277 = vmatpush2.bf16.msra.mxu1 %v9116_v26  ;;  %v9197_v26 = vld [vmem:[#allocation13 + $0x410] ss:$8 sps:$4 sm:$0xff]  }
 0xbfe   : > { %5278 = vmatprep.subr.bf16.mxu1 %v9124_v37  ;;  %v9205_v37 = vld [vmem:[#allocation13 + $0x404] ss:$8 sps:$4 sm:$0xff]  }
 0xbff   : > { %5037 = vmatpush2.bf16.msra.mxu0 %v9119_v41  ;;  %v9200_v41 = vld [vmem:[#allocation13 + $0x500] ss:$8 sps:$4 sm:$0xff]  }
 0xc00   : > { %5038 = vmatprep.subr.bf16.mxu0 %v9127_v42  ;;  %v9208_v42 = vld [vmem:[#allocation13 + $0x5f4] ss:$8 sps:$4 sm:$0xff]  }
 0xc01   : > { %5279 = vmatpush2.bf16.msra.mxu1 %v9122_v35  ;;  %v9203_v35 = vld [vmem:[#allocation13 + $0x400] ss:$8 sps:$4 sm:$0xff]  }
 0xc02   : > { %5280 = vmatprep.subr.bf16.mxu1 %v9130_v39  ;;  %v9211_v39 = vld [vmem:[#allocation13 + $0x4f4] ss:$8 sps:$4 sm:$0xff]  }
 0xc03   : > { %5039 = vmatpush2.bf16.msra.mxu0 %v9125_v44  ;;  %v9206_v44 = vld [vmem:[#allocation13 + $0x5f0] ss:$8 sps:$4 sm:$0xff]  }
 0xc04   : > { %5040 = vmatprep.subr.bf16.mxu0 %v9133_v29  ;;  %v9214_v29 = vld [vmem:[#allocation13 + $0x5e4] ss:$8 sps:$4 sm:$0xff]  }
 0xc05   : > { %5281 = vmatpush2.bf16.msra.mxu1 %v9128_v33  ;;  %v9209_v33 = vld [vmem:[#allocation13 + $0x4f0] ss:$8 sps:$4 sm:$0xff]  }
 0xc06   : > { %5282 = vmatprep.subr.bf16.mxu1 %v9136_v40  ;;  %v9217_v40 = vld [vmem:[#allocation13 + $0x4e4] ss:$8 sps:$4 sm:$0xff]  }
 0xc07   : > { %5041 = vmatpush2.bf16.msra.mxu0 %v9131_v16  ;;  %v9212_v16 = vld [vmem:[#allocation13 + $0x5e0] ss:$8 sps:$4 sm:$0xff]  }
 0xc08   : > { %5042 = vmatprep.subr.bf16.mxu0 %v9139_v60  ;;  %v9220_v60 = vld [vmem:[#allocation13 + $0x5d4] ss:$8 sps:$4 sm:$0xff]  }
 0xc09   : > { %5283 = vmatpush2.bf16.msra.mxu1 %v9134_v5  ;;  %v9215_v5 = vld [vmem:[#allocation13 + $0x4e0] ss:$8 sps:$4 sm:$0xff]  }
 0xc0a   : > { %5284 = vmatprep.subr.bf16.mxu1 %v9142_v13  ;;  %v9223_v13 = vld [vmem:[#allocation13 + $0x4d4] ss:$8 sps:$4 sm:$0xff]  }
 0xc0b   : > { %5043 = vmatpush2.bf16.msra.mxu0 %v9137_v45  ;;  %v9218_v45 = vld [vmem:[#allocation13 + $0x5d0] ss:$8 sps:$4 sm:$0xff]  }
 0xc0c   : > { %5044 = vmatprep.subr.bf16.mxu0 %v9145_v32  ;;  %v9226_v32 = vld [vmem:[#allocation13 + $0x5c4] ss:$8 sps:$4 sm:$0xff]  }
 0xc0d   : > { %5285 = vmatpush2.bf16.msra.mxu1 %v9140_v15  ;;  %v9221_v15 = vld [vmem:[#allocation13 + $0x4d0] ss:$8 sps:$4 sm:$0xff]  }
 0xc0e   : > { %5286 = vmatprep.subr.bf16.mxu1 %v9148_v36  ;;  %v9229_v36 = vld [vmem:[#allocation13 + $0x4c4] ss:$8 sps:$4 sm:$0xff]  }
 0xc0f   : > { %5045 = vmatpush2.bf16.msra.mxu0 %v9143_v10  ;;  %v9224_v10 = vld [vmem:[#allocation13 + $0x5c0] ss:$8 sps:$4 sm:$0xff]  }
 0xc10   : > { %5046 = vmatprep.subr.bf16.mxu0 %v9151_v21  ;;  %v9232_v21 = vld [vmem:[#allocation13 + $0x5b4] ss:$8 sps:$4 sm:$0xff]  }
 0xc11   : > { %5287 = vmatpush2.bf16.msra.mxu1 %v9146_v17  ;;  %v9227_v17 = vld [vmem:[#allocation13 + $0x4c0] ss:$8 sps:$4 sm:$0xff]  }
 0xc12   : > { %5288 = vmatprep.subr.bf16.mxu1 %v9154_v46  ;;  %v9235_v46 = vld [vmem:[#allocation13 + $0x4b4] ss:$8 sps:$4 sm:$0xff]  }
 0xc13   : > { %5047 = vmatpush2.bf16.msra.mxu0 %v9149_v47  ;;  %v9230_v47 = vld [vmem:[#allocation13 + $0x5b0] ss:$8 sps:$4 sm:$0xff]  }
 0xc14   : > { %5048 = vmatprep.subr.bf16.mxu0 %v9157_v19  ;;  %v9238_v19 = vld [vmem:[#allocation13 + $0x5a4] ss:$8 sps:$4 sm:$0xff]  }
 0xc15   : > { %5289 = vmatpush2.bf16.msra.mxu1 %v9152_v49  ;;  %v9233_v49 = vld [vmem:[#allocation13 + $0x4b0] ss:$8 sps:$4 sm:$0xff]  }
 0xc16   : > { %5738 = vmatprep.subr.bf16.mxu1 %v9160_v14  ;;  %v9241_v14 = vld [vmem:[#allocation13 + $0x4a4] ss:$8 sps:$4 sm:$0xff]  }
 0xc17   : > { %5049 = vmatpush2.bf16.msra.mxu0 %v9155_v18  ;;  %v9236_v18 = vld [vmem:[#allocation13 + $0x5a0] ss:$8 sps:$4 sm:$0xff]  }
 0xc18   : > { %5291 = vmatmul.mubr.bf16.vlgmr.msra.gmra.mxu1 %v5094_v22  ;;  %5498 = vmatprep.subr.bf16.mxu0 %v9163_v20  ;;  %v9244_v20 = vld [vmem:[#allocation13 + $0x594] ss:$8 sps:$4 sm:$0xff]  }
 0xc19   : > { %5739 = vmatpush1.bf16.msra.mxu1 %v9158_v62  ;;  %5770 = vmatprep.mubr.bf16.mxu1 %v5575_v53  ;;  %v9239_v62 = vld [vmem:[#allocation13 + $0x4a0] ss:$8 sps:$4 sm:$0xff]   ;;  %v9247_v22 = vld [vmem:[#allocation13 + $0x494] ss:$8 sps:$4 sm:$0xff]   ;;  %v9250_v53 = vld [vmem:[#allocation13 + $0x584] ss:$8 sps:$4 sm:$0xff]  }
 0xc1a   : > { %5051 = vmatmul.mubr.bf16.vlgmr.msra.gmra.mxu0 %v4854_v1  ;;  %5740 = vmatprep.subr.bf16.mxu1 %v9166_v2  ;;  %v9242_v2 = vld [vmem:[#allocation13 + $0x590] ss:$8 sps:$4 sm:$0xff]   ;;  %v9253_v1 = vld [vmem:[#allocation13 + $0x484] ss:$8 sps:$4 sm:$0xff]  }
 0xc1b   : > { %5499 = vmatpush1.bf16.msra.mxu0 %v9161_v24  ;;  %5530 = vmatprep.mubr.bf16.mxu0 %v5335_v3  ;;  %v9245_v24 = vld [vmem:[#allocation13 + $0x490] ss:$8 sps:$4 sm:$0xff]   ;;  %v9256_v3 = vld [vmem:[#allocation13 + $0x774] ss:$8 sps:$4 sm:$0xff]  }
 0xc1c   : > { %5500 = vmatprep.subr.bf16.mxu0 %v9169_v27  ;;  %v9248_v27 = vld [vmem:[#allocation13 + $0x580] ss:$8 sps:$4 sm:$0xff]  }
 0xc1d   : > { %5741 = vmatpush1.bf16.msra.mxu1 %v9164_v12  ;;  %v9251_v12 = vld [vmem:[#allocation13 + $0x480] ss:$8 sps:$4 sm:$0xff]  }
 0xc1e   : > { %5742 = vmatprep.subr.bf16.mxu1 %v9172_v23  ;;  %v9259_v23 = vld [vmem:[#allocation13 + $0x674] ss:$8 sps:$4 sm:$0xff]  }
 0xc1f   : > { %5501 = vmatpush1.bf16.msra.mxu0 %v9167_v48  ;;  %v9254_v48 = vld [vmem:[#allocation13 + $0x770] ss:$8 sps:$4 sm:$0xff]  }
 0xc20   : > { %5502 = vmatprep.subr.bf16.mxu0 %v9175_v7  ;;  %v5574_v7 = vrot.slane %v10690_v9, 2 }
 0xc21   : > { %5743 = vmatpush1.bf16.msra.mxu1 %v9170_v59  ;;  %v9262_v59 = vld [vmem:[#allocation13 + $0x764] ss:$8 sps:$4 sm:$0xff]  }
 0xc22   : > { %5744 = vmatprep.subr.bf16.mxu1 %v9178_v50  ;;  %v6055_v50 = vrot.slane %v10686_v28, 3  ;;  %v9266_v28 = vld [vmem:[#allocation13 + $0x750] ss:$8 sps:$4 sm:$0xff]  }
 0xc23   : > { %5503 = vmatpush1.bf16.msra.mxu0 %v9173_v43  ;;  %v9257_v43 = vld [vmem:[#allocation13 + $0x670] ss:$8 sps:$4 sm:$0xff]  }
 0xc24   : > { %5504 = vmatprep.subr.bf16.mxu0 %v9181_v57  ;;  %v5334_v57 = vrot.slane %v10680_v34, 2 }
 0xc25   : > { %5745 = vmatpush1.bf16.msra.mxu1 %v9176_v0  ;;  %v9265_v0 = vld [vmem:[#allocation13 + $0x664] ss:$8 sps:$4 sm:$0xff]  }
 0xc26   : > { %5746 = vmatprep.subr.bf16.mxu1 %v9184_v31  ;;  %v5815_v31 = vrot.slane %v10682_v38, 3 }
 0xc27   : > { %5505 = vmatpush1.bf16.msra.mxu0 %v9179_v30  ;;  %v9260_v30 = vld [vmem:[#allocation13 + $0x760] ss:$8 sps:$4 sm:$0xff]  }
 0xc28   : > { %5506 = vmatprep.subr.bf16.mxu0 %v9187_v63  ;;  %v9268_v63 = vld [vmem:[#allocation13 + $0x754] ss:$8 sps:$4 sm:$0xff]  }
 0xc29   : > { %5747 = vmatpush1.bf16.msra.mxu1 %v9182_v51  ;;  %v9263_v51 = vld [vmem:[#allocation13 + $0x660] ss:$8 sps:$4 sm:$0xff]  }
 0xc2a   : > { %5748 = vmatprep.subr.bf16.mxu1 %v9190_v52  ;;  %v9271_v52 = vld [vmem:[#allocation13 + $0x654] ss:$8 sps:$4 sm:$0xff]  }
 0xc2b   : > { %5507 = vmatpush1.bf16.msra.mxu0 %v9185_v4  ;;  %v9274_v4 = vld [vmem:[#allocation13 + $0x744] ss:$8 sps:$4 sm:$0xff]  }
 0xc2c   : > { %5508 = vmatprep.subr.bf16.mxu0 %v9193_v55  ;;  %v9269_v55 = vld [vmem:[#allocation13 + $0x650] ss:$8 sps:$4 sm:$0xff]  }
 0xc2d   : > { %5749 = vmatpush1.bf16.msra.mxu1 %v9188_v56  ;;  %v9277_v56 = vld [vmem:[#allocation13 + $0x644] ss:$8 sps:$4 sm:$0xff]  }
 0xc2e   : > { %5750 = vmatprep.subr.bf16.mxu1 %v9196_v8  ;;  %v9272_v8 = vld [vmem:[#allocation13 + $0x740] ss:$8 sps:$4 sm:$0xff]  }
 0xc2f   : > { %5509 = vmatpush1.bf16.msra.mxu0 %v9191_v61  ;;  %v9280_v61 = vld [vmem:[#allocation13 + $0x734] ss:$8 sps:$4 sm:$0xff]  }
 0xc30   : > { %5510 = vmatprep.subr.bf16.mxu0 %v9199_v25  ;;  %v9275_v25 = vld [vmem:[#allocation13 + $0x640] ss:$8 sps:$4 sm:$0xff]  }
 0xc31   : > { %5751 = vmatpush1.bf16.msra.mxu1 %v9194_v6  ;;  %v9283_v6 = vld [vmem:[#allocation13 + $0x634] ss:$8 sps:$4 sm:$0xff]  }
 0xc32   : > { %5752 = vmatprep.subr.bf16.mxu1 %v9202_v11  ;;  %v9278_v11 = vld [vmem:[#allocation13 + $0x730] ss:$8 sps:$4 sm:$0xff]  }
 0xc33   : > { %5511 = vmatpush1.bf16.msra.mxu0 %v9197_v26  ;;  %v9286_v26 = vld [vmem:[#allocation13 + $0x724] ss:$8 sps:$4 sm:$0xff]  }
 0xc34   : > { %5512 = vmatprep.subr.bf16.mxu0 %v9205_v37  ;;  %v9281_v37 = vld [vmem:[#allocation13 + $0x630] ss:$8 sps:$4 sm:$0xff]  }
 0xc35   : > { %5753 = vmatpush1.bf16.msra.mxu1 %v9200_v41  ;;  %v9289_v41 = vld [vmem:[#allocation13 + $0x624] ss:$8 sps:$4 sm:$0xff]  }
 0xc36   : > { %5754 = vmatprep.subr.bf16.mxu1 %v9208_v42  ;;  %v9284_v42 = vld [vmem:[#allocation13 + $0x720] ss:$8 sps:$4 sm:$0xff]  }
 0xc37   : > { %5513 = vmatpush1.bf16.msra.mxu0 %v9203_v35  ;;  %v9292_v35 = vld [vmem:[#allocation13 + $0x714] ss:$8 sps:$4 sm:$0xff]  }
 0xc38   : > { %5514 = vmatprep.subr.bf16.mxu0 %v9211_v39  ;;  %v9287_v39 = vld [vmem:[#allocation13 + $0x620] ss:$8 sps:$4 sm:$0xff]  }
 0xc39   : > { %5755 = vmatpush2.bf16.msra.mxu1 %v9206_v44  ;;  %v9295_v44 = vld [vmem:[#allocation13 + $0x614] ss:$8 sps:$4 sm:$0xff]  }
 0xc3a   : > { %5756 = vmatprep.subr.bf16.mxu1 %v9214_v29  ;;  %v9290_v29 = vld [vmem:[#allocation13 + $0x710] ss:$8 sps:$4 sm:$0xff]  }
 0xc3b   : > { %5515 = vmatpush2.bf16.msra.mxu0 %v9209_v33  ;;  %v9298_v33 = vld [vmem:[#allocation13 + $0x704] ss:$8 sps:$4 sm:$0xff]  }
 0xc3c   : > { %5516 = vmatprep.subr.bf16.mxu0 %v9217_v40  ;;  %v9293_v40 = vld [vmem:[#allocation13 + $0x610] ss:$8 sps:$4 sm:$0xff]  }
 0xc3d   : > { %5757 = vmatpush2.bf16.msra.mxu1 %v9212_v16  ;;  %v9301_v16 = vld [vmem:[#allocation13 + $0x604] ss:$8 sps:$4 sm:$0xff]  }
 0xc3e   : > { %5758 = vmatprep.subr.bf16.mxu1 %v9220_v60  ;;  %v9296_v60 = vld [vmem:[#allocation13 + $0x700] ss:$8 sps:$4 sm:$0xff]  }
 0xc3f   : > { %5517 = vmatpush2.bf16.msra.mxu0 %v9215_v5  ;;  %v9304_v5 = vld [vmem:[#allocation13 + $0x7f4] ss:$8 sps:$4 sm:$0xff]  }
 0xc40   : > { %5518 = vmatprep.subr.bf16.mxu0 %v9223_v13  ;;  %v9299_v13 = vld [vmem:[#allocation13 + $0x600] ss:$8 sps:$4 sm:$0xff]  }
 0xc41   : > { %5759 = vmatpush2.bf16.msra.mxu1 %v9218_v45  ;;  %v9307_v45 = vld [vmem:[#allocation13 + $0x6f4] ss:$8 sps:$4 sm:$0xff]  }
 0xc42   : > { %5760 = vmatprep.subr.bf16.mxu1 %v9226_v32  ;;  %v9302_v32 = vld [vmem:[#allocation13 + $0x7f0] ss:$8 sps:$4 sm:$0xff]  }
 0xc43   : > { %5519 = vmatpush2.bf16.msra.mxu0 %v9221_v15  ;;  %v9310_v15 = vld [vmem:[#allocation13 + $0x7e4] ss:$8 sps:$4 sm:$0xff]  }
 0xc44   : > { %5520 = vmatprep.subr.bf16.mxu0 %v9229_v36  ;;  %v9305_v36 = vld [vmem:[#allocation13 + $0x6f0] ss:$8 sps:$4 sm:$0xff]  }
 0xc45   : > { %5761 = vmatpush2.bf16.msra.mxu1 %v9224_v10  ;;  %v9313_v10 = vld [vmem:[#allocation13 + $0x6e4] ss:$8 sps:$4 sm:$0xff]  }
 0xc46   : > { %5762 = vmatprep.subr.bf16.mxu1 %v9232_v21  ;;  %v9308_v21 = vld [vmem:[#allocation13 + $0x7e0] ss:$8 sps:$4 sm:$0xff]  }
 0xc47   : > { %5521 = vmatpush2.bf16.msra.mxu0 %v9227_v17  ;;  %v9316_v17 = vld [vmem:[#allocation13 + $0x7d4] ss:$8 sps:$4 sm:$0xff]  }
 0xc48   : > { %5522 = vmatprep.subr.bf16.mxu0 %v9235_v46  ;;  %v9311_v46 = vld [vmem:[#allocation13 + $0x6e0] ss:$8 sps:$4 sm:$0xff]  }
 0xc49   : > { %5763 = vmatpush2.bf16.msra.mxu1 %v9230_v47  ;;  %v9319_v47 = vld [vmem:[#allocation13 + $0x6d4] ss:$8 sps:$4 sm:$0xff]  }
 0xc4a   : > { %5764 = vmatprep.subr.bf16.mxu1 %v9238_v19  ;;  %v9314_v19 = vld [vmem:[#allocation13 + $0x7d0] ss:$8 sps:$4 sm:$0xff]  }
 0xc4b   : > { %5523 = vmatpush2.bf16.msra.mxu0 %v9233_v49  ;;  %v9322_v49 = vld [vmem:[#allocation13 + $0x7c4] ss:$8 sps:$4 sm:$0xff]  }
 0xc4c   : > { %5524 = vmatprep.subr.bf16.mxu0 %v9241_v14  ;;  %v9317_v14 = vld [vmem:[#allocation13 + $0x6d0] ss:$8 sps:$4 sm:$0xff]  }
 0xc4d   : > { %5765 = vmatpush2.bf16.msra.mxu1 %v9236_v18  ;;  %v9325_v18 = vld [vmem:[#allocation13 + $0x6c4] ss:$8 sps:$4 sm:$0xff]  }
 0xc4e   : > { %5766 = vmatprep.subr.bf16.mxu1 %v9244_v20  ;;  %v9320_v20 = vld [vmem:[#allocation13 + $0x7c0] ss:$8 sps:$4 sm:$0xff]  }
 0xc4f   : > { %5525 = vmatpush2.bf16.msra.mxu0 %v9239_v62  ;;  %v9328_v62 = vld [vmem:[#allocation13 + $0x7b4] ss:$8 sps:$4 sm:$0xff]  }
 0xc50   : > { %5526 = vmatprep.subr.bf16.mxu0 %v9247_v22  ;;  %v9323_v22 = vld [vmem:[#allocation13 + $0x6c0] ss:$8 sps:$4 sm:$0xff]  }
 0xc51   : > { %5767 = vmatpush2.bf16.msra.mxu1 %v9242_v2  ;;  %v9331_v2 = vld [vmem:[#allocation13 + $0x6b4] ss:$8 sps:$4 sm:$0xff]  }
 0xc52   : > { %5768 = vmatprep.subr.bf16.mxu1 %v9250_v53  ;;  %v9326_v53 = vld [vmem:[#allocation13 + $0x7b0] ss:$8 sps:$4 sm:$0xff]  }
 0xc53   : > { %5527 = vmatpush2.bf16.msra.mxu0 %v9245_v24  ;;  %v9334_v24 = vld [vmem:[#allocation13 + $0x7a4] ss:$8 sps:$4 sm:$0xff]  }
 0xc54   : > { %5528 = vmatprep.subr.bf16.mxu0 %v9253_v1  ;;  %v9329_v1 = vld [vmem:[#allocation13 + $0x6b0] ss:$8 sps:$4 sm:$0xff]  }
 0xc55   : > { %5769 = vmatpush2.bf16.msra.mxu1 %v9248_v27  ;;  %v9337_v27 = vld [vmem:[#allocation13 + $0x6a4] ss:$8 sps:$4 sm:$0xff]  }
 0xc56   : > { %6218 = vmatprep.subr.bf16.mxu1 %v9256_v3  ;;  %v9332_v3 = vld [vmem:[#allocation13 + $0x7a0] ss:$8 sps:$4 sm:$0xff]  }
 0xc57   : > { %5529 = vmatpush2.bf16.msra.mxu0 %v9251_v12  ;;  %v9340_v12 = vld [vmem:[#allocation13 + $0x794] ss:$8 sps:$4 sm:$0xff]  }
 0xc58   : > { %5771 = vmatmul.mubr.bf16.vlgmr.msra.gmra.mxu1 %v5574_v7  ;;  %5978 = vmatprep.subr.bf16.mxu0 %v9259_v23  ;;  %v9335_v23 = vld [vmem:[#allocation13 + $0x6a0] ss:$8 sps:$4 sm:$0xff]   ;;  %v9338_v7 = vld [vmem:[#allocation13 + $0x790] ss:$8 sps:$4 sm:$0xff]  }
 0xc59   : > { %6219 = vmatpush1.bf16.msra.mxu1 %v9254_v48  ;;  %6250 = vmatprep.mubr.bf16.mxu1 %v6055_v50  ;;  %v9343_v48 = vld [vmem:[#allocation13 + $0x694] ss:$8 sps:$4 sm:$0xff]   ;;  %v9341_v50 = vld [vmem:[#allocation13 + $0x690] ss:$8 sps:$4 sm:$0xff]  }
 0xc5a   : > { %5531 = vmatmul.mubr.bf16.vlgmr.msra.gmra.mxu0 %v5334_v57  ;;  %6220 = vmatprep.subr.bf16.mxu1 %v9262_v59  ;;  %v9346_v59 = vld [vmem:[#allocation13 + $0x784] ss:$8 sps:$4 sm:$0xff]   ;;  %v9344_v57 = vld [vmem:[#allocation13 + $0x780] ss:$8 sps:$4 sm:$0xff]  }
 0xc5b   : > { %5979 = vmatpush1.bf16.msra.mxu0 %v9257_v43  ;;  %6010 = vmatprep.mubr.bf16.mxu0 %v5815_v31  ;;  %v9349_v43 = vld [vmem:[#allocation13 + $0x684] ss:$8 sps:$4 sm:$0xff]   ;;  %v9352_v31 = vld [vmem:[#allocation13 + $0x874] ss:$8 sps:$4 sm:$0xff]  }
 0xc5c   : > { %5980 = vmatprep.subr.bf16.mxu0 %v9265_v0  ;;  %v9347_v0 = vld [vmem:[#allocation13 + $0x680] ss:$8 sps:$4 sm:$0xff]  }
 0xc5d   : > { %6221 = vmatpush1.bf16.msra.mxu1 %v9260_v30  ;;  %v6054_v30 = vrot.slane %v10690_v9, 3 }
 0xc5e   : > { %6222 = vmatprep.subr.bf16.mxu1 %v9268_v63  ;;  %v9350_v63 = vld [vmem:[#allocation13 + $0x870] ss:$8 sps:$4 sm:$0xff]  }
 0xc5f   : > { %5981 = vmatpush1.bf16.msra.mxu0 %v9263_v51 }
 0xc60   : > { %5982 = vmatprep.subr.bf16.mxu0 %v9271_v52  ;;  %v5814_v52 = vrot.slane %v10680_v34, 3 }
 0xc61   : > { %6223 = vmatpush1.bf16.msra.mxu1 %v9266_v28  ;;  %v9355_v28 = vld [vmem:[#allocation13 + $0x864] ss:$8 sps:$4 sm:$0xff]  }
 0xc62   : > { %6224 = vmatprep.subr.bf16.mxu1 %v9274_v4  ;;  %v6295_v4 = vrot.slane %v10682_v38, 4  ;;  %v9361_v38 = vld [vmem:[#allocation13 + $0x844] ss:$8 sps:$4 sm:$0xff]  }
 0xc63   : > { %5983 = vmatpush1.bf16.msra.mxu0 %v9269_v55 }
 0xc64   : > { %5984 = vmatprep.subr.bf16.mxu0 %v9277_v56 }
 0xc65   : > { %6225 = vmatpush1.bf16.msra.mxu1 %v9272_v8 }
 0xc66   : > { %6226 = vmatprep.subr.bf16.mxu1 %v9280_v61  ;;  %v9353_v61 = vld [vmem:[#allocation13 + $0x860] ss:$8 sps:$4 sm:$0xff]  }
 0xc67   : > { %5985 = vmatpush1.bf16.msra.mxu0 %v9275_v25 }
 0xc68   : > { %5986 = vmatprep.subr.bf16.mxu0 %v9283_v6  ;;  %v9358_v6 = vld [vmem:[#allocation13 + $0x854] ss:$8 sps:$4 sm:$0xff]  }
 0xc69   : > { %6227 = vmatpush1.bf16.msra.mxu1 %v9278_v11 }
 0xc6a   : > { %6228 = vmatprep.subr.bf16.mxu1 %v9286_v26 }
 0xc6b   : > { %5987 = vmatpush1.bf16.msra.mxu0 %v9281_v37 }
 0xc6c   : > { %5988 = vmatprep.subr.bf16.mxu0 %v9289_v41  ;;  %v9356_v41 = vld [vmem:[#allocation13 + $0x850] ss:$8 sps:$4 sm:$0xff]  }
 0xc6d   : > { %6229 = vmatpush1.bf16.msra.mxu1 %v9284_v42 }
 0xc6e   : > { %6230 = vmatprep.subr.bf16.mxu1 %v9292_v35  ;;  %v9359_v35 = vld [vmem:[#allocation13 + $0x840] ss:$8 sps:$4 sm:$0xff]  }
 0xc6f   : > { %5989 = vmatpush1.bf16.msra.mxu0 %v9287_v39  ;;  %v9364_v39 = vld [vmem:[#allocation13 + $0x834] ss:$8 sps:$4 sm:$0xff]  }
 0xc70   : > { %5990 = vmatprep.subr.bf16.mxu0 %v9295_v44  ;;  %v9362_v44 = vld [vmem:[#allocation13 + $0x830] ss:$8 sps:$4 sm:$0xff]  }
 0xc71   : > { %6231 = vmatpush1.bf16.msra.mxu1 %v9290_v29  ;;  %v9367_v29 = vld [vmem:[#allocation13 + $0x824] ss:$8 sps:$4 sm:$0xff]  }
 0xc72   : > { %6232 = vmatprep.subr.bf16.mxu1 %v9298_v33  ;;  %v9365_v33 = vld [vmem:[#allocation13 + $0x820] ss:$8 sps:$4 sm:$0xff]  }
 0xc73   : > { %5991 = vmatpush1.bf16.msra.mxu0 %v9293_v40  ;;  %v9370_v40 = vld [vmem:[#allocation13 + $0x814] ss:$8 sps:$4 sm:$0xff]  }
 0xc74   : > { %5992 = vmatprep.subr.bf16.mxu0 %v9301_v16  ;;  %v9368_v16 = vld [vmem:[#allocation13 + $0x810] ss:$8 sps:$4 sm:$0xff]  }
 0xc75   : > { %6233 = vmatpush1.bf16.msra.mxu1 %v9296_v60  ;;  %v9373_v60 = vld [vmem:[#allocation13 + $0x804] ss:$8 sps:$4 sm:$0xff]  }
 0xc76   : > { %6234 = vmatprep.subr.bf16.mxu1 %v9304_v5  ;;  %v9371_v5 = vld [vmem:[#allocation13 + $0x800] ss:$8 sps:$4 sm:$0xff]  }
 0xc77   : > { %5993 = vmatpush1.bf16.msra.mxu0 %v9299_v13  ;;  %v9376_v13 = vld [vmem:[#allocation13 + $0x8f4] ss:$8 sps:$4 sm:$0xff]  }
 0xc78   : > { %5994 = vmatprep.subr.bf16.mxu0 %v9307_v45  ;;  %v9374_v45 = vld [vmem:[#allocation13 + $0x8f0] ss:$8 sps:$4 sm:$0xff]  }
 0xc79   : > { %6235 = vmatpush2.bf16.msra.mxu1 %v9302_v32  ;;  %v9379_v32 = vld [vmem:[#allocation13 + $0x8e4] ss:$8 sps:$4 sm:$0xff]  }
 0xc7a   : > { %6236 = vmatprep.subr.bf16.mxu1 %v9310_v15  ;;  %v9377_v15 = vld [vmem:[#allocation13 + $0x8e0] ss:$8 sps:$4 sm:$0xff]  }
 0xc7b   : > { %5995 = vmatpush2.bf16.msra.mxu0 %v9305_v36  ;;  %v9382_v36 = vld [vmem:[#allocation13 + $0x8d4] ss:$8 sps:$4 sm:$0xff]  }
 0xc7c   : > { %5996 = vmatprep.subr.bf16.mxu0 %v9313_v10  ;;  %v9380_v10 = vld [vmem:[#allocation13 + $0x8d0] ss:$8 sps:$4 sm:$0xff]  }
 0xc7d   : > { %6237 = vmatpush2.bf16.msra.mxu1 %v9308_v21  ;;  %v9385_v21 = vld [vmem:[#allocation13 + $0x8c4] ss:$8 sps:$4 sm:$0xff]  }
 0xc7e   : > { %6238 = vmatprep.subr.bf16.mxu1 %v9316_v17  ;;  %v9383_v17 = vld [vmem:[#allocation13 + $0x8c0] ss:$8 sps:$4 sm:$0xff]  }
 0xc7f   : > { %5997 = vmatpush2.bf16.msra.mxu0 %v9311_v46  ;;  %v9388_v46 = vld [vmem:[#allocation13 + $0x8b4] ss:$8 sps:$4 sm:$0xff]  }
 0xc80   : > { %5998 = vmatprep.subr.bf16.mxu0 %v9319_v47  ;;  %v9386_v47 = vld [vmem:[#allocation13 + $0x8b0] ss:$8 sps:$4 sm:$0xff]  }
 0xc81   : > { %6239 = vmatpush2.bf16.msra.mxu1 %v9314_v19  ;;  %v9391_v19 = vld [vmem:[#allocation13 + $0x8a4] ss:$8 sps:$4 sm:$0xff]  }
 0xc82   : > { %6240 = vmatprep.subr.bf16.mxu1 %v9322_v49  ;;  %v9389_v49 = vld [vmem:[#allocation13 + $0x8a0] ss:$8 sps:$4 sm:$0xff]  }
 0xc83   : > { %5999 = vmatpush2.bf16.msra.mxu0 %v9317_v14  ;;  %v9394_v14 = vld [vmem:[#allocation13 + $0x894] ss:$8 sps:$4 sm:$0xff]  }
 0xc84   : > { %6000 = vmatprep.subr.bf16.mxu0 %v9325_v18  ;;  %v9392_v18 = vld [vmem:[#allocation13 + $0x890] ss:$8 sps:$4 sm:$0xff]  }
 0xc85   : > { %6241 = vmatpush2.bf16.msra.mxu1 %v9320_v20  ;;  %v9397_v20 = vld [vmem:[#allocation13 + $0x884] ss:$8 sps:$4 sm:$0xff]  }
 0xc86   : > { %6242 = vmatprep.subr.bf16.mxu1 %v9328_v62  ;;  %v9395_v62 = vld [vmem:[#allocation13 + $0x880] ss:$8 sps:$4 sm:$0xff]  }
 0xc87   : > { %6001 = vmatpush2.bf16.msra.mxu0 %v9323_v22 }
 0xc88   : > { %6002 = vmatprep.subr.bf16.mxu0 %v9331_v2  ;;  %v6294_v2 = vrot.slane %v10680_v34, 4  ;;  %v9401_v34 = vld [vmem:[#allocation16 + $0x60] ss:$8 sps:$4 sm:$0xff]  }
 0xc89   : > { %6243 = vmatpush2.bf16.msra.mxu1 %v9326_v53 }
 0xc8a   : > { %6244 = vmatprep.subr.bf16.mxu1 %v9334_v24 }
 0xc8b   : > { %6003 = vmatpush2.bf16.msra.mxu0 %v9329_v1 }
 0xc8c   : > { %6004 = vmatprep.subr.bf16.mxu0 %v9337_v27 }
 0xc8d   : > { %6245 = vmatpush2.bf16.msra.mxu1 %v9332_v3 }
 0xc8e   : > { %6246 = vmatprep.subr.bf16.mxu1 %v9340_v12 }
 0xc8f   : > { %6005 = vmatpush2.bf16.msra.mxu0 %v9335_v23 }
 0xc90   : > { %6006 = vmatprep.subr.bf16.mxu0 %v9343_v48 }
 0xc91   : > { %6247 = vmatpush2.bf16.msra.mxu1 %v9338_v7 }
 0xc92   : > { %6248 = vmatprep.subr.bf16.mxu1 %v9346_v59 }
 0xc93   : > { %6007 = vmatpush2.bf16.msra.mxu0 %v9341_v50 }
 0xc94   : > { %6008 = vmatprep.subr.bf16.mxu0 %v9349_v43  ;;  %v9398_v43 = vld [vmem:[#allocation16 + $0x70] ss:$8 sps:$4 sm:$0xff]  }
 0xc95   : > { %6249 = vmatpush2.bf16.msra.mxu1 %v9344_v57  ;;  %v9400_v57 = vld [vmem:[#allocation16 + $0x74] ss:$8 sps:$4 sm:$0xff]  }
 0xc96   : > { %6723 = vmatprep.subr.bf16.mxu1 %v9400_v57 }
 0xc97   : > { %6009 = vmatpush2.bf16.msra.mxu0 %v9347_v0  ;;  %v9403_v0 = vld [vmem:[#allocation16 + $0x64] ss:$8 sps:$4 sm:$0xff]  }
 0xc98   : > { %6251 = vmatmul.mubr.bf16.vlgmr.msra.gmra.mxu1 %v6054_v30  ;;  %v4812_v51 = vpop.f32.mrf.mxu1  ;;  %6458 = vmatprep.subr.bf16.mxu0 %v9352_v31  ;;  %v9406_v31 = vld [vmem:[#allocation16 + $0x54] ss:$8 sps:$4 sm:$0xff]   ;;  %v9404_v30 = vld [vmem:[#allocation16 + $0x50] ss:$8 sps:$4 sm:$0xff]  }
 0xc99   : > { %6724 = vmatpush1.bf16.msra.mxu1 %v9398_v43 }
 0xc9a   : > { %6011 = vmatmul.mubr.bf16.vlgmr.msra.gmra.mxu0 %v5814_v52  ;;  %v4611_v55 = vpop.f32.mrf.mxu0  ;;  %v4814_v56 = vpop.f32.mrf.mxu1  ;;  %6725 = vmatprep.subr.bf16.mxu1 %v9403_v0  ;;  %v9412_v52 = vld [vmem:[#allocation16 + $0x34] ss:$8 sps:$4 sm:$0xff]  }
 0xc9b   : > { %v10707_v8 = vadd.f32 %v4812_v51, %v4611_v55  ;;  %6459 = vmatpush1.bf16.msra.mxu0 %v9350_v63  ;;  %6490 = vmatprep.mubr.bf16.mxu0 %v6295_v4  ;;  %v9409_v63 = vld [vmem:[#allocation16 + $0x44] ss:$8 sps:$4 sm:$0xff]   ;;  %v9407_v51 = vld [vmem:[#allocation16 + $0x40] ss:$8 sps:$4 sm:$0xff]  }
 0xc9c   : > { %v4613_v25 = vpop.f32.mrf.mxu0  ;;  %v4816_v9 = vpop.f32.mrf.mxu1  ;;  %6460 = vmatprep.subr.bf16.mxu0 %v9355_v28  ;;  %v9410_v28 = vld [vmem:[#allocation16 + $0x30] ss:$8 sps:$4 sm:$0xff]   ;;  %v9415_v4 = vld [vmem:[#allocation16 + $0x24] ss:$8 sps:$4 sm:$0xff]   ;;  %v9413_v55 = vld [vmem:[#allocation16 + $0x20] ss:$8 sps:$4 sm:$0xff]  }
 0xc9d   : > { %v10709_v11 = vadd.f32 %v4814_v56, %v4613_v25  ;;  %6726 = vmatpush1.bf16.msra.mxu1 %v9401_v34  ;;  %v9418_v56 = vld [vmem:[#allocation16 + $0x14] ss:$8 sps:$4 sm:$0xff]   ;;  %v9419_v25 = vld [vmem:[#allocation16] ss:$8 sps:$4 sm:$0xff]  }
 0xc9e   : > { %v4615_v26 = vpop.f32.mrf.mxu0  ;;  %v4817_v37 = vpop.f32.mrf.mxu1  ;;  %6727 = vmatprep.subr.bf16.mxu1 %v9406_v31  ;;  %v9424_v9 = vld [vmem:[#allocation16 + $0xf4] ss:$8 sps:$4 sm:$0xff]  }
 0xc9f   : > { %6461 = vmatpush1.bf16.msra.mxu0 %v9353_v61  ;;  %v9421_v61 = vld [vmem:[#allocation16 + $0x4] ss:$8 sps:$4 sm:$0xff]   ;;  %v9425_v26 = vld [vmem:[#allocation16 + $0xe0] ss:$8 sps:$4 sm:$0xff]   ;;  %v9430_v37 = vld [vmem:[#allocation16 + $0xd4] ss:$8 sps:$4 sm:$0xff]  }
 0xca0   : > { %v4616_v42 = vpop.f32.mrf.mxu0  ;;  %6462 = vmatprep.subr.bf16.mxu0 %v9358_v6  ;;  %v9422_v6 = vld [vmem:[#allocation16 + $0xf0] ss:$8 sps:$4 sm:$0xff]  }
 0xca1   : > { %6728 = vmatpush1.bf16.msra.mxu1 %v9404_v30  ;;  %v9433_v42 = vld [vmem:[#allocation16 + $0xc4] ss:$8 sps:$4 sm:$0xff]  }
 0xca2   : > { %6729 = vmatprep.subr.bf16.mxu1 %v9409_v63  ;;  %v6501_v63 = vld [vmem:[#allocation14] sm:$0x3] }
 0xca3   : > { %6463 = vmatpush1.bf16.msra.mxu0 %v9356_v41  ;;  %v9428_v41 = vld [vmem:[#allocation16 + $0xd0] ss:$8 sps:$4 sm:$0xff]  }
 0xca4   : > { %6464 = vmatprep.subr.bf16.mxu0 %v9361_v38  ;;  %v9431_v38 = vld [vmem:[#allocation16 + $0xc0] ss:$8 sps:$4 sm:$0xff]  }
 0xca5   : > { %6730 = vmatpush1.bf16.msra.mxu1 %v9407_v51  ;;  %v6506_v51 = vrot.slane %v6501_v63, %v10670_v58 }
 0xca6   : > { %6731 = vmatprep.subr.bf16.mxu1 %v9412_v52 }
 0xca7   : > { %6465 = vmatpush1.bf16.msra.mxu0 %v9359_v35  ;;  %v9436_v35 = vld [vmem:[#allocation16 + $0xb4] ss:$8 sps:$4 sm:$0xff]  }
 0xca8   : > { %6466 = vmatprep.subr.bf16.mxu0 %v9364_v39  ;;  %v9434_v39 = vld [vmem:[#allocation16 + $0xb0] ss:$8 sps:$4 sm:$0xff]  }
 0xca9   : > { %6732 = vmatpush1.bf16.msra.mxu1 %v9410_v28 }
 0xcaa   : > { %6733 = vmatprep.subr.bf16.mxu1 %v9415_v4  ;;  %v6510_v4 = vrot.slane %v6501_v63, %v10673_v54 }
 0xcab   : > { %6467 = vmatpush1.bf16.msra.mxu0 %v9362_v44 }
 0xcac   : > { %6468 = vmatprep.subr.bf16.mxu0 %v9367_v29  ;;  %v9439_v29 = vld [vmem:[#allocation16 + $0xa4] ss:$8 sps:$4 sm:$0xff]  }
 0xcad   : > { %6734 = vmatpush1.bf16.msra.mxu1 %v9413_v55 }
 0xcae   : > { %6735 = vmatprep.subr.bf16.mxu1 %v9418_v56 }
 0xcaf   : > { %6469 = vmatpush1.bf16.msra.mxu0 %v9365_v33  ;;  %v9437_v33 = vld [vmem:[#allocation16 + $0xa0] ss:$8 sps:$4 sm:$0xff]  }
 0xcb0   : > { %6470 = vmatprep.subr.bf16.mxu0 %v9370_v40 }
 0xcb3   : > { %6471 = vmatpush1.bf16.msra.mxu0 %v9368_v16 }
 0xcb4   : > { %6472 = vmatprep.subr.bf16.mxu0 %v9373_v60 }
 0xcb7   : > { %6473 = vmatpush1.bf16.msra.mxu0 %v9371_v5 }
 0xcb8   : > { %6474 = vmatprep.subr.bf16.mxu0 %v9376_v13 }
 0xcbb   : > { %6475 = vmatpush2.bf16.msra.mxu0 %v9374_v45  ;;  %v9442_v45 = vld [vmem:[#allocation16 + $0x94] ss:$8 sps:$4 sm:$0xff]  }
 0xcbc   : > { %6476 = vmatprep.subr.bf16.mxu0 %v9379_v32 }
 0xcbf   : > { %6477 = vmatpush2.bf16.msra.mxu0 %v9377_v15 }
 0xcc0   : > { %6478 = vmatprep.subr.bf16.mxu0 %v9382_v36  ;;  %v9440_v36 = vld [vmem:[#allocation16 + $0x90] ss:$8 sps:$4 sm:$0xff]  }
 0xcc3   : > { %6479 = vmatpush2.bf16.msra.mxu0 %v9380_v10 }
 0xcc4   : > { %6480 = vmatprep.subr.bf16.mxu0 %v9385_v21 }
 0xcc7   : > { %6481 = vmatpush2.bf16.msra.mxu0 %v9383_v17 }
 0xcc8   : > { %6482 = vmatprep.subr.bf16.mxu0 %v9388_v46 }
 0xccb   : > { %6483 = vmatpush2.bf16.msra.mxu0 %v9386_v47  ;;  %v9445_v47 = vld [vmem:[#allocation16 + $0x84] ss:$8 sps:$4 sm:$0xff]  }
 0xccc   : > { %6484 = vmatprep.subr.bf16.mxu0 %v9391_v19  ;;  %v9443_v19 = vld [vmem:[#allocation16 + $0x80] ss:$8 sps:$4 sm:$0xff]  }
 0xccf   : > { %6485 = vmatpush2.bf16.msra.mxu0 %v9389_v49  ;;  %v9446_v49 = vld [vmem:[#allocation19 + $0x78] sm:$0xff]  }
 0xcd0   : > { %6486 = vmatprep.subr.bf16.mxu0 %v9394_v14  ;;  %v9447_v14 = vld [vmem:[#allocation19 + $0x38] sm:$0xff]  }
 0xcd3   : > { %6487 = vmatpush2.bf16.msra.mxu0 %v9392_v18  ;;  %v9448_v18 = vld [vmem:[#allocation19 + $0x70] sm:$0xff]  }
 0xcd4   : > { %6488 = vmatprep.subr.bf16.mxu0 %v9397_v20  ;;  %v9449_v20 = vld [vmem:[#allocation19 + $0x30] sm:$0xff]  }
 0xcd7   : > { %6489 = vmatpush2.bf16.msra.mxu0 %v9395_v62  ;;  %v9450_v62 = vld [vmem:[#allocation19 + $0x68] sm:$0xff]  }
 0xcd8   : > { %v5292_v22 = vpop.f32.mrf.mxu1  ;;  %8230 = vmatprep.subr.bf16.mxu0 %v9446_v49 }
 0xcda   : > { %v5052_v53 = vpop.f32.mrf.mxu0  ;;  %v5294_v24 = vpop.f32.mrf.mxu1  ;;  %6491 = vmatmul.mubr.bf16.vlgmr.msra.gmra.mxu0 %v6294_v2  ;;  %v9452_v2 = vld [vmem:[#allocation19 + $0x60] sm:$0xff]  }
 0xcdb   : > { %v5059_v1 = vadd.f32 %v5052_v53, %v10707_v8  ;;  %v9416_v8 = vld [vmem:[#allocation16 + $0x10] ss:$8 sps:$4 sm:$0xff]   ;;  %8231 = vmatpush3.bf16.msra.mxu0 %v9447_v14  ;;  %v9453_v53 = vld [vmem:[#allocation19 + $0x20] sm:$0xff]  }
 0xcdc   : > { %v5054_v27 = vpop.f32.mrf.mxu0  ;;  %v5296_v3 = vpop.f32.mrf.mxu1  ;;  %6736 = vmatpush1.bf16.msra.mxu1 %v9416_v8  ;;  %8232 = vmatprep.subr.bf16.mxu0 %v9448_v18 }
 0xcdd   : > { %v5060_v12 = vadd.f32 %v5054_v27, %v10709_v11  ;;  %v10714_v23 = vadd.f32 %v5292_v22, %v5059_v1  ;;  %6737 = vmatprep.subr.bf16.mxu1 %v9421_v61  ;;  %v9427_v11 = vld [vmem:[#allocation16 + $0xe4] ss:$8 sps:$4 sm:$0xff]   ;;  %v9455_v1 = vld [vmem:[#allocation19 + $0x18] sm:$0xff]   ;;  %v9456_v27 = vld [vmem:[#allocation19 + $0x50] sm:$0xff]  }
 0xcde   : > { %v5056_v48 = vpop.f32.mrf.mxu0  ;;  %v5297_v7 = vpop.f32.mrf.mxu1  ;;  %v9451_v22 = vld [vmem:[#allocation19 + $0x28] sm:$0xff]   ;;  %v9457_v3 = vld [vmem:[#allocation19 + $0x10] sm:$0xff]  }
 0xcdf   : > { %v10716_v59 = vadd.f32 %v5294_v24, %v5060_v12  ;;  %8233 = vmatpush3.bf16.msra.mxu0 %v9449_v20  ;;  %v9454_v24 = vld [vmem:[#allocation19 + $0x58] sm:$0xff]  }
 0xce0   : > { %v5057_v50 = vpop.f32.mrf.mxu0  ;;  %6738 = vmatpush1.bf16.msra.mxu1 %v9419_v25  ;;  %8234 = vmatprep.subr.bf16.mxu0 %v9450_v62 }
 0xce1   : > { %6739 = vmatprep.subr.bf16.mxu1 %v9424_v9 }
 0xce3   : > { %8235 = vmatpush3.bf16.msra.mxu0 %v9451_v22 }
 0xce4   : > { %6740 = vmatpush2.bf16.msra.mxu1 %v9422_v6  ;;  %8236 = vmatprep.subr.bf16.mxu0 %v9452_v2 }
 0xce5   : > { %6741 = vmatprep.subr.bf16.mxu1 %v9427_v11 }
 0xce7   : > { %8237 = vmatpush3.bf16.msra.mxu0 %v9453_v53 }
 0xce8   : > { %6742 = vmatpush2.bf16.msra.mxu1 %v9425_v26  ;;  %8238 = vmatprep.subr.bf16.mxu0 %v9454_v24 }
 0xce9   : > { %6743 = vmatprep.subr.bf16.mxu1 %v9430_v37 }
 0xceb   : > { %8239 = vmatpush3.bf16.msra.mxu0 %v9455_v1 }
 0xcec   : > { %6744 = vmatpush2.bf16.msra.mxu1 %v9428_v41  ;;  %8240 = vmatprep.subr.bf16.mxu0 %v9456_v27  ;;  %v9458_v41 = vld [vmem:[#allocation19 + $0x48] sm:$0xff]  }
 0xced   : > { %6745 = vmatprep.subr.bf16.mxu1 %v9433_v42  ;;  %v9459_v42 = vld [vmem:[#allocation19 + $0x8] sm:$0xff]  }
 0xcef   : > { %8241 = vmatpush3.bf16.msra.mxu0 %v9457_v3 }
 0xcf0   : > { %6746 = vmatpush2.bf16.msra.mxu1 %v9431_v38  ;;  %8242 = vmatprep.subr.bf16.mxu0 %v9458_v41  ;;  %v9460_v38 = vld [vmem:[#allocation19 + $0x40] sm:$0xff]  }
 0xcf1   : > { %6747 = vmatprep.subr.bf16.mxu1 %v9436_v35  ;;  %v9461_v35 = vld [vmem:[#allocation19] sm:$0xff]  }
 0xcf3   : > { %8243 = vmatpush3.bf16.msra.mxu0 %v9459_v42 }
 0xcf4   : > { %6748 = vmatpush2.bf16.msra.mxu1 %v9434_v39  ;;  %8244 = vmatprep.subr.bf16.mxu0 %v9460_v38  ;;  %v6551_v39 = vld [vmem:[#allocation17] sm:$0x3] }
 0xcf5   : > { %6749 = vmatprep.subr.bf16.mxu1 %v9439_v29  ;;  %v6720_v29 = vrot.slane %v6551_v39, %v10673_v54 }
 0xcf7   : > { %8245 = vmatpush3.bf16.msra.mxu0 %v9461_v35 }
 0xcf8   : > { %6750 = vmatpush2.bf16.msra.mxu1 %v9437_v33 }
 0xcf9   : > { %6751 = vmatprep.subr.bf16.mxu1 %v9442_v45 }
 0xcfc   : > { %6752 = vmatpush2.bf16.msra.mxu1 %v9440_v36 }
 0xcfd   : > { %6753 = vmatprep.subr.bf16.mxu1 %v9445_v47 }
 0xd00   : > { %6754 = vmatpush2.bf16.msra.mxu1 %v9443_v19 }
 0xd18   : > { %v5772_v44 = vpop.f32.mrf.mxu1 }
 0xd1a   : > { %v5532_v40 = vpop.f32.mrf.mxu0  ;;  %v5774_v16 = vpop.f32.mrf.mxu1 }
 0xd1b   : > { %v5539_v60 = vadd.f32 %v5532_v40, %v10714_v23 }
 0xd1c   : > { %v5534_v5 = vpop.f32.mrf.mxu0  ;;  %v5776_v13 = vpop.f32.mrf.mxu1 }
 0xd1d   : > { %v5540_v32 = vadd.f32 %v5534_v5, %v10716_v59  ;;  %v5779_v15 = vadd.f32 %v5772_v44, %v5539_v60  ;;  %v6716_v44 = vrot.slane %v6551_v39, %v10670_v58 }
 0xd1e   : > { %v5536_v10 = vpop.f32.mrf.mxu0  ;;  %v5777_v21 = vpop.f32.mrf.mxu1 }
 0xd1f   : > { %v5780_v17 = vadd.f32 %v5774_v16, %v5540_v32  ;;  %v6800_v21 = vld [vmem:[#allocation20] sm:$0x1] }
 0xd20   : > { %v5537_v46 = vpop.f32.mrf.mxu0 }
 0xd58   : > { %v6252_v12 = vpop.f32.mrf.mxu1 }
 0xd5a   : > { %v6012_v23 = vpop.f32.mrf.mxu0  ;;  %v6254_v48 = vpop.f32.mrf.mxu1 }
 0xd5b   : > { %v6019_v7 = vadd.f32 %v6012_v23, %v5779_v15 }
 0xd5c   : > { %v6014_v59 = vpop.f32.mrf.mxu0  ;;  %v6256_v50 = vpop.f32.mrf.mxu1 }
 0xd5d   : > { %v6020_v43 = vadd.f32 %v6014_v59, %v5780_v17  ;;  %v6259_v57 = vadd.f32 %v6252_v12, %v6019_v7 }
 0xd5e   : > { %v6016_v0 = vpop.f32.mrf.mxu0  ;;  %v6257_v34 = vpop.f32.mrf.mxu1 }
 0xd5f   : > { %v6260_v31 = vadd.f32 %v6254_v48, %v6020_v43 }
 0xd60   : > { %v6017_v30 = vpop.f32.mrf.mxu0 }
 0xd9a   : > { %v6492_v52 = vpop.f32.mrf.mxu0 }
 0xd9b   : > { %v6499_v28 = vadd.f32 %v6492_v52, %v6259_v57 }
 0xd9c   : > { %v6494_v55 = vpop.f32.mrf.mxu0 }
 0xd9d   : > { %v6513_v56 = vadd.f32 %v6506_v51, %v6499_v28  ;;  %v6500_v8 = vadd.f32 %v6494_v55, %v6260_v31 }
 0xd9e   : > { %v6496_v61 = vpop.f32.mrf.mxu0 }
 0xd9f   : > { %v6514_v25 = vadd.f32 %v6510_v4, %v6500_v8  ;;  %v6515_v9 = vmax.f32 %v6513_v56, 0.0 }
 0xda0   : > { %v6497_v6 = vpop.f32.mrf.mxu0 }
 0xda1   : > { %v6516_v11 = vmax.f32 %v6514_v25, 0.0  ;;  %v6517_v37 = vpack.c.bf16 %v6515_v9, %v6515_v9 }
 0xda3   : > { %v6518_v26 = vpack.c.bf16 %v6516_v11, %v6516_v11 }
 0xda5   : > { %6755 = vmatprep.mubr.bf16.mxu1 %v6518_v26 }
 0xda6   : > { %6756 = vmatmul.mubr.bf16.vlgmr.msra.gmra.mxu1 %v6517_v37 }
 0xe66   : > { %v6757_v33 = vpop.f32.mrf.mxu1 }
 0xe67   : > { %v6758_v40 = vadd.f32 %v6757_v33, %v6716_v44 }
 0xe68   : > { %v6759_v16 = vpop.f32.mrf.mxu1 }
 0xe69   : > { %v6760_v60 = vadd.f32 %v6759_v16, %v6720_v29  ;;  %v6764_v5 = vmax.f32 %v6758_v40, 0.0 }
 0xe6a   : > { %v6761_v13 = vpop.f32.mrf.mxu1 }
 0xe6b   : > { %v6765_v45 = vmax.f32 %v6760_v60, 0.0  ;;  %v6766_v36 = vpack.c.bf16 %v6764_v5, %v6764_v5 }
 0xe6c   : > { %v6762_v32 = vpop.f32.mrf.mxu1 }
 0xe6d   : > { %v6767_v15 = vpack.c.bf16 %v6765_v45, %v6765_v45 }
 0xe6f   : > { %6929 = vmatprep.mubr.bf16.mxu0 %v6767_v15 }
 0xe70   : > { %6930 = vmatmul.mubr.bf16.vlgmr.msra.gmra.mxu0 %v6766_v36 }
 0xf30   : > { %v8246_v10 = vpop.f32.mrf.mxu0 }
 0xf32   : > { %v8247_v58 = vpop.f32.mrf.mxu0 }
 0xf33   : > { %v8248_v54 = vadd.f32 %v8247_v58, %v8246_v10 }
 0xf34   : > { %v8249_v17 = vpop.f32.mrf.mxu0 }
 0xf35   : > { %v6932_v46 = vadd.f32 %v8248_v54, %v6800_v21 }
 0xf36   : > { %v8250_v47 = vpop.f32.mrf.mxu0 }
 0xf37   : > { %6937 = vst [vmem:[%s597_s25] sm:$0x1] %v6932_v46 }
 0xf38   : > { %9803 = shalt.err (!%p9800_p11)
}
 0xf39   : > { %s9804_s23 = scalar_lea.hbm %s10729_s16, 16  ;;  %s9808_s22 = scalar_lea.hbm %s10777_s13, 32 }
 0xf3a   : > { %p9805_p0 = scmp.ne.s32.totalorder %s10729_s16, %s9804_s23  ;;  %p9809_p2 = scmp.lt.s32.totalorder %s10729_s16, %s10777_s13 }
 0xf3b   : > { %p9810_p6 = scmp.lt.s32.totalorder %s9808_s22, %s9804_s23 }
 0xf3c   : > { %p9806_p1 = pnand %p9805_p0, %p10818_p10 }
 0xf3d   : > { %p9811_p5 = por %p9810_p6, %p9809_p2 }
 0xf3e   : > { %p9807_p9 = pneg %p9806_p1 }
 0xf40   : > { %p9812_p13 = pnand %p9811_p5, %p9807_p9 }
 0xf42   : > { %9815 = shalt.err (!%p9812_p13)
}
 0xf43   : > { %8507 = dma.vmem_to_hbm [thread:$0]  (%p10818_p10), %s6952_s15, 16, %s10729_s16, %s6939_s30  }
 0xf44 PF: > { %s10819_s27 = sld [smem:[#allocation33_spill]] }
 0xf45   : > { %s10820_s14 = sld [smem:[#allocation31_spill]] }
 0xf46   : > { %s10821_s24 = sld [smem:[#allocation36_spill]] }
 0xf4a   : > { %p8574_p3 = scmp.ge.s32.totalorder %s10819_s27, 2 }
 0xf4b   : > { %s6963_s29 = sand.u32 1, %s10820_s14  }
 0xf4c   : > { %p10822_p4 = scmp.ne.s32.totalorder %s10821_s24, 0  ;;  %s6964_s17 = scalar_lea.sflag [#allocation4], %s6963_s29 }
 0xf4e   : > { %p8547_p12 = pnand %p8574_p3, %p10822_p4 }
 0xf50   : > { %p8548_p7 = pneg %p8547_p12 }
 0xf52   : > { %9861 = dma.done.wait (%p8548_p7), %s6964_s17, 16  }
 0xf53   : > { %9863 = vsyncadd (%p8548_p7), %s6964_s17, 4294967280  ;;  %s10823_s28 = sld [smem:[#allocation34_spill]]  ;;  %s10826_s25 = smov %s9870_s26 }
 0xf54   : > { %s10824_s20 = sld [smem:[#allocation32_spill]] }
 0xf55   : > { %s10825_s27 = sld [smem:[#allocation35_spill]] }
 0xf59   : > { %p30_p8 = scmp.ge.s32.totalorder %s10823_s28, 4  }
 0xf5a   : > { %s10827_s26 = smov %s10824_s20 }
 0xf5b   :  { %32 = sbr.rel (!%p30_p8) target bundleno = 10 (0xa), region = 196 }
 0xf60   :  { %6968 = vsyncpa [#allocation3], 1 }
 0xf61   :  { %6970 = vsyncpa [#allocation3 + $0x1], 1 }
 0xf62   :  { %6971 = vsyncpa [#allocation6], 1 }
 0xf63   :  { %6972 = vsyncpa [#allocation9], 1 }
 0xf64   :  { %6973 = vsyncpa [#allocation12], 1 }
 0xf65   :  { %6974 = vsyncpa [#allocation15], 1 }
 0xf66   :  { %6975 = vsyncpa [#allocation18], 1 }
 0xf67   :  { %6976 = vsyncpa [#allocation21], 1 }
 0xf68   :  { %6977 = vsyncpa [#allocation4], 1 }
 0xf69   :  { %6979 = vsyncpa [#allocation4 + $0x1], 1 }

</bundles_post_ra>
